<compile_context>
chip_gen: v7x
topology: tpu7x:2x2x1
jax: 0.10.0
libtpu: 0.0.40
codegen_flags: <defaults>
</compile_context>

<pallas_src>
import functools

import numpy as np
import jax
import jax.numpy as jnp
from jax.experimental import pallas as pl
from jax.experimental.pallas import tpu as pltpu

# ----------------------------- configuration ------------------------------
SR = 16000
FRAME_LEN = 1024          # frame_length = 1024 samples
FRAME_SHIFT = 256         # frame_shift  = 256 samples (hop)
N_FFT = 1024
N_MELS = 80
# With low_freq=20 Hz, high_freq = SR/2 - 400 = 7600 Hz, the highest FFT bin
# with non-zero mel weight is 486, so only bins [0, 512) are ever needed.
KP = 512                  # retained real-FFT bins (exact w.r.t. the mel output)
MP = 128                  # 80 mel channels padded up to 128 lanes
PREEMPH = 0.97
EPS = 1e-10
MAX_TM = 512              # frames per tile (per grid step)


def _round_up(x, m):
    return -(-x // m) * m


# --------------------- deterministic constant tensors ---------------------
def _folded_dft():
    """Fused (I - J/N) @ P_preemph @ diag(w_povey) @ [cos | sin], float64 build.

    Row-vector convention: X_row = frame_row @ M.  Columns [0, KP) are the
    cosine (real) part, columns [KP, 2*KP) the sine part; only |X| is used so
    the sine sign convention is irrelevant.
    """
    n = np.arange(N_FFT, dtype=np.float64)[:, None]
    k = np.arange(KP, dtype=np.float64)[None, :]
    ang = 2.0 * np.pi * n * k / N_FFT
    dft = np.concatenate([np.cos(ang), np.sin(ang)], axis=1)        # (1024, 2*KP)

    i = np.arange(N_FFT, dtype=np.float64)
    win = (0.5 - 0.5 * np.cos(2.0 * np.pi * i / (N_FFT - 1))) ** 0.85  # povey

    pre = np.eye(N_FFT, dtype=np.float64)                           # Kaldi preemph
    pre[0, 0] = 1.0 - PREEMPH
    pre[np.arange(N_FFT - 1), np.arange(1, N_FFT)] = -PREEMPH

    dc = np.eye(N_FFT, dtype=np.float64) - np.full((N_FFT, N_FFT), 1.0 / N_FFT)

    m = dc @ pre @ (win[:, None] * dft)
    return m.astype(np.float32)


def _mel_filterbank():
    def mel(f):
        return 1127.0 * np.log(1.0 + f / 700.0)

    low_freq = 20.0
    high_freq = SR / 2.0 - 400.0      # lhotse default high_freq = -400 -> nyquist - 400
    mel_pts = np.linspace(mel(low_freq), mel(high_freq), N_MELS + 2)
    bin_mels = mel(np.arange(KP, dtype=np.float64) * SR / N_FFT)
    fb = np.zeros((KP, MP), dtype=np.float32)
    for m in range(N_MELS):
        l, c, r = mel_pts[m], mel_pts[m + 1], mel_pts[m + 2]
        up = (bin_mels - l) / (c - l)
        dn = (r - bin_mels) / (r - c)
        fb[:, m] = np.maximum(0.0, np.minimum(up, dn)).astype(np.float32)
    return fb


_DFT = jnp.asarray(_folded_dft(), dtype=jnp.bfloat16)      # (1024, 1024)
_MELFB = jnp.asarray(_mel_filterbank(), dtype=jnp.bfloat16)  # (512, 128)


# -------------------------------- kernel ----------------------------------
def _mel_l1_kernel(dft_ref, mel_ref,
                   yh_ref, yh_tail_ref, y_ref, y_tail_ref,
                   out_ref, acc_ref, *, n_frames):
    # acc_ref: per-batch (tm, MP) accumulator in VMEM scratch, resident across
    # the (arbitrary) frame-tile axis.  out_ref: lane-dense (1, MP) per batch.
    tm = acc_ref.shape[0]
    i = pl.program_id(1)
    last = pl.num_programs(1) - 1

    @pl.when(i == 0)
    def _():
        acc_ref[...] = jnp.zeros_like(acc_ref)

    def log_mel(hop_ref, tail_ref):
        # This tile's hops plus the next tile's first 8 hops -> (tm+8, 256) f32.
        h = jnp.concatenate([hop_ref[...], tail_ref[...]], axis=0)
        # Frame r = hops r..r+3.  All linear prep is folded into dft_ref, so the
        # real-DFT is 4 accumulating K=256 MXU dots over sublane-shifted slices
        # (no materialized (tm, 1024) frame matrix).
        reim = None
        for j in range(FRAME_LEN // FRAME_SHIFT):
            lhs = h[j:j + tm].astype(jnp.bfloat16)                     # (tm, 256)
            part = jnp.dot(lhs,
                           dft_ref[j * FRAME_SHIFT:(j + 1) * FRAME_SHIFT, :],
                           preferred_element_type=jnp.float32)         # (tm, 2*KP)
            reim = part if reim is None else reim + part
        re = reim[:, :KP]
        im = reim[:, KP:]
        p = re * re + im * im
        mag = p * jax.lax.rsqrt(p + 1e-30)                             # |X| via EUP
        mel = jnp.dot(mag.astype(jnp.bfloat16), mel_ref[...],
                      preferred_element_type=jnp.float32)              # (tm, MP)
        return jnp.log(jnp.maximum(mel, EPS))

    diff = jnp.abs(log_mel(yh_ref, yh_tail_ref) - log_mel(y_ref, y_tail_ref))

    @pl.when(i < last)
    def _():
        acc_ref[...] += diff

    @pl.when(i == last)
    def _():
        # Only the final tile can contain zero-padded frames -> mask them here.
        row = jax.lax.broadcasted_iota(jnp.int32, (tm, MP), 0) + i * tm
        acc_ref[...] += jnp.where(row < n_frames, diff, 0.0)
        # Collapse frames -> one lane-dense (1, 128) partial sum per batch.
        out_ref[...] = jnp.sum(acc_ref[...], axis=0, keepdims=True)


# ------------------------------- wrapper -----------------------------------
def mel_spectrogram_loss(y_hat, y):
    """y_hat, y: (B, 1, T) float32 waveforms.  Returns scalar L1 mel loss."""
    B, _, T = y_hat.shape
    assert T >= FRAME_LEN, "need at least one full frame"

    # TODO(synk): lhotse Wav2LogFilterBank uses snip_edges=False (reflection
    # padding) and optional dithering; here we use snip_edges=True framing and
    # dither=0, which matches the compute pipeline but not the edge frames.
    n_frames = 1 + (T - FRAME_LEN) // FRAME_SHIFT

    tm = min(MAX_TM, _round_up(n_frames, 8))     # frames per tile
    n_tiles = -(-n_frames // tm)
    n_hops = n_tiles * tm + 8        # +8 so the tail block is always in-bounds
    t_pad = n_hops * FRAME_SHIFT

    yh = jnp.pad(y_hat[:, 0, :].astype(jnp.float32), ((0, 0), (0, t_pad - T)))
    yg = jnp.pad(y[:, 0, :].astype(jnp.float32), ((0, 0), (0, t_pad - T)))
    yh_hops = yh.reshape(B, n_hops, FRAME_SHIFT)
    yg_hops = yg.reshape(B, n_hops, FRAME_SHIFT)

    hop_spec = pl.BlockSpec((None, tm, FRAME_SHIFT), lambda b, i: (b, i, 0))
    tail_spec = pl.BlockSpec((None, 8, FRAME_SHIFT),
                             lambda b, i: (b, (i + 1) * (tm // 8), 0))

    def const_spec(shape):
        return pl.BlockSpec(shape, lambda b, i: (0, 0))

    partial = pl.pallas_call(
        functools.partial(_mel_l1_kernel, n_frames=n_frames),
        out_shape=jax.ShapeDtypeStruct((B, 1, MP), jnp.float32),
        grid_spec=pltpu.PrefetchScalarGridSpec(
            num_scalar_prefetch=0,
            grid=(B, n_tiles),
            in_specs=[
                const_spec((FRAME_LEN, 2 * KP)),   # fused preproc+[cos|sin] DFT (bf16)
                const_spec((KP, MP)),              # mel filterbank (bf16)
                hop_spec, tail_spec,               # y_hat hops (+ 8-hop tail)
                hop_spec, tail_spec,               # y     hops (+ 8-hop tail)
            ],
            out_specs=pl.BlockSpec((None, 1, MP), lambda b, i: (b, 0, 0)),
            scratch_shapes=[pltpu.VMEM((tm, MP), jnp.float32)],
        ),
        compiler_params=pltpu.CompilerParams(
            dimension_semantics=("parallel", "arbitrary"),
            vmem_limit_bytes=48 << 20,
        ),
    )(_DFT, _MELFB, yh_hops, yh_hops, yg_hops, yg_hops)

    # F.l1_loss(...) -> mean over (B, num_frames, n_mels) real elements.
    # Padded frames are masked in-kernel; padded mel channels contribute 0.
    return jnp.sum(partial) / (B * n_frames * N_MELS)


# --------------------------------- main ------------------------------------
if __name__ == "__main__":
    key = jax.random.PRNGKey(0)
    k1, k2 = jax.random.split(key)
    B, T = 2, 4096
    y_hat = 0.1 * jax.random.normal(k1, (B, 1, T), dtype=jnp.float32)
    y = 0.1 * jax.random.normal(k2, (B, 1, T), dtype=jnp.float32)

    loss = jax.jit(mel_spectrogram_loss)(y_hat, y)
    jax.block_until_ready(loss)
    assert loss.shape == () and bool(jnp.isfinite(loss))
    print("KERNEL_OK")
</pallas_src>

<mosaic_0001>
module attributes {stable_mosaic.version = 11 : i64} {
  func.func @_mel_l1_kernel(%arg0: i32, %arg1: i32, %arg2: memref<1024x1024xbf16, #tpu.memory_space<vmem>>, %arg3: memref<512x128xbf16, #tpu.memory_space<vmem>>, %arg4: memref<1x16x256xf32, #tpu.memory_space<vmem>>, %arg5: memref<1x8x256xf32, #tpu.memory_space<vmem>>, %arg6: memref<1x16x256xf32, #tpu.memory_space<vmem>>, %arg7: memref<1x8x256xf32, #tpu.memory_space<vmem>>, %arg8: memref<1x1x128xf32, #tpu.memory_space<vmem>>, %arg9: memref<16x128xf32, #tpu.memory_space<vmem>>) attributes {dimension_semantics = [#tpu.dimension_semantics<parallel>, #tpu.dimension_semantics<arbitrary>], iteration_bounds = array<i64: 2, 1>, scalar_prefetch = 0 : i64, scratch_operands = 1 : i64, tpu.core_type = #tpu.core_type<tc>, window_params = [{pipeline_mode = #tpu.pipeline_mode<synchronous>, transform_indices = @transform_0, window_bounds = array<i64: 1024, 1024>}, {pipeline_mode = #tpu.pipeline_mode<synchronous>, transform_indices = @transform_1, window_bounds = array<i64: 512, 128>}, {transform_indices = @transform_2, window_bounds = array<i64: 1, 16, 256>}, {transform_indices = @transform_3, window_bounds = array<i64: 1, 8, 256>}, {transform_indices = @transform_4, window_bounds = array<i64: 1, 16, 256>}, {transform_indices = @transform_5, window_bounds = array<i64: 1, 8, 256>}, {transform_indices = @transform_6, window_bounds = array<i64: 1, 1, 128>}]} {
    %c0_i32 = arith.constant 0 : i32
    %0 = arith.cmpi eq, %arg1, %c0_i32 : i32
    %1 = arith.extui %0 : i1 to i32
    %c0_i32_0 = arith.constant 0 : i32
    %2 = arith.cmpi ne, %1, %c0_i32_0 : i32
    scf.if %2 {
      %cst_46 = arith.constant 0.000000e+00 : f32
      %89 = vector.broadcast %cst_46 : f32 to vector<16x128xf32>
      %c0_47 = arith.constant 0 : index
      %c0_48 = arith.constant 0 : index
      %90 = vector.load %arg9[%c0_47, %c0_48] : memref<16x128xf32, #tpu.memory_space<vmem>>, vector<16x128xf32>
      tpu.vector_store %arg9[%c0_47, %c0_48], %89 {strides = array<i32>} : memref<16x128xf32, #tpu.memory_space<vmem>>, vector<16x128xf32>,
    } else {
    }
    %c0 = arith.constant 0 : index
    %c0_1 = arith.constant 0 : index
    %c0_2 = arith.constant 0 : index
    %3 = vector.load %arg4[%c0, %c0_1, %c0_2] : memref<1x16x256xf32, #tpu.memory_space<vmem>>, vector<1x16x256xf32>
    %4 = vector.shape_cast %3 : vector<1x16x256xf32> to vector<16x256xf32>
    %c0_3 = arith.constant 0 : index
    %c0_4 = arith.constant 0 : index
    %c0_5 = arith.constant 0 : index
    %5 = vector.load %arg5[%c0_3, %c0_4, %c0_5] : memref<1x8x256xf32, #tpu.memory_space<vmem>>, vector<1x8x256xf32>
    %6 = vector.shape_cast %5 : vector<1x8x256xf32> to vector<8x256xf32>
    %7 = tpu.concatenate %4, %6 in 0 : vector<16x256xf32>, vector<8x256xf32> -> vector<24x256xf32>
    %8 = vector.extract_strided_slice %7 {offsets = [0, 0], sizes = [16, 256], strides = [1, 1]} : vector<24x256xf32> to vector<16x256xf32>
    %9 = arith.truncf %8 : vector<16x256xf32> to vector<16x256xbf16>
    %c0_6 = arith.constant 0 : index
    %c0_7 = arith.constant 0 : index
    %10 = vector.load %arg2[%c0_6, %c0_7] : memref<1024x1024xbf16, #tpu.memory_space<vmem>>, vector<256x1024xbf16>
    %cst = arith.constant dense<0.000000e+00> : vector<16x1024xf32>
    %11 = tpu.matmul %9, %10, %cst {dimension_numbers = #tpu.dot_dimension_numbers<[1], [0], [0], [1], [0, 0, 1, 1], [], []>} : vector<16x256xbf16>, vector<256x1024xbf16>, vector<16x1024xf32> -> vector<16x1024xf32>
    %12 = vector.extract_strided_slice %7 {offsets = [1, 0], sizes = [16, 256], strides = [1, 1]} : vector<24x256xf32> to vector<16x256xf32>
    %13 = arith.truncf %12 : vector<16x256xf32> to vector<16x256xbf16>
    %c256 = arith.constant 256 : index
    %c0_8 = arith.constant 0 : index
    %14 = vector.load %arg2[%c256, %c0_8] : memref<1024x1024xbf16, #tpu.memory_space<vmem>>, vector<256x1024xbf16>
    %cst_9 = arith.constant dense<0.000000e+00> : vector<16x1024xf32>
    %15 = tpu.matmul %13, %14, %cst_9 {dimension_numbers = #tpu.dot_dimension_numbers<[1], [0], [0], [1], [0, 0, 1, 1], [], []>} : vector<16x256xbf16>, vector<256x1024xbf16>, vector<16x1024xf32> -> vector<16x1024xf32>
    %16 = arith.addf %11, %15 : vector<16x1024xf32>
    %17 = vector.extract_strided_slice %7 {offsets = [2, 0], sizes = [16, 256], strides = [1, 1]} : vector<24x256xf32> to vector<16x256xf32>
    %18 = arith.truncf %17 : vector<16x256xf32> to vector<16x256xbf16>
    %c512 = arith.constant 512 : index
    %c0_10 = arith.constant 0 : index
    %19 = vector.load %arg2[%c512, %c0_10] : memref<1024x1024xbf16, #tpu.memory_space<vmem>>, vector<256x1024xbf16>
    %cst_11 = arith.constant dense<0.000000e+00> : vector<16x1024xf32>
    %20 = tpu.matmul %18, %19, %cst_11 {dimension_numbers = #tpu.dot_dimension_numbers<[1], [0], [0], [1], [0, 0, 1, 1], [], []>} : vector<16x256xbf16>, vector<256x1024xbf16>, vector<16x1024xf32> -> vector<16x1024xf32>
    %21 = arith.addf %16, %20 : vector<16x1024xf32>
    %22 = vector.extract_strided_slice %7 {offsets = [3, 0], sizes = [16, 256], strides = [1, 1]} : vector<24x256xf32> to vector<16x256xf32>
    %23 = arith.truncf %22 : vector<16x256xf32> to vector<16x256xbf16>
    %c768 = arith.constant 768 : index
    %c0_12 = arith.constant 0 : index
    %24 = vector.load %arg2[%c768, %c0_12] : memref<1024x1024xbf16, #tpu.memory_space<vmem>>, vector<256x1024xbf16>
    %cst_13 = arith.constant dense<0.000000e+00> : vector<16x1024xf32>
    %25 = tpu.matmul %23, %24, %cst_13 {dimension_numbers = #tpu.dot_dimension_numbers<[1], [0], [0], [1], [0, 0, 1, 1], [], []>} : vector<16x256xbf16>, vector<256x1024xbf16>, vector<16x1024xf32> -> vector<16x1024xf32>
    %26 = arith.addf %21, %25 : vector<16x1024xf32>
    %27 = vector.extract_strided_slice %26 {offsets = [0, 0], sizes = [16, 512], strides = [1, 1]} : vector<16x1024xf32> to vector<16x512xf32>
    %28 = vector.extract_strided_slice %26 {offsets = [0, 512], sizes = [16, 512], strides = [1, 1]} : vector<16x1024xf32> to vector<16x512xf32>
    %29 = arith.mulf %27, %27 : vector<16x512xf32>
    %30 = arith.mulf %28, %28 : vector<16x512xf32>
    %31 = arith.addf %29, %30 : vector<16x512xf32>
    %cst_14 = arith.constant 1.000000e-30 : f32
    %32 = vector.broadcast %cst_14 : f32 to vector<16x512xf32>
    %33 = arith.addf %31, %32 : vector<16x512xf32>
    %34 = math.rsqrt %33 : vector<16x512xf32>
    %35 = arith.mulf %31, %34 : vector<16x512xf32>
    %36 = arith.truncf %35 : vector<16x512xf32> to vector<16x512xbf16>
    %c0_15 = arith.constant 0 : index
    %c0_16 = arith.constant 0 : index
    %37 = vector.load %arg3[%c0_15, %c0_16] : memref<512x128xbf16, #tpu.memory_space<vmem>>, vector<512x128xbf16>
    %cst_17 = arith.constant dense<0.000000e+00> : vector<16x128xf32>
    %38 = tpu.matmul %36, %37, %cst_17 {dimension_numbers = #tpu.dot_dimension_numbers<[1], [0], [0], [1], [0, 0, 1, 1], [], []>} : vector<16x512xbf16>, vector<512x128xbf16>, vector<16x128xf32> -> vector<16x128xf32>
    %cst_18 = arith.constant 1.000000e-10 : f32
    %39 = vector.broadcast %cst_18 : f32 to vector<16x128xf32>
    %40 = arith.maximumf %38, %39 : vector<16x128xf32>
    %41 = math.log %40 : vector<16x128xf32>
    %c0_19 = arith.constant 0 : index
    %c0_20 = arith.constant 0 : index
    %c0_21 = arith.constant 0 : index
    %42 = vector.load %arg6[%c0_19, %c0_20, %c0_21] : memref<1x16x256xf32, #tpu.memory_space<vmem>>, vector<1x16x256xf32>
    %43 = vector.shape_cast %42 : vector<1x16x256xf32> to vector<16x256xf32>
    %c0_22 = arith.constant 0 : index
    %c0_23 = arith.constant 0 : index
    %c0_24 = arith.constant 0 : index
    %44 = vector.load %arg7[%c0_22, %c0_23, %c0_24] : memref<1x8x256xf32, #tpu.memory_space<vmem>>, vector<1x8x256xf32>
    %45 = vector.shape_cast %44 : vector<1x8x256xf32> to vector<8x256xf32>
    %46 = tpu.concatenate %43, %45 in 0 : vector<16x256xf32>, vector<8x256xf32> -> vector<24x256xf32>
    %47 = vector.extract_strided_slice %46 {offsets = [0, 0], sizes = [16, 256], strides = [1, 1]} : vector<24x256xf32> to vector<16x256xf32>
    %48 = arith.truncf %47 : vector<16x256xf32> to vector<16x256xbf16>
    %c0_25 = arith.constant 0 : index
    %c0_26 = arith.constant 0 : index
    %49 = vector.load %arg2[%c0_25, %c0_26] : memref<1024x1024xbf16, #tpu.memory_space<vmem>>, vector<256x1024xbf16>
    %cst_27 = arith.constant dense<0.000000e+00> : vector<16x1024xf32>
    %50 = tpu.matmul %48, %49, %cst_27 {dimension_numbers = #tpu.dot_dimension_numbers<[1], [0], [0], [1], [0, 0, 1, 1], [], []>} : vector<16x256xbf16>, vector<256x1024xbf16>, vector<16x1024xf32> -> vector<16x1024xf32>
    %51 = vector.extract_strided_slice %46 {offsets = [1, 0], sizes = [16, 256], strides = [1, 1]} : vector<24x256xf32> to vector<16x256xf32>
    %52 = arith.truncf %51 : vector<16x256xf32> to vector<16x256xbf16>
    %c256_28 = arith.constant 256 : index
    %c0_29 = arith.constant 0 : index
    %53 = vector.load %arg2[%c256_28, %c0_29] : memref<1024x1024xbf16, #tpu.memory_space<vmem>>, vector<256x1024xbf16>
    %cst_30 = arith.constant dense<0.000000e+00> : vector<16x1024xf32>
    %54 = tpu.matmul %52, %53, %cst_30 {dimension_numbers = #tpu.dot_dimension_numbers<[1], [0], [0], [1], [0, 0, 1, 1], [], []>} : vector<16x256xbf16>, vector<256x1024xbf16>, vector<16x1024xf32> -> vector<16x1024xf32>
    %55 = arith.addf %50, %54 : vector<16x1024xf32>
    %56 = vector.extract_strided_slice %46 {offsets = [2, 0], sizes = [16, 256], strides = [1, 1]} : vector<24x256xf32> to vector<16x256xf32>
    %57 = arith.truncf %56 : vector<16x256xf32> to vector<16x256xbf16>
    %c512_31 = arith.constant 512 : index
    %c0_32 = arith.constant 0 : index
    %58 = vector.load %arg2[%c512_31, %c0_32] : memref<1024x1024xbf16, #tpu.memory_space<vmem>>, vector<256x1024xbf16>
    %cst_33 = arith.constant dense<0.000000e+00> : vector<16x1024xf32>
    %59 = tpu.matmul %57, %58, %cst_33 {dimension_numbers = #tpu.dot_dimension_numbers<[1], [0], [0], [1], [0, 0, 1, 1], [], []>} : vector<16x256xbf16>, vector<256x1024xbf16>, vector<16x1024xf32> -> vector<16x1024xf32>
    %60 = arith.addf %55, %59 : vector<16x1024xf32>
    %61 = vector.extract_strided_slice %46 {offsets = [3, 0], sizes = [16, 256], strides = [1, 1]} : vector<24x256xf32> to vector<16x256xf32>
    %62 = arith.truncf %61 : vector<16x256xf32> to vector<16x256xbf16>
    %c768_34 = arith.constant 768 : index
    %c0_35 = arith.constant 0 : index
    %63 = vector.load %arg2[%c768_34, %c0_35] : memref<1024x1024xbf16, #tpu.memory_space<vmem>>, vector<256x1024xbf16>
    %cst_36 = arith.constant dense<0.000000e+00> : vector<16x1024xf32>
    %64 = tpu.matmul %62, %63, %cst_36 {dimension_numbers = #tpu.dot_dimension_numbers<[1], [0], [0], [1], [0, 0, 1, 1], [], []>} : vector<16x256xbf16>, vector<256x1024xbf16>, vector<16x1024xf32> -> vector<16x1024xf32>
    %65 = arith.addf %60, %64 : vector<16x1024xf32>
    %66 = vector.extract_strided_slice %65 {offsets = [0, 0], sizes = [16, 512], strides = [1, 1]} : vector<16x1024xf32> to vector<16x512xf32>
    %67 = vector.extract_strided_slice %65 {offsets = [0, 512], sizes = [16, 512], strides = [1, 1]} : vector<16x1024xf32> to vector<16x512xf32>
    %68 = arith.mulf %66, %66 : vector<16x512xf32>
    %69 = arith.mulf %67, %67 : vector<16x512xf32>
    %70 = arith.addf %68, %69 : vector<16x512xf32>
    %cst_37 = arith.constant 1.000000e-30 : f32
    %71 = vector.broadcast %cst_37 : f32 to vector<16x512xf32>
    %72 = arith.addf %70, %71 : vector<16x512xf32>
    %73 = math.rsqrt %72 : vector<16x512xf32>
    %74 = arith.mulf %70, %73 : vector<16x512xf32>
    %75 = arith.truncf %74 : vector<16x512xf32> to vector<16x512xbf16>
    %c0_38 = arith.constant 0 : index
    %c0_39 = arith.constant 0 : index
    %76 = vector.load %arg3[%c0_38, %c0_39] : memref<512x128xbf16, #tpu.memory_space<vmem>>, vector<512x128xbf16>
    %cst_40 = arith.constant dense<0.000000e+00> : vector<16x128xf32>
    %77 = tpu.matmul %75, %76, %cst_40 {dimension_numbers = #tpu.dot_dimension_numbers<[1], [0], [0], [1], [0, 0, 1, 1], [], []>} : vector<16x512xbf16>, vector<512x128xbf16>, vector<16x128xf32> -> vector<16x128xf32>
    %cst_41 = arith.constant 1.000000e-10 : f32
    %78 = vector.broadcast %cst_41 : f32 to vector<16x128xf32>
    %79 = arith.maximumf %77, %78 : vector<16x128xf32>
    %80 = math.log %79 : vector<16x128xf32>
    %81 = arith.subf %41, %80 : vector<16x128xf32>
    %82 = math.absf %81 : vector<16x128xf32>
    %c0_i32_42 = arith.constant 0 : i32
    %83 = arith.cmpi slt, %arg1, %c0_i32_42 : i32
    %84 = arith.extui %83 : i1 to i32
    %c0_i32_43 = arith.constant 0 : i32
    %85 = arith.cmpi ne, %84, %c0_i32_43 : i32
    scf.if %85 {
      %c0_46 = arith.constant 0 : index
      %c0_47 = arith.constant 0 : index
      %89 = vector.load %arg9[%c0_46, %c0_47] : memref<16x128xf32, #tpu.memory_space<vmem>>, vector<16x128xf32>
      %90 = arith.addf %89, %82 : vector<16x128xf32>
      %c0_48 = arith.constant 0 : index
      %c0_49 = arith.constant 0 : index
      %91 = vector.load %arg9[%c0_48, %c0_49] : memref<16x128xf32, #tpu.memory_space<vmem>>, vector<16x128xf32>
      tpu.vector_store %arg9[%c0_48, %c0_49], %90 {strides = array<i32>} : memref<16x128xf32, #tpu.memory_space<vmem>>, vector<16x128xf32>,
    } else {
    }
    %c0_i32_44 = arith.constant 0 : i32
    %86 = arith.cmpi eq, %arg1, %c0_i32_44 : i32
    %87 = arith.extui %86 : i1 to i32
    %c0_i32_45 = arith.constant 0 : i32
    %88 = arith.cmpi ne, %87, %c0_i32_45 : i32
    scf.if %88 {
      %89 = tpu.iota {dimensions = array<i32: 0>} : vector<16x128xi32>
      %c16_i32 = arith.constant 16 : i32
      %90 = arith.muli %arg1, %c16_i32 : i32
      %91 = vector.broadcast %90 : i32 to vector<16x128xi32>
      %92 = arith.addi %89, %91 : vector<16x128xi32>
      %c0_46 = arith.constant 0 : index
      %c0_47 = arith.constant 0 : index
      %93 = vector.load %arg9[%c0_46, %c0_47] : memref<16x128xf32, #tpu.memory_space<vmem>>, vector<16x128xf32>
      %c13_i32 = arith.constant 13 : i32
      %94 = vector.broadcast %c13_i32 : i32 to vector<16x128xi32>
      %95 = arith.cmpi slt, %92, %94 : vector<16x128xi32>
      %cst_48 = arith.constant 0.000000e+00 : f32
      %96 = vector.broadcast %cst_48 : f32 to vector<16x128xf32>
      %97 = arith.select %95, %82, %96 : vector<16x128xi1>, vector<16x128xf32>
      %98 = arith.addf %93, %97 : vector<16x128xf32>
      %c0_49 = arith.constant 0 : index
      %c0_50 = arith.constant 0 : index
      %99 = vector.load %arg9[%c0_49, %c0_50] : memref<16x128xf32, #tpu.memory_space<vmem>>, vector<16x128xf32>
      tpu.vector_store %arg9[%c0_49, %c0_50], %98 {strides = array<i32>} : memref<16x128xf32, #tpu.memory_space<vmem>>, vector<16x128xf32>,
      %c0_51 = arith.constant 0 : index
      %c0_52 = arith.constant 0 : index
      %100 = vector.load %arg9[%c0_51, %c0_52] : memref<16x128xf32, #tpu.memory_space<vmem>>, vector<16x128xf32>
      %cst_53 = arith.constant dense<0.000000e+00> : vector<128xf32>
      %101 = vector.multi_reduction <add>, %100, %cst_53 [0] : vector<16x128xf32> to vector<128xf32>
      %102 = vector.shape_cast %101 : vector<128xf32> to vector<1x128xf32>
      %c0_54 = arith.constant 0 : index
      %c0_55 = arith.constant 0 : index
      %c0_56 = arith.constant 0 : index
      %103 = vector.load %arg8[%c0_54, %c0_55, %c0_56] : memref<1x1x128xf32, #tpu.memory_space<vmem>>, vector<1x1x128xf32>
      %104 = vector.shape_cast %103 : vector<1x1x128xf32> to vector<1x128xf32>
      %105 = vector.shape_cast %102 : vector<1x128xf32> to vector<1x1x128xf32>
      tpu.vector_store %arg8[%c0_54, %c0_55, %c0_56], %105 {strides = array<i32>} : memref<1x1x128xf32, #tpu.memory_space<vmem>>, vector<1x1x128xf32>,
    } else {
    }
    return
  }
  func.func @transform_0(%arg0: i32, %arg1: i32) -> (i32, i32) {
    %c0_i32 = arith.constant 0 : i32
    %c0_i32_0 = arith.constant 0 : i32
    %c0_i32_1 = arith.constant 0 : i32
    return %c0_i32, %c0_i32_0 : i32, i32
  }
  func.func @transform_1(%arg0: i32, %arg1: i32) -> (i32, i32) {
    %c0_i32 = arith.constant 0 : i32
    %c0_i32_0 = arith.constant 0 : i32
    %c0_i32_1 = arith.constant 0 : i32
    return %c0_i32, %c0_i32_0 : i32, i32
  }
  func.func @transform_2(%arg0: i32, %arg1: i32) -> (i32, i32, i32) {
    %c0_i32 = arith.constant 0 : i32
    %c0_i32_0 = arith.constant 0 : i32
    return %arg0, %arg1, %c0_i32 : i32, i32, i32
  }
  func.func @transform_3(%arg0: i32, %arg1: i32) -> (i32, i32, i32) {
    %c1_i32 = arith.constant 1 : i32
    %0 = arith.addi %arg1, %c1_i32 : i32
    %c2_i32 = arith.constant 2 : i32
    %1 = arith.muli %0, %c2_i32 : i32
    %c0_i32 = arith.constant 0 : i32
    %c0_i32_0 = arith.constant 0 : i32
    return %arg0, %1, %c0_i32 : i32, i32, i32
  }
  func.func @transform_4(%arg0: i32, %arg1: i32) -> (i32, i32, i32) {
    %c0_i32 = arith.constant 0 : i32
    %c0_i32_0 = arith.constant 0 : i32
    return %arg0, %arg1, %c0_i32 : i32, i32, i32
  }
  func.func @transform_5(%arg0: i32, %arg1: i32) -> (i32, i32, i32) {
    %c1_i32 = arith.constant 1 : i32
    %0 = arith.addi %arg1, %c1_i32 : i32
    %c2_i32 = arith.constant 2 : i32
    %1 = arith.muli %0, %c2_i32 : i32
    %c0_i32 = arith.constant 0 : i32
    %c0_i32_0 = arith.constant 0 : i32
    return %arg0, %1, %c0_i32 : i32, i32, i32
  }
  func.func @transform_6(%arg0: i32, %arg1: i32) -> (i32, i32, i32) {
    %c0_i32 = arith.constant 0 : i32
    %c0_i32_0 = arith.constant 0 : i32
    %c0_i32_1 = arith.constant 0 : i32
    return %arg0, %c0_i32, %c0_i32_0 : i32, i32, i32
  }
}

</mosaic_0001>

<bundles_post_ra>
// kernel: mel_spectrogram_loss.1
= control target key start
LH: loop header
LB: loop body
LE: loop exit
PB: predicated region body
PF: predicated region fallthrough
CT: control target
= control target key end

     0   :  { %s6762_s21 = smov 0   ;;  %s6764_s22 = smov 0   ;;  %s10813_s0 = inlined_call_operand.vmem [shape: bf16[1024,1024], index: 0, kind: input, shape index: {}]   ;;  %s10814_s1 = inlined_call_operand.vmem [shape: bf16[512,128], index: 1, kind: input, shape index: {}]   ;;  %s10815_s2 = inlined_call_operand.vmem [shape: f32[2,24,256], index: 2, kind: input, shape index: {}, may-alias: {2,3}]   ;;  %s10816_s3 = inlined_call_operand.vmem [shape: f32[2,24,256], index: 3, kind: input, shape index: {}, may-alias: {2,3}]   ;;  %s10817_s4 = inlined_call_operand.vmem [shape: f32[2,24,256], index: 4, kind: input, shape index: {}, may-alias: {4,5}]   ;;  %s10818_s5 = inlined_call_operand.vmem [shape: f32[2,24,256], index: 5, kind: input, shape index: {}, may-alias: {4,5}]   ;;  %s10819_s6 = inlined_call_operand.vmem [shape: f32[2,1,128], index: 6, kind: output, shape index: {}]  }
   0x1   :  { %s6766_s23 = smov 0  }
   0x2 LB: > { %s28_s24 = sadd.s32 1, %s6721_s22  ;;  %p5833_p0 = scmp.ge.s32.totalorder %s6725_s23, 1  ;;  %s6725_s23 = sphi %s6766_s23, %s16_s23   ;;  %s6721_s22 = sphi %s6764_s22, %s12278_s22   ;;  %s6717_s21 = sphi %s6762_s21, %s12277_s21  }
   0x3   : > { %p30_p1 = scmp.ge.s32.totalorder %s28_s24, 2  ;;  %p318_p2 = scmp.lt.s32.totalorder %s6725_s23, 3 }
   0x5   : > { %s12280_s24 = smov (%p30_p1, %s28_s24), 0  ;;  %p319_p3 = pnand %p5833_p0, %p318_p2 }
   0x7   : > { %322 = sbr.rel (%p319_p3) target bundleno = 1777 (0x6f1), region = 44 }
   0xe   : > { %v609_v0 = vld [vmem:[%s10813_s0 + $0x400] sm:$0xff]  ;;  %v610_v2 = vld [vmem:[%s10813_s0 + $0x408] sm:$0xff]  ;;  %p399_p4 = scmp.lt.s32.totalorder %s6717_s21, 1  ;;  %vm737_vm0 = vsmask.f32 7424  ;;  %vm2520_vm1 = vcmask 1046528  }
   0xf   : > { %v613_v1 = vld [vmem:[%s10813_s0 + $0x420] sm:$0xff]  ;;  %v614_v4 = vld [vmem:[%s10813_s0 + $0x428] sm:$0xff]  ;;  %vm3485_vm2 = vsmask.f32 6400 }
  0x10   : > { %v6792_v3 = vcombine.high %v609_v0, %v613_v1  ;;  %v6797_v5 = vcombine.low %v609_v0, %v613_v1  ;;  %v617_v6 = vld [vmem:[%s10813_s0 + $0x440] sm:$0xff]  ;;  %v6805_v8 = vcombine.high %v610_v2, %v614_v4  ;;  %v6807_v9 = vcombine.low %v610_v2, %v614_v4  ;;  %v618_v11 = vld [vmem:[%s10813_s0 + $0x448] sm:$0xff]  ;;  %s12282_s21 = smov (!%p399_p4, %s6717_s21), 1 }
  0x11   : > { %v621_v7 = vld [vmem:[%s10813_s0 + $0x460] sm:$0xff]  ;;  %v622_v12 = vld [vmem:[%s10813_s0 + $0x468] sm:$0xff]  ;;  %s6890_s25 = smul.u32 48, %s12282_s21  ;;  %s463_s11 = scalar_lea.vmem %s10819_s6, %s12282_s21 }
  0x12   : > { %v6809_v10 = vcombine.high %v617_v6, %v621_v7  ;;  %v625_v13 = vld [vmem:[%s10813_s0 + $0x480] sm:$0xff]  ;;  %1404 = vmatprep.subr.bf16.mxu0 %v6792_v3  ;;  %v6821_v14 = vcombine.high %v618_v11, %v622_v12  ;;  %v626_v16 = vld [vmem:[%s10813_s0 + $0x488] sm:$0xff]  ;;  %1447 = vmatprep.subr.bf16.mxu1 %v6805_v8  ;;  %v6839_v18 = vcombine.low %v617_v6, %v621_v7 }
  0x13   : > { %v629_v15 = vld [vmem:[%s10813_s0 + $0x4a0] sm:$0xff]  ;;  %v630_v17 = vld [vmem:[%s10813_s0 + $0x4a8] sm:$0xff]  ;;  %1405 = vmatpush1.bf16.msra.mxu0 %v6797_v5  ;;  %1448 = vmatpush1.bf16.msra.mxu1 %v6807_v9  ;;  %v6843_v19 = vcombine.low %v618_v11, %v622_v12  ;;  %s6385_s10 = sadd.s32 32, %s6890_s25  ;;  %s6936_s17 = scalar_lea.vmem %s10815_s2, %s6890_s25 }
  0x14   : > { %1406 = vmatprep.subr.bf16.mxu0 %v6809_v10  ;;  %v6845_v20 = vcombine.high %v625_v13, %v629_v15  ;;  %1449 = vmatprep.subr.bf16.mxu1 %v6821_v14  ;;  %v6848_v21 = vcombine.high %v626_v16, %v630_v17  ;;  %v633_v22 = vld [vmem:[%s10813_s0 + $0x4c0] sm:$0xff]  ;;  %v634_v24 = vld [vmem:[%s10813_s0 + $0x4c8] sm:$0xff]  ;;  %v6863_v26 = vcombine.low %v625_v13, %v629_v15  ;;  %s6949_s29 = scalar_lea.vmem %s10816_s3, %s6385_s10  ;;  %v474_v57 = vld [vmem:[%s6936_s17 + $0x18] sm:$0xff]  ;;  %s10079_s26 = scalar_lea.vmem %s10817_s4, %s6890_s25 }
  0x15   : > { %v637_v23 = vld [vmem:[%s10813_s0 + $0x4e0] sm:$0xff]  ;;  %v638_v25 = vld [vmem:[%s10813_s0 + $0x4e8] sm:$0xff]  ;;  %v6867_v27 = vcombine.low %v626_v16, %v630_v17  ;;  %s10088_s28 = scalar_lea.vmem %s10818_s5, %s6385_s10 }
  0x16   : > { %v6869_v28 = vcombine.high %v633_v22, %v637_v23  ;;  %v6872_v29 = vcombine.high %v634_v24, %v638_v25  ;;  %v641_v30 = vld [vmem:[%s10813_s0 + $0x500] sm:$0xff]  ;;  %v642_v32 = vld [vmem:[%s10813_s0 + $0x508] sm:$0xff]  ;;  %v6887_v34 = vcombine.low %v633_v22, %v637_v23  ;;  %v6894_v35 = vcombine.low %v634_v24, %v638_v25 }
  0x17   : > { %1407 = vmatpush1.bf16.msra.mxu0 %v6839_v18  ;;  %1450 = vmatpush1.bf16.msra.mxu1 %v6843_v19  ;;  %v645_v31 = vld [vmem:[%s10813_s0 + $0x520] sm:$0xff]  ;;  %v646_v33 = vld [vmem:[%s10813_s0 + $0x528] sm:$0xff] }
  0x18   : > { %1408 = vmatprep.subr.bf16.mxu0 %v6845_v20  ;;  %1451 = vmatprep.subr.bf16.mxu1 %v6848_v21  ;;  %v6896_v36 = vcombine.high %v641_v30, %v645_v31  ;;  %v6899_v37 = vcombine.high %v642_v32, %v646_v33  ;;  %v649_v38 = vld [vmem:[%s10813_s0 + $0x540] sm:$0xff]  ;;  %v650_v40 = vld [vmem:[%s10813_s0 + $0x548] sm:$0xff]  ;;  %v6914_v42 = vcombine.low %v641_v30, %v645_v31 }
  0x19   : > { %v653_v39 = vld [vmem:[%s10813_s0 + $0x560] sm:$0xff]  ;;  %v654_v41 = vld [vmem:[%s10813_s0 + $0x568] sm:$0xff]  ;;  %v6919_v43 = vcombine.low %v642_v32, %v646_v33 }
  0x1a   : > { %v6921_v44 = vcombine.high %v649_v38, %v653_v39  ;;  %v6924_v45 = vcombine.high %v650_v40, %v654_v41  ;;  %v657_v46 = vld [vmem:[%s10813_s0 + $0x580] sm:$0xff]  ;;  %v658_v48 = vld [vmem:[%s10813_s0 + $0x588] sm:$0xff]  ;;  %v6952_v50 = vcombine.low %v649_v38, %v653_v39  ;;  %v6956_v51 = vcombine.low %v650_v40, %v654_v41 }
  0x1b   : > { %1409 = vmatpush1.bf16.msra.mxu0 %v6863_v26  ;;  %1452 = vmatpush1.bf16.msra.mxu1 %v6867_v27  ;;  %v661_v47 = vld [vmem:[%s10813_s0 + $0x5a0] sm:$0xff]  ;;  %v662_v49 = vld [vmem:[%s10813_s0 + $0x5a8] sm:$0xff] }
  0x1c   : > { %1410 = vmatprep.subr.bf16.mxu0 %v6869_v28  ;;  %1453 = vmatprep.subr.bf16.mxu1 %v6872_v29  ;;  %v6958_v52 = vcombine.high %v657_v46, %v661_v47  ;;  %v665_v53 = vld [vmem:[%s10813_s0 + $0x5c0] sm:$0xff]  ;;  %v472_v54 = vld [vmem:[%s6936_s17 + $0x8] sm:$0xff]  ;;  %v6965_v55 = vcombine.high %v658_v48, %v662_v49  ;;  %v6983_v63 = vcombine.low %v657_v46, %v661_v47 }
  0x1d   : > { %v669_v56 = vld [vmem:[%s10813_s0 + $0x5e0] sm:$0xff]  ;;  %v476_v58 = vld [vmem:[%s6949_s29 + $0x8] sm:$0xff]  ;;  %v6978_v61 = vpack.c.bf16 %v474_v57, %v472_v54  ;;  %v6985_v0 = vcombine.low %v658_v48, %v662_v49 }
  0x1e   : > { %v666_v59 = vld [vmem:[%s10813_s0 + $0x5c8] sm:$0xff]  ;;  %v6980_v62 = vpack.c.bf16 %v476_v58, %v476_v58  ;;  %v6989_v1 = vcombine.high %v665_v53, %v669_v56  ;;  %v673_v11 = vld [vmem:[%s10813_s0 + $0x600] sm:$0xff]  ;;  %v7014_v22 = vcombine.low %v665_v53, %v669_v56 }
  0x1f   : > { %1411 = vmatpush1.bf16.msra.mxu0 %v6887_v34  ;;  %1454 = vmatpush1.bf16.msra.mxu1 %v6894_v35  ;;  %v670_v60 = vld [vmem:[%s10813_s0 + $0x5e8] sm:$0xff]  ;;  %v10822_v2 = vshrl.u32 %v6978_v61, 16  ;;  %v10821_v4 = vshll.u32 %v6978_v61, 16  ;;  %v677_v12 = vld [vmem:[%s10813_s0 + $0x620] sm:$0xff] }
  0x20   : > { %1412 = vmatprep.subr.bf16.mxu0 %v6896_v36  ;;  %1455 = vmatprep.subr.bf16.mxu1 %v6899_v37  ;;  %v10820_v6 = vshll.u32 %v6980_v62, 16  ;;  %v6995_v7 = vcombine.high %v666_v59, %v670_v60  ;;  %v674_v13 = vld [vmem:[%s10813_s0 + $0x608] sm:$0xff]  ;;  %v7018_v23 = vcombine.low %v666_v59, %v670_v60  ;;  %v7020_v24 = vcombine.high %v673_v11, %v677_v12  ;;  %v681_v31 = vld [vmem:[%s10813_s0 + $0x640] sm:$0xff] }
  0x21   : > { %v678_v15 = vld [vmem:[%s10813_s0 + $0x628] sm:$0xff]  ;;  %v755_v16 = vrot.slane %v10821_v4, 1  ;;  %v685_v32 = vld [vmem:[%s10813_s0 + $0x660] sm:$0xff]  ;;  %v7043_v40 = vcombine.low %v673_v11, %v677_v12 }
  0x22   : > { %v760_v17 = vrot.slane %v10820_v6, 1  ;;  %11306 = vst [vmem:[#allocation3_spill] sm:$0xff] %v7018_v23  ;;  %11307 = vst [vmem:[#allocation4_spill] sm:$0xff] %v7020_v24  ;;  %v7025_v30 = vcombine.high %v674_v13, %v678_v15  ;;  %v682_v33 = vld [vmem:[%s10813_s0 + $0x648] sm:$0xff]  ;;  %v7048_v41 = vcombine.low %v674_v13, %v678_v15  ;;  %v7050_v46 = vcombine.high %v681_v31, %v685_v32  ;;  %v689_v48 = vld [vmem:[%s10813_s0 + $0x680] sm:$0xff] }
  0x23   : > { %1413 = vmatpush1.bf16.msra.mxu0 %v6914_v42  ;;  %1456 = vmatpush1.bf16.msra.mxu1 %v6919_v43  ;;  %v756_v25 = vor.u32 %v755_v16, %v10822_v2  ;;  %v686_v38 = vld [vmem:[%s10813_s0 + $0x668] sm:$0xff]  ;;  %11309 = vst [vmem:[#allocation6_spill] sm:$0xff] %v7043_v40  ;;  %v693_v49 = vld [vmem:[%s10813_s0 + $0x6a0] sm:$0xff]  ;;  %v7069_v56 = vcombine.low %v681_v31, %v685_v32  ;;  %v473_v6 = vld [vmem:[%s6936_s17 + $0x10] sm:$0xff] }
  0x24   : > { %1414 = vmatprep.subr.bf16.mxu0 %v6921_v44  ;;  %1457 = vmatprep.subr.bf16.mxu1 %v6924_v45  ;;  %11308 = vst [vmem:[#allocation5_spill] sm:$0xff] %v7025_v30  ;;  %11310 = vst [vmem:[#allocation7_spill] sm:$0xff] %v7048_v41  ;;  %v7053_v47 = vcombine.high %v682_v33, %v686_v38  ;;  %v690_v53 = vld [vmem:[%s10813_s0 + $0x688] sm:$0xff]  ;;  %v7073_v57 = vcombine.low %v682_v33, %v686_v38  ;;  %v697_v60 = vld [vmem:[%s10813_s0 + $0x6c0] sm:$0xff] }
  0x25   : > { %v7040_v39 = vsel %vm737_vm0, %v756_v25, %v760_v17  ;;  %11311 = vst [vmem:[#allocation8_spill] sm:$0xff] %v7050_v46  ;;  %v694_v54 = vld [vmem:[%s10813_s0 + $0x6a8] sm:$0xff]  ;;  %11313 = vst [vmem:[#allocation10_spill] sm:$0xff] %v7069_v56  ;;  %v7075_v58 = vcombine.high %v689_v48, %v693_v49  ;;  %v701_v11 = vld [vmem:[%s10813_s0 + $0x6e0] sm:$0xff]  ;;  %v7093_v15 = vcombine.low %v689_v48, %v693_v49 }
  0x26   : > { %1436 = vmatprep.mubr.bf16.mxu0 %v7040_v39  ;;  %11312 = vst [vmem:[#allocation9_spill] sm:$0xff] %v7053_v47  ;;  %1479 = vmatprep.mubr.bf16.mxu1 %v7040_v39  ;;  %11314 = vst [vmem:[#allocation11_spill] sm:$0xff] %v7073_v57  ;;  %v7078_v59 = vcombine.high %v690_v53, %v694_v54  ;;  %v698_v12 = vld [vmem:[%s10813_s0 + $0x6c8] sm:$0xff]  ;;  %v7097_v16 = vcombine.low %v690_v53, %v694_v54  ;;  %v705_v31 = vld [vmem:[%s10813_s0 + $0x700] sm:$0xff] }
  0x27   : > { %1415 = vmatpush1.bf16.msra.mxu0 %v6952_v50  ;;  %1458 = vmatpush1.bf16.msra.mxu1 %v6956_v51  ;;  %11315 = vst [vmem:[#allocation12_spill] sm:$0xff] %v7075_v58  ;;  %v702_v13 = vld [vmem:[%s10813_s0 + $0x6e8] sm:$0xff]  ;;  %11317 = vst [vmem:[#allocation14_spill] sm:$0xff] %v7093_v15  ;;  %v7099_v17 = vcombine.high %v697_v60, %v701_v11  ;;  %v709_v32 = vld [vmem:[%s10813_s0 + $0x720] sm:$0xff]  ;;  %v7117_v48 = vcombine.low %v697_v60, %v701_v11 }
  0x28   : > { %1416 = vmatprep.subr.bf16.mxu0 %v6958_v52  ;;  %1459 = vmatprep.subr.bf16.mxu1 %v6965_v55  ;;  %11316 = vst [vmem:[#allocation13_spill] sm:$0xff] %v7078_v59  ;;  %11318 = vst [vmem:[#allocation15_spill] sm:$0xff] %v7097_v16  ;;  %v7102_v25 = vcombine.high %v698_v12, %v702_v13  ;;  %v706_v33 = vld [vmem:[%s10813_s0 + $0x708] sm:$0xff]  ;;  %v7121_v49 = vcombine.low %v698_v12, %v702_v13  ;;  %v471_v54 = vld [vmem:[%s6936_s17] sm:$0xff] }
  0x29   : > { %11319 = vst [vmem:[#allocation16_spill] sm:$0xff] %v7099_v17  ;;  %v710_v38 = vld [vmem:[%s10813_s0 + $0x728] sm:$0xff]  ;;  %11321 = vst [vmem:[#allocation18_spill] sm:$0xff] %v7117_v48  ;;  %v7123_v53 = vcombine.high %v705_v31, %v709_v32  ;;  %v713_v60 = vld [vmem:[%s10813_s0 + $0x740] sm:$0xff]  ;;  %v7143_v2 = vcombine.low %v705_v31, %v709_v32 }
  0x2a   : > { %11320 = vst [vmem:[#allocation17_spill] sm:$0xff] %v7102_v25  ;;  %11322 = vst [vmem:[#allocation19_spill] sm:$0xff] %v7121_v49  ;;  %v7128_v4 = vcombine.high %v706_v33, %v710_v38  ;;  %v717_v11 = vld [vmem:[%s10813_s0 + $0x760] sm:$0xff]  ;;  %v714_v12 = vld [vmem:[%s10813_s0 + $0x748] sm:$0xff] }
  0x2b   : > { %1417 = vmatpush1.bf16.msra.mxu0 %v6983_v63  ;;  %1460 = vmatpush1.bf16.msra.mxu1 %v6985_v0  ;;  %11323 = vst [vmem:[#allocation20_spill] sm:$0xff] %v7123_v53  ;;  %v718_v13 = vld [vmem:[%s10813_s0 + $0x768] sm:$0xff]  ;;  %11325 = vst [vmem:[#allocation22_spill] sm:$0xff] %v7143_v2  ;;  %v721_v31 = vld [vmem:[%s10813_s0 + $0x780] sm:$0xff] }
  0x2c   : > { %1418 = vmatprep.subr.bf16.mxu0 %v6989_v1  ;;  %1461 = vmatprep.subr.bf16.mxu1 %v6995_v7  ;;  %11324 = vst [vmem:[#allocation21_spill] sm:$0xff] %v7128_v4  ;;  %v722_v32 = vld [vmem:[%s10813_s0 + $0x788] sm:$0xff] }
  0x2f   : > { %1419 = vmatpush1.bf16.msra.mxu0 %v7014_v22  ;;  %1462 = vmatpush1.bf16.msra.mxu1 %v7018_v23 }
  0x30   : > { %1420 = vmatprep.subr.bf16.mxu0 %v7020_v24  ;;  %1463 = vmatprep.subr.bf16.mxu1 %v7025_v30 }
  0x33   : > { %1421 = vmatpush1.bf16.msra.mxu0 %v7043_v40  ;;  %1464 = vmatpush1.bf16.msra.mxu1 %v7048_v41 }
  0x34   : > { %1422 = vmatprep.subr.bf16.mxu0 %v7050_v46  ;;  %1465 = vmatprep.subr.bf16.mxu1 %v7053_v47 }
  0x37   : > { %1423 = vmatpush1.bf16.msra.mxu0 %v7069_v56  ;;  %1466 = vmatpush1.bf16.msra.mxu1 %v7073_v57 }
  0x38   : > { %1424 = vmatprep.subr.bf16.mxu0 %v7075_v58  ;;  %1467 = vmatprep.subr.bf16.mxu1 %v7078_v59  ;;  %v7155_v59 = vcombine.high %v714_v12, %v718_v13 }
  0x3a   : > { %11328 = vst [vmem:[#allocation25_spill] sm:$0xff] %v7155_v59 }
  0x3b   : > { %1425 = vmatpush1.bf16.msra.mxu0 %v7093_v15  ;;  %1468 = vmatpush1.bf16.msra.mxu1 %v7097_v16  ;;  %v7151_v16 = vcombine.high %v713_v60, %v717_v11  ;;  %v475_v15 = vld [vmem:[%s6949_s29] sm:$0xff] }
  0x3c   : > { %1426 = vmatprep.subr.bf16.mxu0 %v7099_v17  ;;  %1469 = vmatprep.subr.bf16.mxu1 %v7102_v25  ;;  %v7145_v25 = vpack.c.bf16 %v473_v6, %v471_v54  ;;  %v7149_v17 = vcombine.low %v706_v33, %v710_v38  ;;  %v725_v6 = vld [vmem:[%s10813_s0 + $0x7a0] sm:$0xff]  ;;  %v726_v33 = vld [vmem:[%s10813_s0 + $0x7a8] sm:$0xff]  ;;  %v7170_v38 = vcombine.low %v713_v60, %v717_v11 }
  0x3d   : > { %11327 = vst [vmem:[#allocation24_spill] sm:$0xff] %v7151_v16  ;;  %v7172_v54 = vpack.c.bf16 %v475_v15, %v475_v15  ;;  %v729_v60 = vld [vmem:[%s10813_s0 + $0x7c0] sm:$0xff]  ;;  %v730_v11 = vld [vmem:[%s10813_s0 + $0x7c8] sm:$0xff] }
  0x3e   : > { %11326 = vst [vmem:[#allocation23_spill] sm:$0xff] %v7149_v17  ;;  %11329 = vst [vmem:[#allocation26_spill] sm:$0xff] %v7170_v38  ;;  %v733_v15 = vld [vmem:[%s10813_s0 + $0x7e0] sm:$0xff] }
  0x3f   : > { %1427 = vmatpush1.bf16.msra.mxu0 %v7117_v48  ;;  %1470 = vmatpush1.bf16.msra.mxu1 %v7121_v49  ;;  %v7179_v49 = vcombine.high %v721_v31, %v725_v6  ;;  %v7182_v48 = vcombine.high %v722_v32, %v726_v33  ;;  %v7207_v58 = vcombine.high %v729_v60, %v733_v15 }
  0x40   : > { %1428 = vmatprep.subr.bf16.mxu0 %v7123_v53  ;;  %1471 = vmatprep.subr.bf16.mxu1 %v7128_v4  ;;  %v7177_v53 = vcombine.low %v714_v12, %v718_v13  ;;  %v734_v12 = vld [vmem:[%s10813_s0 + $0x7e8] sm:$0xff]  ;;  %v7197_v13 = vcombine.low %v721_v31, %v725_v6  ;;  %v10843_v4 = vshrl.u32 %v7145_v25, 16  ;;  %v611_v31 = vld [vmem:[%s10813_s0 + $0x410] sm:$0xff]  ;;  %v612_v6 = vld [vmem:[%s10813_s0 + $0x418] sm:$0xff] }
  0x41   : > { %11331 = vst [vmem:[#allocation28_spill] sm:$0xff] %v7179_v49  ;;  %11332 = vst [vmem:[#allocation29_spill] sm:$0xff] %v7182_v48 }
  0x42   : > { %11330 = vst [vmem:[#allocation27_spill] sm:$0xff] %v7177_v53  ;;  %11333 = vst [vmem:[#allocation30_spill] sm:$0xff] %v7197_v13 }
  0x43   : > { %1429 = vmatpush1.bf16.msra.mxu0 %v7143_v2  ;;  %1472 = vmatpush1.bf16.msra.mxu1 %v7149_v17  ;;  %v7205_v2 = vcombine.low %v722_v32, %v726_v33  ;;  %11336 = vst [vmem:[#allocation32_spill] sm:$0xff] %v7207_v58  ;;  %v616_v32 = vld [vmem:[%s10813_s0 + $0x438] sm:$0xff]  ;;  %v7225_v33 = vcombine.low %v729_v60, %v733_v15  ;;  %v619_v60 = vld [vmem:[%s10813_s0 + $0x450] sm:$0xff] }
  0x44   : > { %1430 = vmatprep.subr.bf16.mxu0 %v7151_v16  ;;  %1473 = vmatprep.subr.bf16.mxu1 %v7155_v59  ;;  %v11334_v59 = vshll.u32 %v7145_v25, 16  ;;  %v7238_v56 = vcombine.high %v612_v6, %v616_v32  ;;  %v624_v15 = vld [vmem:[%s10813_s0 + $0x478] sm:$0xff] }
  0x45   : > { %11335 = vst [vmem:[#allocation31_spill] sm:$0xff] %v7205_v2  ;;  %11338 = vst [vmem:[#allocation34_spill] sm:$0xff] %v7225_v33 }
  0x46   : > { %v743_v16 = vrot.slane %v11334_v59, 1  ;;  %v615_v59 = vld [vmem:[%s10813_s0 + $0x430] sm:$0xff]  ;;  %11342 = vst [vmem:[#allocation37_spill] sm:$0xff] %v7238_v56 }
  0x47   : > { %1431 = vmatpush1.bf16.msra.mxu0 %v7170_v38  ;;  %1474 = vmatpush1.bf16.msra.mxu1 %v7177_v53  ;;  %v7210_v38 = vcombine.high %v730_v11, %v734_v12  ;;  %v7233_v53 = vcombine.low %v730_v11, %v734_v12  ;;  %v7235_v57 = vcombine.high %v611_v31, %v615_v59 }
  0x48   : > { %1432 = vmatprep.subr.bf16.mxu0 %v7179_v49  ;;  %1475 = vmatprep.subr.bf16.mxu1 %v7182_v48  ;;  %v744_v17 = vor.u32 %v743_v16, %v10843_v4  ;;  %v11339_v48 = vshll.u32 %v7172_v54, 16  ;;  %v623_v16 = vld [vmem:[%s10813_s0 + $0x470] sm:$0xff]  ;;  %v7253_v11 = vcombine.low %v611_v31, %v615_v59  ;;  %v7260_v4 = vcombine.low %v612_v6, %v616_v32  ;;  %v632_v59 = vld [vmem:[%s10813_s0 + $0x4b8] sm:$0xff] }
  0x49   : > { %11337 = vst [vmem:[#allocation33_spill] sm:$0xff] %v7210_v38  ;;  %11340 = vst [vmem:[#allocation35_spill] sm:$0xff] %v7233_v53  ;;  %v627_v31 = vld [vmem:[%s10813_s0 + $0x490] sm:$0xff]  ;;  %v7282_v6 = vcombine.low %v619_v60, %v623_v16 }
  0x4a   : > { %v748_v49 = vrot.slane %v11339_v48, 1  ;;  %11341 = vst [vmem:[#allocation36_spill] sm:$0xff] %v7235_v57  ;;  %v620_v48 = vld [vmem:[%s10813_s0 + $0x458] sm:$0xff]  ;;  %11343 = vst [vmem:[#allocation38_spill] sm:$0xff] %v7253_v11 }
  0x4b   : > { %1433 = vmatpush1.bf16.msra.mxu0 %v7197_v13  ;;  %1476 = vmatpush1.bf16.msra.mxu1 %v7205_v2  ;;  %11344 = vst [vmem:[#allocation39_spill] sm:$0xff] %v7260_v4  ;;  %11347 = vst [vmem:[#allocation42_spill] sm:$0xff] %v7282_v6  ;;  %v7286_v32 = vcombine.low %v620_v48, %v624_v15 }
  0x4c   : > { %1434 = vmatprep.subr.bf16.mxu0 %v7207_v58  ;;  %1477 = vmatprep.subr.bf16.mxu1 %v7210_v38  ;;  %v7256_v12 = vsel %vm737_vm0, %v744_v17, %v748_v49  ;;  %v7262_v38 = vcombine.high %v619_v60, %v623_v16  ;;  %v7265_v58 = vcombine.high %v620_v48, %v624_v15  ;;  %v631_v17 = vld [vmem:[%s10813_s0 + $0x4b0] sm:$0xff]  ;;  %v628_v49 = vld [vmem:[%s10813_s0 + $0x498] sm:$0xff] }
  0x4d   : > { %11348 = vst [vmem:[#allocation43_spill] sm:$0xff] %v7286_v32  ;;  %v636_v60 = vld [vmem:[%s10813_s0 + $0x4d8] sm:$0xff]  ;;  %v7300_v16 = vcombine.high %v628_v49, %v632_v59  ;;  %v7308_v15 = vcombine.low %v627_v31, %v631_v17 }
  0x4e   : > { %11345 = vst [vmem:[#allocation40_spill] sm:$0xff] %v7262_v38  ;;  %11346 = vst [vmem:[#allocation41_spill] sm:$0xff] %v7265_v58  ;;  %v640_v48 = vld [vmem:[%s10813_s0 + $0x4f8] sm:$0xff] }
  0x4f   : > { %1435 = vmatpush1.bf16.msra.mxu0 %v7225_v33  ;;  %1478 = vmatpush1.bf16.msra.mxu1 %v7233_v53  ;;  %v639_v53 = vld [vmem:[%s10813_s0 + $0x4f0] sm:$0xff]  ;;  %11350 = vst [vmem:[#allocation45_spill] sm:$0xff] %v7300_v16  ;;  %11351 = vst [vmem:[#allocation46_spill] sm:$0xff] %v7308_v15 }
  0x50   : > { %1490 = vmatprep.subr.bf16.mxu0 %v7235_v57  ;;  %1533 = vmatprep.subr.bf16.mxu1 %v7238_v56  ;;  %v7288_v56 = vcombine.high %v627_v31, %v631_v17  ;;  %v635_v57 = vld [vmem:[%s10813_s0 + $0x4d0] sm:$0xff]  ;;  %v644_v31 = vld [vmem:[%s10813_s0 + $0x518] sm:$0xff]  ;;  %v7326_v17 = vcombine.high %v636_v60, %v640_v48 }
  0x52   : > { %1437 = vmatmul.mubr.bf16.vlgmr.msra.gmra.mrb[0].mxu0 %v7256_v12  ;;  %1480 = vmatmul.mubr.bf16.vlgmr.msra.gmra.mrb[0].mxu1 %v7256_v12  ;;  %11349 = vst [vmem:[#allocation44_spill] sm:$0xff] %v7288_v56  ;;  %11354 = vst [vmem:[#allocation49_spill] sm:$0xff] %v7326_v17 }
  0x53   : > { %1491 = vmatpush1.bf16.msra.mxu0 %v7253_v11  ;;  %1534 = vmatpush1.bf16.msra.mxu1 %v7260_v4  ;;  %v643_v4 = vld [vmem:[%s10813_s0 + $0x510] sm:$0xff]  ;;  %v2404_v11 = vld [vmem:[%s10813_s0 + $0x880] sm:$0xff] }
  0x54   : > { %1492 = vmatprep.subr.bf16.mxu0 %v7262_v38  ;;  %1535 = vmatprep.subr.bf16.mxu1 %v7265_v58  ;;  %v7312_v38 = vcombine.low %v628_v49, %v632_v59  ;;  %v7314_v58 = vcombine.high %v635_v57, %v639_v53  ;;  %v648_v49 = vld [vmem:[%s10813_s0 + $0x538] sm:$0xff]  ;;  %v7332_v59 = vcombine.low %v635_v57, %v639_v53 }
  0x55   : > { %1522 = vmatprep.mubr.bf16.mxu0 %v7040_v39  ;;  %1565 = vmatprep.mubr.bf16.mxu1 %v7040_v39  ;;  %v647_v39 = vld [vmem:[%s10813_s0 + $0x530] sm:$0xff]  ;;  %v652_v57 = vld [vmem:[%s10813_s0 + $0x558] sm:$0xff]  ;;  %v7350_v53 = vcombine.high %v644_v31, %v648_v49 }
  0x56   : > { %11352 = vst [vmem:[#allocation47_spill] sm:$0xff] %v7312_v38  ;;  %11353 = vst [vmem:[#allocation48_spill] sm:$0xff] %v7314_v58 }
  0x57   : > { %1493 = vmatpush1.bf16.msra.mxu0 %v7282_v6  ;;  %1536 = vmatpush1.bf16.msra.mxu1 %v7286_v32  ;;  %11355 = vst [vmem:[#allocation50_spill] sm:$0xff] %v7332_v59  ;;  %v7338_v32 = vcombine.high %v643_v4, %v647_v39  ;;  %v655_v6 = vld [vmem:[%s10813_s0 + $0x570] sm:$0xff]  ;;  %11358 = vst [vmem:[#allocation53_spill] sm:$0xff] %v7350_v53 }
  0x58   : > { %1494 = vmatprep.subr.bf16.mxu0 %v7288_v56  ;;  %1537 = vmatprep.subr.bf16.mxu1 %v7300_v16  ;;  %v7336_v56 = vcombine.low %v636_v60, %v640_v48  ;;  %v651_v16 = vld [vmem:[%s10813_s0 + $0x550] sm:$0xff]  ;;  %v656_v60 = vld [vmem:[%s10813_s0 + $0x578] sm:$0xff]  ;;  %v7356_v48 = vcombine.low %v643_v4, %v647_v39 }
  0x59   : > { %11357 = vst [vmem:[#allocation52_spill] sm:$0xff] %v7338_v32  ;;  %v660_v4 = vld [vmem:[%s10813_s0 + $0x598] sm:$0xff]  ;;  %v7374_v39 = vcombine.high %v652_v57, %v656_v60 }
  0x5a   : > { %11356 = vst [vmem:[#allocation51_spill] sm:$0xff] %v7336_v56  ;;  %11359 = vst [vmem:[#allocation54_spill] sm:$0xff] %v7356_v48 }
  0x5b   : > { %1495 = vmatpush1.bf16.msra.mxu0 %v7308_v15  ;;  %1538 = vmatpush1.bf16.msra.mxu1 %v7312_v38  ;;  %v7362_v38 = vcombine.high %v651_v16, %v655_v6  ;;  %v663_v15 = vld [vmem:[%s10813_s0 + $0x5b0] sm:$0xff]  ;;  %11362 = vst [vmem:[#allocation57_spill] sm:$0xff] %v7374_v39 }
  0x5c   : > { %1496 = vmatprep.subr.bf16.mxu0 %v7314_v58  ;;  %1539 = vmatprep.subr.bf16.mxu1 %v7326_v17  ;;  %v7360_v58 = vcombine.low %v644_v31, %v648_v49  ;;  %v659_v17 = vld [vmem:[%s10813_s0 + $0x590] sm:$0xff]  ;;  %v664_v31 = vld [vmem:[%s10813_s0 + $0x5b8] sm:$0xff]  ;;  %v7380_v49 = vcombine.low %v651_v16, %v655_v6 }
  0x5d   : > { %11361 = vst [vmem:[#allocation56_spill] sm:$0xff] %v7362_v38  ;;  %v668_v6 = vld [vmem:[%s10813_s0 + $0x5d8] sm:$0xff]  ;;  %v7398_v16 = vcombine.high %v660_v4, %v664_v31 }
  0x5e   : > { %11360 = vst [vmem:[#allocation55_spill] sm:$0xff] %v7360_v58  ;;  %11363 = vst [vmem:[#allocation58_spill] sm:$0xff] %v7380_v49 }
  0x5f   : > { %1497 = vmatpush1.bf16.msra.mxu0 %v7332_v59  ;;  %1540 = vmatpush1.bf16.msra.mxu1 %v7336_v56  ;;  %v7386_v56 = vcombine.high %v659_v17, %v663_v15  ;;  %v671_v59 = vld [vmem:[%s10813_s0 + $0x5f0] sm:$0xff]  ;;  %11366 = vst [vmem:[#allocation61_spill] sm:$0xff] %v7398_v16 }
  0x60   : > { %1498 = vmatprep.subr.bf16.mxu0 %v7338_v32  ;;  %1541 = vmatprep.subr.bf16.mxu1 %v7350_v53  ;;  %v7384_v32 = vcombine.low %v652_v57, %v656_v60  ;;  %v667_v53 = vld [vmem:[%s10813_s0 + $0x5d0] sm:$0xff]  ;;  %v672_v57 = vld [vmem:[%s10813_s0 + $0x5f8] sm:$0xff]  ;;  %v7404_v60 = vcombine.low %v659_v17, %v663_v15 }
  0x61   : > { %11365 = vst [vmem:[#allocation60_spill] sm:$0xff] %v7386_v56  ;;  %v676_v15 = vld [vmem:[%s10813_s0 + $0x618] sm:$0xff]  ;;  %v7422_v17 = vcombine.high %v668_v6, %v672_v57 }
  0x62   : > { %11364 = vst [vmem:[#allocation59_spill] sm:$0xff] %v7384_v32  ;;  %11367 = vst [vmem:[#allocation62_spill] sm:$0xff] %v7404_v60 }
  0x63   : > { %1499 = vmatpush1.bf16.msra.mxu0 %v7356_v48  ;;  %1542 = vmatpush1.bf16.msra.mxu1 %v7360_v58  ;;  %v7410_v58 = vcombine.high %v667_v53, %v671_v59  ;;  %v679_v48 = vld [vmem:[%s10813_s0 + $0x630] sm:$0xff]  ;;  %11370 = vst [vmem:[#allocation65_spill] sm:$0xff] %v7422_v17 }
  0x64   : > { %1500 = vmatprep.subr.bf16.mxu0 %v7362_v38  ;;  %1543 = vmatprep.subr.bf16.mxu1 %v7374_v39  ;;  %v7408_v38 = vcombine.low %v660_v4, %v664_v31  ;;  %v675_v39 = vld [vmem:[%s10813_s0 + $0x610] sm:$0xff]  ;;  %v680_v4 = vld [vmem:[%s10813_s0 + $0x638] sm:$0xff]  ;;  %v7428_v31 = vcombine.low %v667_v53, %v671_v59 }
  0x65   : > { %11369 = vst [vmem:[#allocation64_spill] sm:$0xff] %v7410_v58  ;;  %v684_v59 = vld [vmem:[%s10813_s0 + $0x658] sm:$0xff]  ;;  %v7446_v53 = vcombine.high %v676_v15, %v680_v4 }
  0x66   : > { %11368 = vst [vmem:[#allocation63_spill] sm:$0xff] %v7408_v38  ;;  %11371 = vst [vmem:[#allocation66_spill] sm:$0xff] %v7428_v31 }
  0x67   : > { %1501 = vmatpush1.bf16.msra.mxu0 %v7380_v49  ;;  %1544 = vmatpush1.bf16.msra.mxu1 %v7384_v32  ;;  %v7434_v32 = vcombine.high %v675_v39, %v679_v48  ;;  %v687_v49 = vld [vmem:[%s10813_s0 + $0x670] sm:$0xff]  ;;  %11374 = vst [vmem:[#allocation69_spill] sm:$0xff] %v7446_v53 }
  0x68   : > { %1502 = vmatprep.subr.bf16.mxu0 %v7386_v56  ;;  %1545 = vmatprep.subr.bf16.mxu1 %v7398_v16  ;;  %v7432_v56 = vcombine.low %v668_v6, %v672_v57  ;;  %v683_v16 = vld [vmem:[%s10813_s0 + $0x650] sm:$0xff]  ;;  %v688_v6 = vld [vmem:[%s10813_s0 + $0x678] sm:$0xff]  ;;  %v7452_v57 = vcombine.low %v675_v39, %v679_v48 }
  0x69   : > { %11373 = vst [vmem:[#allocation68_spill] sm:$0xff] %v7434_v32  ;;  %v692_v48 = vld [vmem:[%s10813_s0 + $0x698] sm:$0xff]  ;;  %v7470_v39 = vcombine.high %v684_v59, %v688_v6 }
  0x6a   : > { %11372 = vst [vmem:[#allocation67_spill] sm:$0xff] %v7432_v56  ;;  %11375 = vst [vmem:[#allocation70_spill] sm:$0xff] %v7452_v57 }
  0x6b   : > { %1503 = vmatpush1.bf16.msra.mxu0 %v7404_v60  ;;  %1546 = vmatpush1.bf16.msra.mxu1 %v7408_v38  ;;  %v7458_v38 = vcombine.high %v683_v16, %v687_v49  ;;  %v695_v60 = vld [vmem:[%s10813_s0 + $0x6b0] sm:$0xff]  ;;  %11378 = vst [vmem:[#allocation73_spill] sm:$0xff] %v7470_v39 }
  0x6c   : > { %1504 = vmatprep.subr.bf16.mxu0 %v7410_v58  ;;  %1547 = vmatprep.subr.bf16.mxu1 %v7422_v17  ;;  %v7456_v58 = vcombine.low %v676_v15, %v680_v4  ;;  %v691_v17 = vld [vmem:[%s10813_s0 + $0x690] sm:$0xff]  ;;  %v696_v15 = vld [vmem:[%s10813_s0 + $0x6b8] sm:$0xff]  ;;  %v7476_v4 = vcombine.low %v683_v16, %v687_v49 }
  0x6d   : > { %11377 = vst [vmem:[#allocation72_spill] sm:$0xff] %v7458_v38  ;;  %v703_v49 = vld [vmem:[%s10813_s0 + $0x6f0] sm:$0xff]  ;;  %v700_v16 = vld [vmem:[%s10813_s0 + $0x6d8] sm:$0xff] }
  0x6e   : > { %11376 = vst [vmem:[#allocation71_spill] sm:$0xff] %v7456_v58  ;;  %11379 = vst [vmem:[#allocation74_spill] sm:$0xff] %v7476_v4 }
  0x6f   : > { %1505 = vmatpush1.bf16.msra.mxu0 %v7428_v31  ;;  %1548 = vmatpush1.bf16.msra.mxu1 %v7432_v56  ;;  %v7482_v56 = vcombine.high %v691_v17, %v695_v60  ;;  %v699_v31 = vld [vmem:[%s10813_s0 + $0x6d0] sm:$0xff] }
  0x70   : > { %1506 = vmatprep.subr.bf16.mxu0 %v7434_v32  ;;  %1549 = vmatprep.subr.bf16.mxu1 %v7446_v53  ;;  %v7480_v32 = vcombine.low %v684_v59, %v688_v6  ;;  %v7485_v53 = vcombine.high %v692_v48, %v696_v15  ;;  %v704_v59 = vld [vmem:[%s10813_s0 + $0x6f8] sm:$0xff]  ;;  %v7500_v6 = vcombine.low %v691_v17, %v695_v60  ;;  %v711_v60 = vld [vmem:[%s10813_s0 + $0x730] sm:$0xff] }
  0x71   : > { %11381 = vst [vmem:[#allocation76_spill] sm:$0xff] %v7482_v56  ;;  %v708_v17 = vld [vmem:[%s10813_s0 + $0x718] sm:$0xff] }
  0x72   : > { %11380 = vst [vmem:[#allocation75_spill] sm:$0xff] %v7480_v32  ;;  %11382 = vst [vmem:[#allocation77_spill] sm:$0xff] %v7485_v53 }
  0x73   : > { %1507 = vmatpush1.bf16.msra.mxu0 %v7452_v57  ;;  %1550 = vmatpush1.bf16.msra.mxu1 %v7456_v58  ;;  %11383 = vst [vmem:[#allocation78_spill] sm:$0xff] %v7500_v6  ;;  %v7509_v58 = vcombine.high %v700_v16, %v704_v59  ;;  %v707_v57 = vld [vmem:[%s10813_s0 + $0x710] sm:$0xff] }
  0x74   : > { %1508 = vmatprep.subr.bf16.mxu0 %v7458_v38  ;;  %1551 = vmatprep.subr.bf16.mxu1 %v7470_v39  ;;  %v7504_v39 = vcombine.low %v692_v48, %v696_v15  ;;  %v7506_v38 = vcombine.high %v699_v31, %v703_v49  ;;  %v712_v48 = vld [vmem:[%s10813_s0 + $0x738] sm:$0xff]  ;;  %v7524_v15 = vcombine.low %v699_v31, %v703_v49  ;;  %v719_v31 = vld [vmem:[%s10813_s0 + $0x770] sm:$0xff] }
  0x75   : > { %11386 = vst [vmem:[#allocation81_spill] sm:$0xff] %v7509_v58  ;;  %v716_v49 = vld [vmem:[%s10813_s0 + $0x758] sm:$0xff] }
  0x76   : > { %11384 = vst [vmem:[#allocation79_spill] sm:$0xff] %v7504_v39  ;;  %11385 = vst [vmem:[#allocation80_spill] sm:$0xff] %v7506_v38 }
  0x77   : > { %1509 = vmatpush1.bf16.msra.mxu0 %v7476_v4  ;;  %1552 = vmatpush1.bf16.msra.mxu1 %v7480_v32  ;;  %11387 = vst [vmem:[#allocation82_spill] sm:$0xff] %v7524_v15  ;;  %v7533_v32 = vcombine.high %v708_v17, %v712_v48  ;;  %v715_v4 = vld [vmem:[%s10813_s0 + $0x750] sm:$0xff] }
  0x78   : > { %1510 = vmatprep.subr.bf16.mxu0 %v7482_v56  ;;  %1553 = vmatprep.subr.bf16.mxu1 %v7485_v53  ;;  %v7528_v53 = vcombine.low %v700_v16, %v704_v59  ;;  %v7530_v56 = vcombine.high %v707_v57, %v711_v60  ;;  %v720_v16 = vld [vmem:[%s10813_s0 + $0x778] sm:$0xff]  ;;  %v7548_v59 = vcombine.low %v707_v57, %v711_v60  ;;  %v727_v57 = vld [vmem:[%s10813_s0 + $0x7b0] sm:$0xff] }
  0x79   : > { %11390 = vst [vmem:[#allocation85_spill] sm:$0xff] %v7533_v32  ;;  %v724_v60 = vld [vmem:[%s10813_s0 + $0x798] sm:$0xff] }
  0x7a   : > { %11388 = vst [vmem:[#allocation83_spill] sm:$0xff] %v7528_v53  ;;  %11389 = vst [vmem:[#allocation84_spill] sm:$0xff] %v7530_v56 }
  0x7b   : > { %1511 = vmatpush1.bf16.msra.mxu0 %v7500_v6  ;;  %1554 = vmatpush1.bf16.msra.mxu1 %v7504_v39  ;;  %11391 = vst [vmem:[#allocation86_spill] sm:$0xff] %v7548_v59  ;;  %v7557_v39 = vcombine.high %v716_v49, %v720_v16  ;;  %v723_v6 = vld [vmem:[%s10813_s0 + $0x790] sm:$0xff] }
  0x7c   : > { %1512 = vmatprep.subr.bf16.mxu0 %v7506_v38  ;;  %1555 = vmatprep.subr.bf16.mxu1 %v7509_v58  ;;  %v7552_v58 = vcombine.low %v708_v17, %v712_v48  ;;  %v7554_v38 = vcombine.high %v715_v4, %v719_v31  ;;  %v728_v17 = vld [vmem:[%s10813_s0 + $0x7b8] sm:$0xff]  ;;  %v7572_v48 = vcombine.low %v715_v4, %v719_v31  ;;  %v735_v4 = vld [vmem:[%s10813_s0 + $0x7f0] sm:$0xff] }
  0x7d   : > { %11394 = vst [vmem:[#allocation89_spill] sm:$0xff] %v7557_v39  ;;  %v732_v31 = vld [vmem:[%s10813_s0 + $0x7d8] sm:$0xff] }
  0x7e   : > { %11392 = vst [vmem:[#allocation87_spill] sm:$0xff] %v7552_v58  ;;  %11393 = vst [vmem:[#allocation88_spill] sm:$0xff] %v7554_v38 }
  0x7f   : > { %1513 = vmatpush1.bf16.msra.mxu0 %v7524_v15  ;;  %1556 = vmatpush1.bf16.msra.mxu1 %v7528_v53  ;;  %11395 = vst [vmem:[#allocation90_spill] sm:$0xff] %v7572_v48  ;;  %v7581_v53 = vcombine.high %v724_v60, %v728_v17  ;;  %v731_v15 = vld [vmem:[%s10813_s0 + $0x7d0] sm:$0xff] }
  0x80   : > { %1514 = vmatprep.subr.bf16.mxu0 %v7530_v56  ;;  %1557 = vmatprep.subr.bf16.mxu1 %v7533_v32  ;;  %v7576_v32 = vcombine.low %v716_v49, %v720_v16  ;;  %v7578_v56 = vcombine.high %v723_v6, %v727_v57  ;;  %v736_v49 = vld [vmem:[%s10813_s0 + $0x7f8] sm:$0xff]  ;;  %v7596_v16 = vcombine.low %v723_v6, %v727_v57  ;;  %v483_v6 = vld [vmem:[%s10813_s0 + $0x20] sm:$0xff]  ;;  %v480_v57 = vld [vmem:[%s10813_s0 + $0x8] sm:$0xff] }
  0x81   : > { %11398 = vst [vmem:[#allocation93_spill] sm:$0xff] %v7581_v53 }
  0x82   : > { %11396 = vst [vmem:[#allocation91_spill] sm:$0xff] %v7576_v32  ;;  %11397 = vst [vmem:[#allocation92_spill] sm:$0xff] %v7578_v56 }
  0x83   : > { %1515 = vmatpush1.bf16.msra.mxu0 %v7548_v59  ;;  %1558 = vmatpush1.bf16.msra.mxu1 %v7552_v58  ;;  %11399 = vst [vmem:[#allocation94_spill] sm:$0xff] %v7596_v16  ;;  %v7605_v58 = vcombine.high %v732_v31, %v736_v49  ;;  %v479_v59 = vld [vmem:[%s10813_s0] sm:$0xff] }
  0x84   : > { %1516 = vmatprep.subr.bf16.mxu0 %v7554_v38  ;;  %1559 = vmatprep.subr.bf16.mxu1 %v7557_v39  ;;  %v7600_v39 = vcombine.low %v724_v60, %v728_v17  ;;  %v7602_v38 = vcombine.high %v731_v15, %v735_v4  ;;  %v484_v60 = vld [vmem:[%s10813_s0 + $0x28] sm:$0xff]  ;;  %v7620_v17 = vcombine.low %v731_v15, %v735_v4  ;;  %v491_v15 = vld [vmem:[%s10813_s0 + $0x60] sm:$0xff] }
  0x85   : > { %11402 = vst [vmem:[#allocation97_spill] sm:$0xff] %v7605_v58  ;;  %v488_v4 = vld [vmem:[%s10813_s0 + $0x48] sm:$0xff] }
  0x86   : > { %11400 = vst [vmem:[#allocation95_spill] sm:$0xff] %v7600_v39  ;;  %11401 = vst [vmem:[#allocation96_spill] sm:$0xff] %v7602_v38 }
  0x87   : > { %1517 = vmatpush1.bf16.msra.mxu0 %v7572_v48  ;;  %1560 = vmatpush1.bf16.msra.mxu1 %v7576_v32  ;;  %11403 = vst [vmem:[#allocation98_spill] sm:$0xff] %v7620_v17  ;;  %v7629_v32 = vcombine.high %v480_v57, %v484_v60  ;;  %v487_v48 = vld [vmem:[%s10813_s0 + $0x40] sm:$0xff] }
  0x88   : > { %1518 = vmatprep.subr.bf16.mxu0 %v7578_v56  ;;  %1561 = vmatprep.subr.bf16.mxu1 %v7581_v53  ;;  %v7624_v53 = vcombine.low %v732_v31, %v736_v49  ;;  %v7626_v56 = vcombine.high %v479_v59, %v483_v6  ;;  %v492_v31 = vld [vmem:[%s10813_s0 + $0x68] sm:$0xff]  ;;  %v7644_v49 = vcombine.low %v479_v59, %v483_v6  ;;  %v499_v59 = vld [vmem:[%s10813_s0 + $0xa0] sm:$0xff] }
  0x89   : > { %11406 = vst [vmem:[#allocation101_spill] sm:$0xff] %v7629_v32  ;;  %v496_v6 = vld [vmem:[%s10813_s0 + $0x88] sm:$0xff] }
  0x8a   : > { %11404 = vst [vmem:[#allocation99_spill] sm:$0xff] %v7624_v53  ;;  %11405 = vst [vmem:[#allocation100_spill] sm:$0xff] %v7626_v56 }
  0x8b   : > { %1519 = vmatpush1.bf16.msra.mxu0 %v7596_v16  ;;  %1562 = vmatpush1.bf16.msra.mxu1 %v7600_v39  ;;  %11407 = vst [vmem:[#allocation102_spill] sm:$0xff] %v7644_v49  ;;  %v7653_v39 = vcombine.high %v488_v4, %v492_v31  ;;  %v495_v16 = vld [vmem:[%s10813_s0 + $0x80] sm:$0xff] }
  0x8c   : > { %1520 = vmatprep.subr.bf16.mxu0 %v7602_v38  ;;  %1563 = vmatprep.subr.bf16.mxu1 %v7605_v58  ;;  %v7648_v58 = vcombine.low %v480_v57, %v484_v60  ;;  %v7650_v38 = vcombine.high %v487_v48, %v491_v15  ;;  %v500_v57 = vld [vmem:[%s10813_s0 + $0xa8] sm:$0xff]  ;;  %v7670_v60 = vcombine.low %v487_v48, %v491_v15  ;;  %v507_v48 = vld [vmem:[%s10813_s0 + $0xe0] sm:$0xff] }
  0x8d   : > { %11410 = vst [vmem:[#allocation105_spill] sm:$0xff] %v7653_v39  ;;  %v504_v15 = vld [vmem:[%s10813_s0 + $0xc8] sm:$0xff] }
  0x8e   : > { %11408 = vst [vmem:[#allocation103_spill] sm:$0xff] %v7648_v58  ;;  %11409 = vst [vmem:[#allocation104_spill] sm:$0xff] %v7650_v38 }
  0x8f   : > { %1521 = vmatpush1.bf16.msra.mxu0 %v7620_v17  ;;  %1564 = vmatpush1.bf16.msra.mxu1 %v7624_v53  ;;  %11411 = vst [vmem:[#allocation106_spill] sm:$0xff] %v7670_v60  ;;  %v7679_v53 = vcombine.high %v496_v6, %v500_v57 }
  0x90   : > { %2216 = vmatprep.subr.bf16.mxu0 %v7626_v56  ;;  %2259 = vmatprep.subr.bf16.mxu1 %v7629_v32  ;;  %v7674_v32 = vcombine.low %v488_v4, %v492_v31  ;;  %v7676_v56 = vcombine.high %v495_v16, %v499_v59  ;;  %v508_v4 = vld [vmem:[%s10813_s0 + $0xe8] sm:$0xff]  ;;  %v7696_v31 = vcombine.low %v495_v16, %v499_v59  ;;  %v515_v16 = vld [vmem:[%s10813_s0 + $0x120] sm:$0xff] }
  0x91   : > { %11414 = vst [vmem:[#allocation109_spill] sm:$0xff] %v7679_v53  ;;  %v512_v59 = vld [vmem:[%s10813_s0 + $0x108] sm:$0xff] }
  0x92   : > { %1523 = vmatmul.mubr.bf16.vlgmr.msra.gmra.mrb[4].mxu0 %v7256_v12  ;;  %1566 = vmatmul.mubr.bf16.vlgmr.msra.gmra.mrb[4].mxu1 %v7256_v12  ;;  %11412 = vst [vmem:[#allocation107_spill] sm:$0xff] %v7674_v32  ;;  %11413 = vst [vmem:[#allocation108_spill] sm:$0xff] %v7676_v56  ;;  %v503_v12 = vld [vmem:[%s10813_s0 + $0xc0] sm:$0xff] }
  0x93   : > { %2217 = vmatpush1.bf16.msra.mxu0 %v7644_v49  ;;  %2260 = vmatpush1.bf16.msra.mxu1 %v7648_v58  ;;  %11415 = vst [vmem:[#allocation110_spill] sm:$0xff] %v7696_v31  ;;  %v7705_v58 = vcombine.high %v504_v15, %v508_v4  ;;  %v511_v49 = vld [vmem:[%s10813_s0 + $0x100] sm:$0xff] }
  0x94   : > { %2218 = vmatprep.subr.bf16.mxu0 %v7650_v38  ;;  %2261 = vmatprep.subr.bf16.mxu1 %v7653_v39  ;;  %v7700_v39 = vcombine.low %v496_v6, %v500_v57  ;;  %v7702_v38 = vcombine.high %v503_v12, %v507_v48  ;;  %v516_v6 = vld [vmem:[%s10813_s0 + $0x128] sm:$0xff]  ;;  %v7720_v57 = vcombine.low %v503_v12, %v507_v48  ;;  %v523_v12 = vld [vmem:[%s10813_s0 + $0x160] sm:$0xff] }
  0x95   : > { %2248 = vmatprep.mubr.bf16.mxu0 %v6978_v61  ;;  %2291 = vmatprep.mubr.bf16.mxu1 %v6978_v61  ;;  %11418 = vst [vmem:[#allocation113_spill] sm:$0xff] %v7705_v58  ;;  %v520_v48 = vld [vmem:[%s10813_s0 + $0x148] sm:$0xff] }
  0x96   : > { %11416 = vst [vmem:[#allocation111_spill] sm:$0xff] %v7700_v39  ;;  %11417 = vst [vmem:[#allocation112_spill] sm:$0xff] %v7702_v38 }
  0x97   : > { %2219 = vmatpush1.bf16.msra.mxu0 %v7670_v60  ;;  %2262 = vmatpush1.bf16.msra.mxu1 %v7674_v32  ;;  %11419 = vst [vmem:[#allocation114_spill] sm:$0xff] %v7720_v57  ;;  %v7729_v32 = vcombine.high %v512_v59, %v516_v6  ;;  %v519_v60 = vld [vmem:[%s10813_s0 + $0x140] sm:$0xff] }
  0x98   : > { %2220 = vmatprep.subr.bf16.mxu0 %v7676_v56  ;;  %2263 = vmatprep.subr.bf16.mxu1 %v7679_v53  ;;  %v7724_v53 = vcombine.low %v504_v15, %v508_v4  ;;  %v7726_v56 = vcombine.high %v511_v49, %v515_v16  ;;  %v524_v15 = vld [vmem:[%s10813_s0 + $0x168] sm:$0xff]  ;;  %v7744_v4 = vcombine.low %v511_v49, %v515_v16  ;;  %v531_v49 = vld [vmem:[%s10813_s0 + $0x1a0] sm:$0xff] }
  0x99   : > { %11422 = vst [vmem:[#allocation117_spill] sm:$0xff] %v7729_v32  ;;  %v528_v16 = vld [vmem:[%s10813_s0 + $0x188] sm:$0xff] }
  0x9a   : > { %11420 = vst [vmem:[#allocation115_spill] sm:$0xff] %v7724_v53  ;;  %11421 = vst [vmem:[#allocation116_spill] sm:$0xff] %v7726_v56 }
  0x9b   : > { %2221 = vmatpush1.bf16.msra.mxu0 %v7696_v31  ;;  %2264 = vmatpush1.bf16.msra.mxu1 %v7700_v39  ;;  %11423 = vst [vmem:[#allocation118_spill] sm:$0xff] %v7744_v4  ;;  %v7753_v39 = vcombine.high %v520_v48, %v524_v15  ;;  %v527_v31 = vld [vmem:[%s10813_s0 + $0x180] sm:$0xff] }
  0x9c   : > { %2222 = vmatprep.subr.bf16.mxu0 %v7702_v38  ;;  %2265 = vmatprep.subr.bf16.mxu1 %v7705_v58  ;;  %v7748_v58 = vcombine.low %v512_v59, %v516_v6  ;;  %v7750_v38 = vcombine.high %v519_v60, %v523_v12  ;;  %v532_v59 = vld [vmem:[%s10813_s0 + $0x1a8] sm:$0xff]  ;;  %v7768_v6 = vcombine.low %v519_v60, %v523_v12  ;;  %v539_v60 = vld [vmem:[%s10813_s0 + $0x1e0] sm:$0xff] }
  0x9d   : > { %11426 = vst [vmem:[#allocation121_spill] sm:$0xff] %v7753_v39  ;;  %v536_v12 = vld [vmem:[%s10813_s0 + $0x1c8] sm:$0xff] }
  0x9e   : > { %11424 = vst [vmem:[#allocation119_spill] sm:$0xff] %v7748_v58  ;;  %11425 = vst [vmem:[#allocation120_spill] sm:$0xff] %v7750_v38 }
  0x9f   : > { %2223 = vmatpush1.bf16.msra.mxu0 %v7720_v57  ;;  %2266 = vmatpush1.bf16.msra.mxu1 %v7724_v53  ;;  %11427 = vst [vmem:[#allocation122_spill] sm:$0xff] %v7768_v6  ;;  %v7777_v53 = vcombine.high %v528_v16, %v532_v59  ;;  %v535_v57 = vld [vmem:[%s10813_s0 + $0x1c0] sm:$0xff] }
  0xa0   : > { %2224 = vmatprep.subr.bf16.mxu0 %v7726_v56  ;;  %2267 = vmatprep.subr.bf16.mxu1 %v7729_v32  ;;  %v7772_v32 = vcombine.low %v520_v48, %v524_v15  ;;  %v7774_v56 = vcombine.high %v527_v31, %v531_v49  ;;  %v540_v48 = vld [vmem:[%s10813_s0 + $0x1e8] sm:$0xff]  ;;  %v7792_v15 = vcombine.low %v527_v31, %v531_v49  ;;  %v547_v31 = vld [vmem:[%s10813_s0 + $0x220] sm:$0xff] }
  0xa1   : > { %11430 = vst [vmem:[#allocation125_spill] sm:$0xff] %v7777_v53  ;;  %v544_v49 = vld [vmem:[%s10813_s0 + $0x208] sm:$0xff] }
  0xa2   : > { %11428 = vst [vmem:[#allocation123_spill] sm:$0xff] %v7772_v32  ;;  %11429 = vst [vmem:[#allocation124_spill] sm:$0xff] %v7774_v56 }
  0xa3   : > { %2225 = vmatpush1.bf16.msra.mxu0 %v7744_v4  ;;  %2268 = vmatpush1.bf16.msra.mxu1 %v7748_v58  ;;  %11431 = vst [vmem:[#allocation126_spill] sm:$0xff] %v7792_v15  ;;  %v7801_v58 = vcombine.high %v536_v12, %v540_v48  ;;  %v543_v4 = vld [vmem:[%s10813_s0 + $0x200] sm:$0xff] }
  0xa4   : > { %2226 = vmatprep.subr.bf16.mxu0 %v7750_v38  ;;  %2269 = vmatprep.subr.bf16.mxu1 %v7753_v39  ;;  %v7796_v39 = vcombine.low %v528_v16, %v532_v59  ;;  %v7798_v38 = vcombine.high %v535_v57, %v539_v60  ;;  %v548_v16 = vld [vmem:[%s10813_s0 + $0x228] sm:$0xff]  ;;  %v7816_v59 = vcombine.low %v535_v57, %v539_v60  ;;  %v555_v57 = vld [vmem:[%s10813_s0 + $0x260] sm:$0xff] }
  0xa5   : > { %11434 = vst [vmem:[#allocation129_spill] sm:$0xff] %v7801_v58  ;;  %v552_v60 = vld [vmem:[%s10813_s0 + $0x248] sm:$0xff] }
  0xa6   : > { %11432 = vst [vmem:[#allocation127_spill] sm:$0xff] %v7796_v39  ;;  %11433 = vst [vmem:[#allocation128_spill] sm:$0xff] %v7798_v38 }
  0xa7   : > { %2227 = vmatpush1.bf16.msra.mxu0 %v7768_v6  ;;  %2270 = vmatpush1.bf16.msra.mxu1 %v7772_v32  ;;  %11435 = vst [vmem:[#allocation130_spill] sm:$0xff] %v7816_v59  ;;  %v7825_v32 = vcombine.high %v544_v49, %v548_v16  ;;  %v551_v6 = vld [vmem:[%s10813_s0 + $0x240] sm:$0xff] }
  0xa8   : > { %2228 = vmatprep.subr.bf16.mxu0 %v7774_v56  ;;  %2271 = vmatprep.subr.bf16.mxu1 %v7777_v53  ;;  %v7820_v53 = vcombine.low %v536_v12, %v540_v48  ;;  %v7822_v56 = vcombine.high %v543_v4, %v547_v31  ;;  %v556_v12 = vld [vmem:[%s10813_s0 + $0x268] sm:$0xff]  ;;  %v7840_v48 = vcombine.low %v543_v4, %v547_v31  ;;  %v563_v4 = vld [vmem:[%s10813_s0 + $0x2a0] sm:$0xff] }
  0xa9   : > { %11438 = vst [vmem:[#allocation133_spill] sm:$0xff] %v7825_v32  ;;  %v560_v31 = vld [vmem:[%s10813_s0 + $0x288] sm:$0xff] }
  0xaa   : > { %11436 = vst [vmem:[#allocation131_spill] sm:$0xff] %v7820_v53  ;;  %11437 = vst [vmem:[#allocation132_spill] sm:$0xff] %v7822_v56 }
  0xab   : > { %2229 = vmatpush1.bf16.msra.mxu0 %v7792_v15  ;;  %2272 = vmatpush1.bf16.msra.mxu1 %v7796_v39  ;;  %11439 = vst [vmem:[#allocation134_spill] sm:$0xff] %v7840_v48  ;;  %v7849_v39 = vcombine.high %v552_v60, %v556_v12  ;;  %v559_v15 = vld [vmem:[%s10813_s0 + $0x280] sm:$0xff] }
  0xac   : > { %2230 = vmatprep.subr.bf16.mxu0 %v7798_v38  ;;  %2273 = vmatprep.subr.bf16.mxu1 %v7801_v58  ;;  %v7844_v58 = vcombine.low %v544_v49, %v548_v16  ;;  %v7846_v38 = vcombine.high %v551_v6, %v555_v57  ;;  %v564_v49 = vld [vmem:[%s10813_s0 + $0x2a8] sm:$0xff]  ;;  %v7864_v16 = vcombine.low %v551_v6, %v555_v57  ;;  %v571_v6 = vld [vmem:[%s10813_s0 + $0x2e0] sm:$0xff] }
  0xad   : > { %11442 = vst [vmem:[#allocation137_spill] sm:$0xff] %v7849_v39  ;;  %v568_v57 = vld [vmem:[%s10813_s0 + $0x2c8] sm:$0xff] }
  0xae   : > { %11440 = vst [vmem:[#allocation135_spill] sm:$0xff] %v7844_v58  ;;  %11441 = vst [vmem:[#allocation136_spill] sm:$0xff] %v7846_v38 }
  0xaf   : > { %2231 = vmatpush1.bf16.msra.mxu0 %v7816_v59  ;;  %2274 = vmatpush1.bf16.msra.mxu1 %v7820_v53  ;;  %11443 = vst [vmem:[#allocation138_spill] sm:$0xff] %v7864_v16  ;;  %v7873_v53 = vcombine.high %v560_v31, %v564_v49  ;;  %v567_v59 = vld [vmem:[%s10813_s0 + $0x2c0] sm:$0xff] }
  0xb0   : > { %2232 = vmatprep.subr.bf16.mxu0 %v7822_v56  ;;  %2275 = vmatprep.subr.bf16.mxu1 %v7825_v32  ;;  %v7868_v32 = vcombine.low %v552_v60, %v556_v12  ;;  %v7870_v56 = vcombine.high %v559_v15, %v563_v4  ;;  %v572_v60 = vld [vmem:[%s10813_s0 + $0x2e8] sm:$0xff]  ;;  %v7888_v12 = vcombine.low %v559_v15, %v563_v4  ;;  %v579_v15 = vld [vmem:[%s10813_s0 + $0x320] sm:$0xff] }
  0xb1   : > { %11446 = vst [vmem:[#allocation141_spill] sm:$0xff] %v7873_v53  ;;  %v576_v4 = vld [vmem:[%s10813_s0 + $0x308] sm:$0xff] }
  0xb2   : > { %11444 = vst [vmem:[#allocation139_spill] sm:$0xff] %v7868_v32  ;;  %11445 = vst [vmem:[#allocation140_spill] sm:$0xff] %v7870_v56 }
  0xb3   : > { %2233 = vmatpush1.bf16.msra.mxu0 %v7840_v48  ;;  %2276 = vmatpush1.bf16.msra.mxu1 %v7844_v58  ;;  %11447 = vst [vmem:[#allocation142_spill] sm:$0xff] %v7888_v12  ;;  %v7897_v58 = vcombine.high %v568_v57, %v572_v60  ;;  %v575_v48 = vld [vmem:[%s10813_s0 + $0x300] sm:$0xff] }
  0xb4   : > { %2234 = vmatprep.subr.bf16.mxu0 %v7846_v38  ;;  %2277 = vmatprep.subr.bf16.mxu1 %v7849_v39  ;;  %v7892_v39 = vcombine.low %v560_v31, %v564_v49  ;;  %v7894_v38 = vcombine.high %v567_v59, %v571_v6  ;;  %v580_v31 = vld [vmem:[%s10813_s0 + $0x328] sm:$0xff]  ;;  %v7912_v49 = vcombine.low %v567_v59, %v571_v6  ;;  %v587_v59 = vld [vmem:[%s10813_s0 + $0x360] sm:$0xff] }
  0xb5   : > { %11450 = vst [vmem:[#allocation145_spill] sm:$0xff] %v7897_v58  ;;  %v584_v6 = vld [vmem:[%s10813_s0 + $0x348] sm:$0xff] }
  0xb6   : > { %11448 = vst [vmem:[#allocation143_spill] sm:$0xff] %v7892_v39  ;;  %11449 = vst [vmem:[#allocation144_spill] sm:$0xff] %v7894_v38 }
  0xb7   : > { %2235 = vmatpush1.bf16.msra.mxu0 %v7864_v16  ;;  %2278 = vmatpush1.bf16.msra.mxu1 %v7868_v32  ;;  %11451 = vst [vmem:[#allocation146_spill] sm:$0xff] %v7912_v49  ;;  %v7921_v32 = vcombine.high %v576_v4, %v580_v31  ;;  %v583_v16 = vld [vmem:[%s10813_s0 + $0x340] sm:$0xff] }
  0xb8   : > { %2236 = vmatprep.subr.bf16.mxu0 %v7870_v56  ;;  %2279 = vmatprep.subr.bf16.mxu1 %v7873_v53  ;;  %v7916_v53 = vcombine.low %v568_v57, %v572_v60  ;;  %v7918_v56 = vcombine.high %v575_v48, %v579_v15  ;;  %v588_v57 = vld [vmem:[%s10813_s0 + $0x368] sm:$0xff]  ;;  %v7936_v60 = vcombine.low %v575_v48, %v579_v15  ;;  %v595_v48 = vld [vmem:[%s10813_s0 + $0x3a0] sm:$0xff] }
  0xb9   : > { %11454 = vst [vmem:[#allocation149_spill] sm:$0xff] %v7921_v32  ;;  %v592_v15 = vld [vmem:[%s10813_s0 + $0x388] sm:$0xff] }
  0xba   : > { %11452 = vst [vmem:[#allocation147_spill] sm:$0xff] %v7916_v53  ;;  %11453 = vst [vmem:[#allocation148_spill] sm:$0xff] %v7918_v56 }
  0xbb   : > { %2237 = vmatpush1.bf16.msra.mxu0 %v7888_v12  ;;  %2280 = vmatpush1.bf16.msra.mxu1 %v7892_v39  ;;  %11455 = vst [vmem:[#allocation150_spill] sm:$0xff] %v7936_v60  ;;  %v7945_v39 = vcombine.high %v584_v6, %v588_v57  ;;  %v591_v12 = vld [vmem:[%s10813_s0 + $0x380] sm:$0xff] }
  0xbc   : > { %2238 = vmatprep.subr.bf16.mxu0 %v7894_v38  ;;  %2281 = vmatprep.subr.bf16.mxu1 %v7897_v58  ;;  %v7940_v58 = vcombine.low %v576_v4, %v580_v31  ;;  %v7942_v38 = vcombine.high %v583_v16, %v587_v59  ;;  %v596_v4 = vld [vmem:[%s10813_s0 + $0x3a8] sm:$0xff]  ;;  %v7960_v31 = vcombine.low %v583_v16, %v587_v59  ;;  %v603_v16 = vld [vmem:[%s10813_s0 + $0x3e0] sm:$0xff] }
  0xbd   : > { %11458 = vst [vmem:[#allocation153_spill] sm:$0xff] %v7945_v39  ;;  %v600_v59 = vld [vmem:[%s10813_s0 + $0x3c8] sm:$0xff] }
  0xbe   : > { %11456 = vst [vmem:[#allocation151_spill] sm:$0xff] %v7940_v58  ;;  %11457 = vst [vmem:[#allocation152_spill] sm:$0xff] %v7942_v38 }
  0xbf   : > { %2239 = vmatpush1.bf16.msra.mxu0 %v7912_v49  ;;  %2282 = vmatpush1.bf16.msra.mxu1 %v7916_v53  ;;  %11459 = vst [vmem:[#allocation154_spill] sm:$0xff] %v7960_v31  ;;  %v7969_v53 = vcombine.high %v592_v15, %v596_v4  ;;  %v599_v49 = vld [vmem:[%s10813_s0 + $0x3c0] sm:$0xff] }
  0xc0   : > { %2240 = vmatprep.subr.bf16.mxu0 %v7918_v56  ;;  %2283 = vmatprep.subr.bf16.mxu1 %v7921_v32  ;;  %v7964_v32 = vcombine.low %v584_v6, %v588_v57  ;;  %v7966_v56 = vcombine.high %v591_v12, %v595_v48  ;;  %v604_v6 = vld [vmem:[%s10813_s0 + $0x3e8] sm:$0xff]  ;;  %v7984_v57 = vcombine.low %v591_v12, %v595_v48  ;;  %v485_v12 = vld [vmem:[%s10813_s0 + $0x30] sm:$0xff]  ;;  %v482_v48 = vld [vmem:[%s10813_s0 + $0x18] sm:$0xff] }
  0xc1   : > { %11462 = vst [vmem:[#allocation157_spill] sm:$0xff] %v7969_v53 }
  0xc2   : > { %11460 = vst [vmem:[#allocation155_spill] sm:$0xff] %v7964_v32  ;;  %11461 = vst [vmem:[#allocation156_spill] sm:$0xff] %v7966_v56 }
  0xc3   : > { %2241 = vmatpush1.bf16.msra.mxu0 %v7936_v60  ;;  %2284 = vmatpush1.bf16.msra.mxu1 %v7940_v58  ;;  %11463 = vst [vmem:[#allocation158_spill] sm:$0xff] %v7984_v57  ;;  %v7993_v58 = vcombine.high %v600_v59, %v604_v6  ;;  %v481_v60 = vld [vmem:[%s10813_s0 + $0x10] sm:$0xff] }
  0xc4   : > { %2242 = vmatprep.subr.bf16.mxu0 %v7942_v38  ;;  %2285 = vmatprep.subr.bf16.mxu1 %v7945_v39  ;;  %v7988_v39 = vcombine.low %v592_v15, %v596_v4  ;;  %v7990_v38 = vcombine.high %v599_v49, %v603_v16  ;;  %v486_v15 = vld [vmem:[%s10813_s0 + $0x38] sm:$0xff]  ;;  %v8008_v4 = vcombine.low %v599_v49, %v603_v16  ;;  %v493_v49 = vld [vmem:[%s10813_s0 + $0x70] sm:$0xff] }
  0xc5   : > { %11466 = vst [vmem:[#allocation161_spill] sm:$0xff] %v7993_v58  ;;  %v490_v16 = vld [vmem:[%s10813_s0 + $0x58] sm:$0xff] }
  0xc6   : > { %11464 = vst [vmem:[#allocation159_spill] sm:$0xff] %v7988_v39  ;;  %11465 = vst [vmem:[#allocation160_spill] sm:$0xff] %v7990_v38 }
  0xc7   : > { %2243 = vmatpush1.bf16.msra.mxu0 %v7960_v31  ;;  %2286 = vmatpush1.bf16.msra.mxu1 %v7964_v32  ;;  %11467 = vst [vmem:[#allocation162_spill] sm:$0xff] %v8008_v4  ;;  %v8017_v32 = vcombine.high %v482_v48, %v486_v15  ;;  %v489_v31 = vld [vmem:[%s10813_s0 + $0x50] sm:$0xff] }
  0xc8   : > { %2244 = vmatprep.subr.bf16.mxu0 %v7966_v56  ;;  %2287 = vmatprep.subr.bf16.mxu1 %v7969_v53  ;;  %v8012_v53 = vcombine.low %v600_v59, %v604_v6  ;;  %v8014_v56 = vcombine.high %v481_v60, %v485_v12  ;;  %v494_v59 = vld [vmem:[%s10813_s0 + $0x78] sm:$0xff]  ;;  %v8032_v6 = vcombine.low %v481_v60, %v485_v12  ;;  %v501_v60 = vld [vmem:[%s10813_s0 + $0xb0] sm:$0xff] }
  0xc9   : > { %11470 = vst [vmem:[#allocation165_spill] sm:$0xff] %v8017_v32  ;;  %v498_v12 = vld [vmem:[%s10813_s0 + $0x98] sm:$0xff] }
  0xca   : > { %11468 = vst [vmem:[#allocation163_spill] sm:$0xff] %v8012_v53  ;;  %11469 = vst [vmem:[#allocation164_spill] sm:$0xff] %v8014_v56 }
  0xcb   : > { %2245 = vmatpush1.bf16.msra.mxu0 %v7984_v57  ;;  %2288 = vmatpush1.bf16.msra.mxu1 %v7988_v39  ;;  %11471 = vst [vmem:[#allocation166_spill] sm:$0xff] %v8032_v6  ;;  %v8041_v39 = vcombine.high %v490_v16, %v494_v59  ;;  %v497_v57 = vld [vmem:[%s10813_s0 + $0x90] sm:$0xff] }
  0xcc   : > { %2246 = vmatprep.subr.bf16.mxu0 %v7990_v38  ;;  %2289 = vmatprep.subr.bf16.mxu1 %v7993_v58  ;;  %v8036_v58 = vcombine.low %v482_v48, %v486_v15  ;;  %v8038_v38 = vcombine.high %v489_v31, %v493_v49  ;;  %v502_v48 = vld [vmem:[%s10813_s0 + $0xb8] sm:$0xff]  ;;  %v8058_v15 = vcombine.low %v489_v31, %v493_v49  ;;  %v509_v31 = vld [vmem:[%s10813_s0 + $0xf0] sm:$0xff] }
  0xcd   : > { %11474 = vst [vmem:[#allocation169_spill] sm:$0xff] %v8041_v39  ;;  %v506_v49 = vld [vmem:[%s10813_s0 + $0xd8] sm:$0xff] }
  0xce   : > { %11472 = vst [vmem:[#allocation167_spill] sm:$0xff] %v8036_v58  ;;  %11473 = vst [vmem:[#allocation168_spill] sm:$0xff] %v8038_v38 }
  0xcf   : > { %2247 = vmatpush1.bf16.msra.mxu0 %v8008_v4  ;;  %2290 = vmatpush1.bf16.msra.mxu1 %v8012_v53  ;;  %11475 = vst [vmem:[#allocation170_spill] sm:$0xff] %v8058_v15  ;;  %v8067_v53 = vcombine.high %v498_v12, %v502_v48  ;;  %v505_v4 = vld [vmem:[%s10813_s0 + $0xd0] sm:$0xff] }
  0xd0   : > { %2302 = vmatprep.subr.bf16.mxu0 %v8014_v56  ;;  %2345 = vmatprep.subr.bf16.mxu1 %v8017_v32  ;;  %v8062_v32 = vcombine.low %v490_v16, %v494_v59  ;;  %v8064_v56 = vcombine.high %v497_v57, %v501_v60  ;;  %v510_v16 = vld [vmem:[%s10813_s0 + $0xf8] sm:$0xff]  ;;  %v8084_v59 = vcombine.low %v497_v57, %v501_v60  ;;  %v517_v57 = vld [vmem:[%s10813_s0 + $0x130] sm:$0xff] }
  0xd1   : > { %11478 = vst [vmem:[#allocation173_spill] sm:$0xff] %v8067_v53  ;;  %v514_v60 = vld [vmem:[%s10813_s0 + $0x118] sm:$0xff] }
  0xd2   : > { %2249 = vmatmul.mubr.bf16.vlgmr.msra.gmra.mrb[0].mxu0 %v7145_v25  ;;  %2292 = vmatmul.mubr.bf16.vlgmr.msra.gmra.mrb[0].mxu1 %v7145_v25  ;;  %11476 = vst [vmem:[#allocation171_spill] sm:$0xff] %v8062_v32  ;;  %11477 = vst [vmem:[#allocation172_spill] sm:$0xff] %v8064_v56 }
  0xd3   : > { %2303 = vmatpush1.bf16.msra.mxu0 %v8032_v6  ;;  %2346 = vmatpush1.bf16.msra.mxu1 %v8036_v58  ;;  %11479 = vst [vmem:[#allocation174_spill] sm:$0xff] %v8084_v59  ;;  %v8093_v58 = vcombine.high %v506_v49, %v510_v16  ;;  %v513_v6 = vld [vmem:[%s10813_s0 + $0x110] sm:$0xff] }
  0xd4   : > { %2304 = vmatprep.subr.bf16.mxu0 %v8038_v38  ;;  %2347 = vmatprep.subr.bf16.mxu1 %v8041_v39  ;;  %v8088_v39 = vcombine.low %v498_v12, %v502_v48  ;;  %v8090_v38 = vcombine.high %v505_v4, %v509_v31  ;;  %v518_v12 = vld [vmem:[%s10813_s0 + $0x138] sm:$0xff]  ;;  %v8108_v48 = vcombine.low %v505_v4, %v509_v31  ;;  %v525_v4 = vld [vmem:[%s10813_s0 + $0x170] sm:$0xff] }
  0xd5   : > { %2334 = vmatprep.mubr.bf16.mxu0 %v6978_v61  ;;  %2377 = vmatprep.mubr.bf16.mxu1 %v6978_v61  ;;  %11482 = vst [vmem:[#allocation177_spill] sm:$0xff] %v8093_v58  ;;  %v522_v31 = vld [vmem:[%s10813_s0 + $0x158] sm:$0xff] }
  0xd6   : > { %11480 = vst [vmem:[#allocation175_spill] sm:$0xff] %v8088_v39  ;;  %11481 = vst [vmem:[#allocation176_spill] sm:$0xff] %v8090_v38 }
  0xd7   : > { %2305 = vmatpush1.bf16.msra.mxu0 %v8058_v15  ;;  %2348 = vmatpush1.bf16.msra.mxu1 %v8062_v32  ;;  %11483 = vst [vmem:[#allocation178_spill] sm:$0xff] %v8108_v48  ;;  %v8117_v32 = vcombine.high %v514_v60, %v518_v12  ;;  %v521_v15 = vld [vmem:[%s10813_s0 + $0x150] sm:$0xff] }
  0xd8   : > { %2306 = vmatprep.subr.bf16.mxu0 %v8064_v56  ;;  %2349 = vmatprep.subr.bf16.mxu1 %v8067_v53  ;;  %v8112_v53 = vcombine.low %v506_v49, %v510_v16  ;;  %v8114_v56 = vcombine.high %v513_v6, %v517_v57  ;;  %v526_v49 = vld [vmem:[%s10813_s0 + $0x178] sm:$0xff]  ;;  %v8132_v16 = vcombine.low %v513_v6, %v517_v57  ;;  %v533_v6 = vld [vmem:[%s10813_s0 + $0x1b0] sm:$0xff] }
  0xd9   : > { %11486 = vst [vmem:[#allocation181_spill] sm:$0xff] %v8117_v32  ;;  %v530_v57 = vld [vmem:[%s10813_s0 + $0x198] sm:$0xff] }
  0xda   : > { %11484 = vst [vmem:[#allocation179_spill] sm:$0xff] %v8112_v53  ;;  %11485 = vst [vmem:[#allocation180_spill] sm:$0xff] %v8114_v56 }
  0xdb   : > { %2307 = vmatpush1.bf16.msra.mxu0 %v8084_v59  ;;  %2350 = vmatpush1.bf16.msra.mxu1 %v8088_v39  ;;  %11487 = vst [vmem:[#allocation182_spill] sm:$0xff] %v8132_v16  ;;  %v8141_v39 = vcombine.high %v522_v31, %v526_v49  ;;  %v529_v59 = vld [vmem:[%s10813_s0 + $0x190] sm:$0xff] }
  0xdc   : > { %2308 = vmatprep.subr.bf16.mxu0 %v8090_v38  ;;  %2351 = vmatprep.subr.bf16.mxu1 %v8093_v58  ;;  %v8136_v58 = vcombine.low %v514_v60, %v518_v12  ;;  %v8138_v38 = vcombine.high %v521_v15, %v525_v4  ;;  %v534_v60 = vld [vmem:[%s10813_s0 + $0x1b8] sm:$0xff]  ;;  %v8156_v12 = vcombine.low %v521_v15, %v525_v4  ;;  %v541_v15 = vld [vmem:[%s10813_s0 + $0x1f0] sm:$0xff] }
  0xdd   : > { %11490 = vst [vmem:[#allocation185_spill] sm:$0xff] %v8141_v39  ;;  %v538_v4 = vld [vmem:[%s10813_s0 + $0x1d8] sm:$0xff] }
  0xde   : > { %11488 = vst [vmem:[#allocation183_spill] sm:$0xff] %v8136_v58  ;;  %11489 = vst [vmem:[#allocation184_spill] sm:$0xff] %v8138_v38 }
  0xdf   : > { %2309 = vmatpush1.bf16.msra.mxu0 %v8108_v48  ;;  %2352 = vmatpush1.bf16.msra.mxu1 %v8112_v53  ;;  %11491 = vst [vmem:[#allocation186_spill] sm:$0xff] %v8156_v12  ;;  %v8165_v53 = vcombine.high %v530_v57, %v534_v60  ;;  %v537_v48 = vld [vmem:[%s10813_s0 + $0x1d0] sm:$0xff] }
  0xe0   : > { %2310 = vmatprep.subr.bf16.mxu0 %v8114_v56  ;;  %2353 = vmatprep.subr.bf16.mxu1 %v8117_v32  ;;  %v8160_v32 = vcombine.low %v522_v31, %v526_v49  ;;  %v8162_v56 = vcombine.high %v529_v59, %v533_v6  ;;  %v542_v31 = vld [vmem:[%s10813_s0 + $0x1f8] sm:$0xff]  ;;  %v8180_v49 = vcombine.low %v529_v59, %v533_v6  ;;  %v549_v59 = vld [vmem:[%s10813_s0 + $0x230] sm:$0xff] }
  0xe1   : > { %11494 = vst [vmem:[#allocation189_spill] sm:$0xff] %v8165_v53  ;;  %v546_v6 = vld [vmem:[%s10813_s0 + $0x218] sm:$0xff] }
  0xe2   : > { %11492 = vst [vmem:[#allocation187_spill] sm:$0xff] %v8160_v32  ;;  %11493 = vst [vmem:[#allocation188_spill] sm:$0xff] %v8162_v56 }
  0xe3   : > { %2311 = vmatpush1.bf16.msra.mxu0 %v8132_v16  ;;  %2354 = vmatpush1.bf16.msra.mxu1 %v8136_v58  ;;  %11495 = vst [vmem:[#allocation190_spill] sm:$0xff] %v8180_v49  ;;  %v8189_v58 = vcombine.high %v538_v4, %v542_v31  ;;  %v545_v16 = vld [vmem:[%s10813_s0 + $0x210] sm:$0xff] }
  0xe4   : > { %2312 = vmatprep.subr.bf16.mxu0 %v8138_v38  ;;  %2355 = vmatprep.subr.bf16.mxu1 %v8141_v39  ;;  %v8184_v39 = vcombine.low %v530_v57, %v534_v60  ;;  %v8186_v38 = vcombine.high %v537_v48, %v541_v15  ;;  %v550_v57 = vld [vmem:[%s10813_s0 + $0x238] sm:$0xff]  ;;  %v8204_v60 = vcombine.low %v537_v48, %v541_v15  ;;  %v557_v48 = vld [vmem:[%s10813_s0 + $0x270] sm:$0xff] }
  0xe5   : > { %11498 = vst [vmem:[#allocation193_spill] sm:$0xff] %v8189_v58  ;;  %v554_v15 = vld [vmem:[%s10813_s0 + $0x258] sm:$0xff] }
  0xe6   : > { %11496 = vst [vmem:[#allocation191_spill] sm:$0xff] %v8184_v39  ;;  %11497 = vst [vmem:[#allocation192_spill] sm:$0xff] %v8186_v38 }
  0xe7   : > { %2313 = vmatpush1.bf16.msra.mxu0 %v8156_v12  ;;  %2356 = vmatpush1.bf16.msra.mxu1 %v8160_v32  ;;  %11499 = vst [vmem:[#allocation194_spill] sm:$0xff] %v8204_v60  ;;  %v8213_v32 = vcombine.high %v546_v6, %v550_v57  ;;  %v553_v12 = vld [vmem:[%s10813_s0 + $0x250] sm:$0xff] }
  0xe8   : > { %2314 = vmatprep.subr.bf16.mxu0 %v8162_v56  ;;  %2357 = vmatprep.subr.bf16.mxu1 %v8165_v53  ;;  %v8208_v53 = vcombine.low %v538_v4, %v542_v31  ;;  %v8210_v56 = vcombine.high %v545_v16, %v549_v59  ;;  %v558_v4 = vld [vmem:[%s10813_s0 + $0x278] sm:$0xff]  ;;  %v8228_v31 = vcombine.low %v545_v16, %v549_v59  ;;  %v565_v16 = vld [vmem:[%s10813_s0 + $0x2b0] sm:$0xff] }
  0xe9   : > { %11502 = vst [vmem:[#allocation197_spill] sm:$0xff] %v8213_v32  ;;  %v562_v59 = vld [vmem:[%s10813_s0 + $0x298] sm:$0xff] }
  0xea   : > { %11500 = vst [vmem:[#allocation195_spill] sm:$0xff] %v8208_v53  ;;  %11501 = vst [vmem:[#allocation196_spill] sm:$0xff] %v8210_v56 }
  0xeb   : > { %2315 = vmatpush1.bf16.msra.mxu0 %v8180_v49  ;;  %2358 = vmatpush1.bf16.msra.mxu1 %v8184_v39  ;;  %11503 = vst [vmem:[#allocation198_spill] sm:$0xff] %v8228_v31  ;;  %v8237_v39 = vcombine.high %v554_v15, %v558_v4  ;;  %v561_v49 = vld [vmem:[%s10813_s0 + $0x290] sm:$0xff] }
  0xec   : > { %2316 = vmatprep.subr.bf16.mxu0 %v8186_v38  ;;  %2359 = vmatprep.subr.bf16.mxu1 %v8189_v58  ;;  %v8232_v58 = vcombine.low %v546_v6, %v550_v57  ;;  %v8234_v38 = vcombine.high %v553_v12, %v557_v48  ;;  %v566_v6 = vld [vmem:[%s10813_s0 + $0x2b8] sm:$0xff]  ;;  %v8252_v57 = vcombine.low %v553_v12, %v557_v48  ;;  %v573_v12 = vld [vmem:[%s10813_s0 + $0x2f0] sm:$0xff] }
  0xed   : > { %11506 = vst [vmem:[#allocation201_spill] sm:$0xff] %v8237_v39  ;;  %v570_v48 = vld [vmem:[%s10813_s0 + $0x2d8] sm:$0xff] }
  0xee   : > { %11504 = vst [vmem:[#allocation199_spill] sm:$0xff] %v8232_v58  ;;  %11505 = vst [vmem:[#allocation200_spill] sm:$0xff] %v8234_v38 }
  0xef   : > { %2317 = vmatpush1.bf16.msra.mxu0 %v8204_v60  ;;  %2360 = vmatpush1.bf16.msra.mxu1 %v8208_v53  ;;  %11507 = vst [vmem:[#allocation202_spill] sm:$0xff] %v8252_v57  ;;  %v8261_v53 = vcombine.high %v562_v59, %v566_v6  ;;  %v569_v60 = vld [vmem:[%s10813_s0 + $0x2d0] sm:$0xff] }
  0xf0   : > { %2318 = vmatprep.subr.bf16.mxu0 %v8210_v56  ;;  %2361 = vmatprep.subr.bf16.mxu1 %v8213_v32  ;;  %v8256_v32 = vcombine.low %v554_v15, %v558_v4  ;;  %v8258_v56 = vcombine.high %v561_v49, %v565_v16  ;;  %v574_v15 = vld [vmem:[%s10813_s0 + $0x2f8] sm:$0xff]  ;;  %v8276_v4 = vcombine.low %v561_v49, %v565_v16  ;;  %v581_v49 = vld [vmem:[%s10813_s0 + $0x330] sm:$0xff] }
  0xf1   : > { %11510 = vst [vmem:[#allocation205_spill] sm:$0xff] %v8261_v53  ;;  %v578_v16 = vld [vmem:[%s10813_s0 + $0x318] sm:$0xff] }
  0xf2   : > { %11508 = vst [vmem:[#allocation203_spill] sm:$0xff] %v8256_v32  ;;  %11509 = vst [vmem:[#allocation204_spill] sm:$0xff] %v8258_v56 }
  0xf3   : > { %2319 = vmatpush1.bf16.msra.mxu0 %v8228_v31  ;;  %2362 = vmatpush1.bf16.msra.mxu1 %v8232_v58  ;;  %11511 = vst [vmem:[#allocation206_spill] sm:$0xff] %v8276_v4  ;;  %v8285_v58 = vcombine.high %v570_v48, %v574_v15  ;;  %v577_v31 = vld [vmem:[%s10813_s0 + $0x310] sm:$0xff] }
  0xf4   : > { %2320 = vmatprep.subr.bf16.mxu0 %v8234_v38  ;;  %2363 = vmatprep.subr.bf16.mxu1 %v8237_v39  ;;  %v8280_v39 = vcombine.low %v562_v59, %v566_v6  ;;  %v8282_v38 = vcombine.high %v569_v60, %v573_v12  ;;  %v582_v59 = vld [vmem:[%s10813_s0 + $0x338] sm:$0xff]  ;;  %v8300_v6 = vcombine.low %v569_v60, %v573_v12  ;;  %v589_v60 = vld [vmem:[%s10813_s0 + $0x370] sm:$0xff] }
  0xf5   : > { %11514 = vst [vmem:[#allocation209_spill] sm:$0xff] %v8285_v58  ;;  %v586_v12 = vld [vmem:[%s10813_s0 + $0x358] sm:$0xff] }
  0xf6   : > { %11512 = vst [vmem:[#allocation207_spill] sm:$0xff] %v8280_v39  ;;  %11513 = vst [vmem:[#allocation208_spill] sm:$0xff] %v8282_v38 }
  0xf7   : > { %2321 = vmatpush1.bf16.msra.mxu0 %v8252_v57  ;;  %2364 = vmatpush1.bf16.msra.mxu1 %v8256_v32  ;;  %11515 = vst [vmem:[#allocation210_spill] sm:$0xff] %v8300_v6  ;;  %v8309_v32 = vcombine.high %v578_v16, %v582_v59  ;;  %v585_v57 = vld [vmem:[%s10813_s0 + $0x350] sm:$0xff] }
  0xf8   : > { %2322 = vmatprep.subr.bf16.mxu0 %v8258_v56  ;;  %2365 = vmatprep.subr.bf16.mxu1 %v8261_v53  ;;  %v8304_v53 = vcombine.low %v570_v48, %v574_v15  ;;  %v8306_v56 = vcombine.high %v577_v31, %v581_v49  ;;  %v590_v48 = vld [vmem:[%s10813_s0 + $0x378] sm:$0xff]  ;;  %v8324_v15 = vcombine.low %v577_v31, %v581_v49  ;;  %v597_v31 = vld [vmem:[%s10813_s0 + $0x3b0] sm:$0xff] }
  0xf9   : > { %11518 = vst [vmem:[#allocation213_spill] sm:$0xff] %v8309_v32  ;;  %v594_v49 = vld [vmem:[%s10813_s0 + $0x398] sm:$0xff] }
  0xfa   : > { %11516 = vst [vmem:[#allocation211_spill] sm:$0xff] %v8304_v53  ;;  %11517 = vst [vmem:[#allocation212_spill] sm:$0xff] %v8306_v56 }
  0xfb   : > { %2323 = vmatpush1.bf16.msra.mxu0 %v8276_v4  ;;  %2366 = vmatpush1.bf16.msra.mxu1 %v8280_v39  ;;  %11519 = vst [vmem:[#allocation214_spill] sm:$0xff] %v8324_v15  ;;  %v8333_v39 = vcombine.high %v586_v12, %v590_v48  ;;  %v593_v4 = vld [vmem:[%s10813_s0 + $0x390] sm:$0xff] }
  0xfc   : > { %2324 = vmatprep.subr.bf16.mxu0 %v8282_v38  ;;  %2367 = vmatprep.subr.bf16.mxu1 %v8285_v58  ;;  %v8328_v58 = vcombine.low %v578_v16, %v582_v59  ;;  %v8330_v38 = vcombine.high %v585_v57, %v589_v60  ;;  %v598_v16 = vld [vmem:[%s10813_s0 + $0x3b8] sm:$0xff]  ;;  %v8348_v59 = vcombine.low %v585_v57, %v589_v60  ;;  %v605_v57 = vld [vmem:[%s10813_s0 + $0x3f0] sm:$0xff] }
  0xfd   : > { %11522 = vst [vmem:[#allocation217_spill] sm:$0xff] %v8333_v39  ;;  %v602_v60 = vld [vmem:[%s10813_s0 + $0x3d8] sm:$0xff] }
  0xfe   : > { %11520 = vst [vmem:[#allocation215_spill] sm:$0xff] %v8328_v58  ;;  %11521 = vst [vmem:[#allocation216_spill] sm:$0xff] %v8330_v38 }
  0xff   : > { %2325 = vmatpush1.bf16.msra.mxu0 %v8300_v6  ;;  %2368 = vmatpush1.bf16.msra.mxu1 %v8304_v53  ;;  %11523 = vst [vmem:[#allocation218_spill] sm:$0xff] %v8348_v59  ;;  %v8357_v53 = vcombine.high %v594_v49, %v598_v16  ;;  %v601_v6 = vld [vmem:[%s10813_s0 + $0x3d0] sm:$0xff] }
 0x100   : > { %2326 = vmatprep.subr.bf16.mxu0 %v8306_v56  ;;  %2369 = vmatprep.subr.bf16.mxu1 %v8309_v32  ;;  %v8352_v32 = vcombine.low %v586_v12, %v590_v48  ;;  %v8354_v56 = vcombine.high %v593_v4, %v597_v31  ;;  %v606_v12 = vld [vmem:[%s10813_s0 + $0x3f8] sm:$0xff]  ;;  %v8372_v48 = vcombine.low %v593_v4, %v597_v31  ;;  %v2392_v4 = vld [vmem:[%s10813_s0 + $0x820] sm:$0xff]  ;;  %v2389_v31 = vld [vmem:[%s10813_s0 + $0x808] sm:$0xff] }
 0x101   : > { %11526 = vst [vmem:[#allocation221_spill] sm:$0xff] %v8357_v53 }
 0x102   : > { %11524 = vst [vmem:[#allocation219_spill] sm:$0xff] %v8352_v32  ;;  %11525 = vst [vmem:[#allocation220_spill] sm:$0xff] %v8354_v56 }
 0x103   : > { %2327 = vmatpush1.bf16.msra.mxu0 %v8324_v15  ;;  %2370 = vmatpush1.bf16.msra.mxu1 %v8328_v58  ;;  %11527 = vst [vmem:[#allocation222_spill] sm:$0xff] %v8372_v48  ;;  %v8381_v58 = vcombine.high %v602_v60, %v606_v12  ;;  %v2388_v15 = vld [vmem:[%s10813_s0 + $0x800] sm:$0xff] }
 0x104   : > { %2328 = vmatprep.subr.bf16.mxu0 %v8330_v38  ;;  %2371 = vmatprep.subr.bf16.mxu1 %v8333_v39  ;;  %v8376_v39 = vcombine.low %v594_v49, %v598_v16  ;;  %v8378_v38 = vcombine.high %v601_v6, %v605_v57  ;;  %v2393_v49 = vld [vmem:[%s10813_s0 + $0x828] sm:$0xff]  ;;  %v8396_v16 = vcombine.low %v601_v6, %v605_v57  ;;  %v2400_v6 = vld [vmem:[%s10813_s0 + $0x860] sm:$0xff] }
 0x105   : > { %11530 = vst [vmem:[#allocation225_spill] sm:$0xff] %v8381_v58  ;;  %v2397_v57 = vld [vmem:[%s10813_s0 + $0x848] sm:$0xff] }
 0x106   : > { %11528 = vst [vmem:[#allocation223_spill] sm:$0xff] %v8376_v39  ;;  %11529 = vst [vmem:[#allocation224_spill] sm:$0xff] %v8378_v38 }
 0x107   : > { %2329 = vmatpush1.bf16.msra.mxu0 %v8348_v59  ;;  %2372 = vmatpush1.bf16.msra.mxu1 %v8352_v32  ;;  %11531 = vst [vmem:[#allocation226_spill] sm:$0xff] %v8396_v16  ;;  %v8405_v32 = vcombine.high %v2389_v31, %v2393_v49  ;;  %v2396_v59 = vld [vmem:[%s10813_s0 + $0x840] sm:$0xff] }
 0x108   : > { %2330 = vmatprep.subr.bf16.mxu0 %v8354_v56  ;;  %2373 = vmatprep.subr.bf16.mxu1 %v8357_v53  ;;  %v8400_v53 = vcombine.low %v602_v60, %v606_v12  ;;  %v8402_v56 = vcombine.high %v2388_v15, %v2392_v4  ;;  %v2401_v60 = vld [vmem:[%s10813_s0 + $0x868] sm:$0xff]  ;;  %v2524_v12 = vrot.slane %v6978_v61, 1 }
 0x109   : > { %11534 = vst [vmem:[#allocation229_spill] sm:$0xff] %v8405_v32  ;;  %v8431_v17 = vcombine.high %v2397_v57, %v2401_v60 }
 0x10a   : > { %11532 = vst [vmem:[#allocation227_spill] sm:$0xff] %v8400_v53  ;;  %11533 = vst [vmem:[#allocation228_spill] sm:$0xff] %v8402_v56 }
 0x10b   : > { %2331 = vmatpush1.bf16.msra.mxu0 %v8372_v48  ;;  %2374 = vmatpush1.bf16.msra.mxu1 %v8376_v39  ;;  %v8426_v39 = vcombine.low %v2389_v31, %v2393_v49  ;;  %v8428_v48 = vcombine.high %v2396_v59, %v2400_v6  ;;  %11538 = vst [vmem:[#allocation233_spill] sm:$0xff] %v8431_v17  ;;  %v2409_v31 = vld [vmem:[%s10813_s0 + $0x8a8] sm:$0xff] }
 0x10c   : > { %2332 = vmatprep.subr.bf16.mxu0 %v8378_v38  ;;  %2375 = vmatprep.subr.bf16.mxu1 %v8381_v58  ;;  %v2525_v58 = vrot.slane %v6980_v62, 1  ;;  %v8422_v38 = vcombine.low %v2388_v15, %v2392_v4  ;;  %v2408_v15 = vld [vmem:[%s10813_s0 + $0x8a0] sm:$0xff]  ;;  %v2405_v4 = vld [vmem:[%s10813_s0 + $0x888] sm:$0xff] }
 0x10d   : > { %11536 = vst [vmem:[#allocation231_spill] sm:$0xff] %v8426_v39  ;;  %11537 = vst [vmem:[#allocation232_spill] sm:$0xff] %v8428_v48 }
 0x10e   : > { %11535 = vst [vmem:[#allocation230_spill] sm:$0xff] %v8422_v38  ;;  %v8447_v49 = vsel %vm2520_vm1, %v2524_v12, %v2525_v58  ;;  %v2412_v58 = vld [vmem:[%s10813_s0 + $0x8c0] sm:$0xff]  ;;  %v8481_v12 = vcombine.low %v2405_v4, %v2409_v31 }
 0x10f   : > { %2333 = vmatpush1.bf16.msra.mxu0 %v8396_v16  ;;  %2376 = vmatpush1.bf16.msra.mxu1 %v8400_v53  ;;  %v8457_v53 = vcombine.high %v2404_v11, %v2408_v15  ;;  %v8460_v16 = vcombine.high %v2405_v4, %v2409_v31  ;;  %v2425_v4 = vld [vmem:[%s10813_s0 + $0x928] sm:$0xff] }
 0x110   : > { %3169 = vmatprep.subr.bf16.mxu0 %v8402_v56  ;;  %3212 = vmatprep.subr.bf16.mxu1 %v8405_v32  ;;  %v8451_v32 = vcombine.low %v2396_v59, %v2400_v6  ;;  %v8455_v56 = vcombine.low %v2397_v57, %v2401_v60  ;;  %v2416_v59 = vld [vmem:[%s10813_s0 + $0x8e0] sm:$0xff]  ;;  %v2413_v6 = vld [vmem:[%s10813_s0 + $0x8c8] sm:$0xff]  ;;  %v8477_v60 = vcombine.low %v2404_v11, %v2408_v15 }
 0x111   : > { %11541 = vst [vmem:[#allocation236_spill] sm:$0xff] %v8457_v53  ;;  %11542 = vst [vmem:[#allocation237_spill] sm:$0xff] %v8460_v16  ;;  %v2417_v57 = vld [vmem:[%s10813_s0 + $0x8e8] sm:$0xff]  ;;  %v2424_v11 = vld [vmem:[%s10813_s0 + $0x920] sm:$0xff]  ;;  %v8501_v31 = vcombine.low %v2412_v58, %v2416_v59 }
 0x112   : > { %2335 = vmatmul.mubr.bf16.vlgmr.msra.gmra.mrb[4].mxu0 %v7145_v25  ;;  %2378 = vmatmul.mubr.bf16.vlgmr.msra.gmra.mrb[4].mxu1 %v7145_v25  ;;  %11539 = vst [vmem:[#allocation234_spill] sm:$0xff] %v8451_v32  ;;  %11540 = vst [vmem:[#allocation235_spill] sm:$0xff] %v8455_v56  ;;  %v2421_v15 = vld [vmem:[%s10813_s0 + $0x908] sm:$0xff] }
 0x113   : > { %3170 = vmatpush1.bf16.msra.mxu0 %v8422_v38  ;;  %3213 = vmatpush1.bf16.msra.mxu1 %v8426_v39  ;;  %11543 = vst [vmem:[#allocation238_spill] sm:$0xff] %v8477_v60  ;;  %11544 = vst [vmem:[#allocation239_spill] sm:$0xff] %v8481_v12  ;;  %v2420_v39 = vld [vmem:[%s10813_s0 + $0x900] sm:$0xff] }
 0x114   : > { %3171 = vmatprep.subr.bf16.mxu0 %v8428_v48  ;;  %3214 = vmatprep.subr.bf16.mxu1 %v8431_v17  ;;  %v8483_v17 = vcombine.high %v2412_v58, %v2416_v59  ;;  %v8486_v48 = vcombine.high %v2413_v6, %v2417_v57  ;;  %11547 = vst [vmem:[#allocation242_spill] sm:$0xff] %v8501_v31  ;;  %v2432_v58 = vld [vmem:[%s10813_s0 + $0x960] sm:$0xff]  ;;  %v2429_v59 = vld [vmem:[%s10813_s0 + $0x948] sm:$0xff] }
 0x115   : > { %3201 = vmatprep.mubr.bf16.mxu0 %v8447_v49  ;;  %3244 = vmatprep.mubr.bf16.mxu1 %v8447_v49 }
 0x116   : > { %11545 = vst [vmem:[#allocation240_spill] sm:$0xff] %v8483_v17  ;;  %11546 = vst [vmem:[#allocation241_spill] sm:$0xff] %v8486_v48 }
 0x117   : > { %3172 = vmatpush1.bf16.msra.mxu0 %v8451_v32  ;;  %3215 = vmatpush1.bf16.msra.mxu1 %v8455_v56  ;;  %v8510_v56 = vcombine.high %v2421_v15, %v2425_v4  ;;  %v2428_v32 = vld [vmem:[%s10813_s0 + $0x940] sm:$0xff] }
 0x118   : > { %3173 = vmatprep.subr.bf16.mxu0 %v8457_v53  ;;  %3216 = vmatprep.subr.bf16.mxu1 %v8460_v16  ;;  %v8505_v16 = vcombine.low %v2413_v6, %v2417_v57  ;;  %v8507_v53 = vcombine.high %v2420_v39, %v2424_v11  ;;  %v2433_v6 = vld [vmem:[%s10813_s0 + $0x968] sm:$0xff]  ;;  %v8525_v57 = vcombine.low %v2420_v39, %v2424_v11  ;;  %v2440_v39 = vld [vmem:[%s10813_s0 + $0x9a0] sm:$0xff] }
 0x119   : > { %11550 = vst [vmem:[#allocation245_spill] sm:$0xff] %v8510_v56  ;;  %v2437_v11 = vld [vmem:[%s10813_s0 + $0x988] sm:$0xff] }
 0x11a   : > { %11548 = vst [vmem:[#allocation243_spill] sm:$0xff] %v8505_v16  ;;  %11549 = vst [vmem:[#allocation244_spill] sm:$0xff] %v8507_v53 }
 0x11b   : > { %3174 = vmatpush1.bf16.msra.mxu0 %v8477_v60  ;;  %3217 = vmatpush1.bf16.msra.mxu1 %v8481_v12  ;;  %11551 = vst [vmem:[#allocation246_spill] sm:$0xff] %v8525_v57  ;;  %v8534_v12 = vcombine.high %v2429_v59, %v2433_v6  ;;  %v2436_v60 = vld [vmem:[%s10813_s0 + $0x980] sm:$0xff] }
 0x11c   : > { %3175 = vmatprep.subr.bf16.mxu0 %v8483_v17  ;;  %3218 = vmatprep.subr.bf16.mxu1 %v8486_v48  ;;  %v8529_v48 = vcombine.low %v2421_v15, %v2425_v4  ;;  %v8531_v17 = vcombine.high %v2428_v32, %v2432_v58  ;;  %v2441_v15 = vld [vmem:[%s10813_s0 + $0x9a8] sm:$0xff]  ;;  %v8549_v4 = vcombine.low %v2428_v32, %v2432_v58  ;;  %v2448_v32 = vld [vmem:[%s10813_s0 + $0x9e0] sm:$0xff] }
 0x11d   : > { %11554 = vst [vmem:[#allocation249_spill] sm:$0xff] %v8534_v12  ;;  %v2445_v58 = vld [vmem:[%s10813_s0 + $0x9c8] sm:$0xff] }
 0x11e   : > { %11552 = vst [vmem:[#allocation247_spill] sm:$0xff] %v8529_v48  ;;  %11553 = vst [vmem:[#allocation248_spill] sm:$0xff] %v8531_v17 }
 0x11f   : > { %3176 = vmatpush1.bf16.msra.mxu0 %v8501_v31  ;;  %3219 = vmatpush1.bf16.msra.mxu1 %v8505_v16  ;;  %11555 = vst [vmem:[#allocation250_spill] sm:$0xff] %v8549_v4  ;;  %v8558_v16 = vcombine.high %v2437_v11, %v2441_v15  ;;  %v2444_v31 = vld [vmem:[%s10813_s0 + $0x9c0] sm:$0xff] }
 0x120   : > { %3177 = vmatprep.subr.bf16.mxu0 %v8507_v53  ;;  %3220 = vmatprep.subr.bf16.mxu1 %v8510_v56  ;;  %v8553_v56 = vcombine.low %v2429_v59, %v2433_v6  ;;  %v8555_v53 = vcombine.high %v2436_v60, %v2440_v39  ;;  %v2449_v59 = vld [vmem:[%s10813_s0 + $0x9e8] sm:$0xff]  ;;  %v8573_v6 = vcombine.low %v2436_v60, %v2440_v39  ;;  %v2456_v60 = vld [vmem:[%s10813_s0 + $0xa20] sm:$0xff] }
 0x121   : > { %11558 = vst [vmem:[#allocation253_spill] sm:$0xff] %v8558_v16  ;;  %v2453_v39 = vld [vmem:[%s10813_s0 + $0xa08] sm:$0xff] }
 0x122   : > { %11556 = vst [vmem:[#allocation251_spill] sm:$0xff] %v8553_v56  ;;  %11557 = vst [vmem:[#allocation252_spill] sm:$0xff] %v8555_v53 }
 0x123   : > { %3178 = vmatpush1.bf16.msra.mxu0 %v8525_v57  ;;  %3221 = vmatpush1.bf16.msra.mxu1 %v8529_v48  ;;  %11559 = vst [vmem:[#allocation254_spill] sm:$0xff] %v8573_v6  ;;  %v8582_v48 = vcombine.high %v2445_v58, %v2449_v59  ;;  %v2452_v57 = vld [vmem:[%s10813_s0 + $0xa00] sm:$0xff] }
 0x124   : > { %3179 = vmatprep.subr.bf16.mxu0 %v8531_v17  ;;  %3222 = vmatprep.subr.bf16.mxu1 %v8534_v12  ;;  %v8577_v12 = vcombine.low %v2437_v11, %v2441_v15  ;;  %v8579_v17 = vcombine.high %v2444_v31, %v2448_v32  ;;  %v2457_v11 = vld [vmem:[%s10813_s0 + $0xa28] sm:$0xff]  ;;  %v8597_v15 = vcombine.low %v2444_v31, %v2448_v32  ;;  %v2464_v31 = vld [vmem:[%s10813_s0 + $0xa60] sm:$0xff] }
 0x125   : > { %11562 = vst [vmem:[#allocation257_spill] sm:$0xff] %v8582_v48  ;;  %v2461_v32 = vld [vmem:[%s10813_s0 + $0xa48] sm:$0xff] }
 0x126   : > { %11560 = vst [vmem:[#allocation255_spill] sm:$0xff] %v8577_v12  ;;  %11561 = vst [vmem:[#allocation256_spill] sm:$0xff] %v8579_v17 }
 0x127   : > { %3180 = vmatpush1.bf16.msra.mxu0 %v8549_v4  ;;  %3223 = vmatpush1.bf16.msra.mxu1 %v8553_v56  ;;  %11563 = vst [vmem:[#allocation258_spill] sm:$0xff] %v8597_v15  ;;  %v8606_v56 = vcombine.high %v2453_v39, %v2457_v11  ;;  %v2460_v4 = vld [vmem:[%s10813_s0 + $0xa40] sm:$0xff] }
 0x128   : > { %3181 = vmatprep.subr.bf16.mxu0 %v8555_v53  ;;  %3224 = vmatprep.subr.bf16.mxu1 %v8558_v16  ;;  %v8601_v16 = vcombine.low %v2445_v58, %v2449_v59  ;;  %v8603_v53 = vcombine.high %v2452_v57, %v2456_v60  ;;  %v2465_v58 = vld [vmem:[%s10813_s0 + $0xa68] sm:$0xff]  ;;  %v8621_v59 = vcombine.low %v2452_v57, %v2456_v60  ;;  %v2472_v57 = vld [vmem:[%s10813_s0 + $0xaa0] sm:$0xff] }
 0x129   : > { %11566 = vst [vmem:[#allocation261_spill] sm:$0xff] %v8606_v56  ;;  %v2469_v60 = vld [vmem:[%s10813_s0 + $0xa88] sm:$0xff] }
 0x12a   : > { %11564 = vst [vmem:[#allocation259_spill] sm:$0xff] %v8601_v16  ;;  %11565 = vst [vmem:[#allocation260_spill] sm:$0xff] %v8603_v53 }
 0x12b   : > { %3182 = vmatpush1.bf16.msra.mxu0 %v8573_v6  ;;  %3225 = vmatpush1.bf16.msra.mxu1 %v8577_v12  ;;  %11567 = vst [vmem:[#allocation262_spill] sm:$0xff] %v8621_v59  ;;  %v8630_v12 = vcombine.high %v2461_v32, %v2465_v58  ;;  %v2468_v6 = vld [vmem:[%s10813_s0 + $0xa80] sm:$0xff] }
 0x12c   : > { %3183 = vmatprep.subr.bf16.mxu0 %v8579_v17  ;;  %3226 = vmatprep.subr.bf16.mxu1 %v8582_v48  ;;  %v8625_v48 = vcombine.low %v2453_v39, %v2457_v11  ;;  %v8627_v17 = vcombine.high %v2460_v4, %v2464_v31  ;;  %v2473_v39 = vld [vmem:[%s10813_s0 + $0xaa8] sm:$0xff]  ;;  %v8645_v11 = vcombine.low %v2460_v4, %v2464_v31  ;;  %v2480_v4 = vld [vmem:[%s10813_s0 + $0xae0] sm:$0xff] }
 0x12d   : > { %11570 = vst [vmem:[#allocation265_spill] sm:$0xff] %v8630_v12  ;;  %v2477_v31 = vld [vmem:[%s10813_s0 + $0xac8] sm:$0xff] }
 0x12e   : > { %11568 = vst [vmem:[#allocation263_spill] sm:$0xff] %v8625_v48  ;;  %11569 = vst [vmem:[#allocation264_spill] sm:$0xff] %v8627_v17 }
 0x12f   : > { %3184 = vmatpush1.bf16.msra.mxu0 %v8597_v15  ;;  %3227 = vmatpush1.bf16.msra.mxu1 %v8601_v16  ;;  %11571 = vst [vmem:[#allocation266_spill] sm:$0xff] %v8645_v11  ;;  %v8654_v16 = vcombine.high %v2469_v60, %v2473_v39  ;;  %v2476_v15 = vld [vmem:[%s10813_s0 + $0xac0] sm:$0xff] }
 0x130   : > { %3185 = vmatprep.subr.bf16.mxu0 %v8603_v53  ;;  %3228 = vmatprep.subr.bf16.mxu1 %v8606_v56  ;;  %v8649_v56 = vcombine.low %v2461_v32, %v2465_v58  ;;  %v8651_v53 = vcombine.high %v2468_v6, %v2472_v57  ;;  %v2481_v32 = vld [vmem:[%s10813_s0 + $0xae8] sm:$0xff]  ;;  %v8669_v58 = vcombine.low %v2468_v6, %v2472_v57  ;;  %v2488_v6 = vld [vmem:[%s10813_s0 + $0xb20] sm:$0xff] }
 0x131   : > { %11574 = vst [vmem:[#allocation269_spill] sm:$0xff] %v8654_v16  ;;  %v2485_v57 = vld [vmem:[%s10813_s0 + $0xb08] sm:$0xff] }
 0x132   : > { %11572 = vst [vmem:[#allocation267_spill] sm:$0xff] %v8649_v56  ;;  %11573 = vst [vmem:[#allocation268_spill] sm:$0xff] %v8651_v53 }
 0x133   : > { %3186 = vmatpush1.bf16.msra.mxu0 %v8621_v59  ;;  %3229 = vmatpush1.bf16.msra.mxu1 %v8625_v48  ;;  %11575 = vst [vmem:[#allocation270_spill] sm:$0xff] %v8669_v58  ;;  %v8678_v48 = vcombine.high %v2477_v31, %v2481_v32  ;;  %v2484_v59 = vld [vmem:[%s10813_s0 + $0xb00] sm:$0xff] }
 0x134   : > { %3187 = vmatprep.subr.bf16.mxu0 %v8627_v17  ;;  %3230 = vmatprep.subr.bf16.mxu1 %v8630_v12  ;;  %v8673_v12 = vcombine.low %v2469_v60, %v2473_v39  ;;  %v8675_v17 = vcombine.high %v2476_v15, %v2480_v4  ;;  %v2489_v60 = vld [vmem:[%s10813_s0 + $0xb28] sm:$0xff]  ;;  %v8693_v39 = vcombine.low %v2476_v15, %v2480_v4  ;;  %v2496_v15 = vld [vmem:[%s10813_s0 + $0xb60] sm:$0xff] }
 0x135   : > { %11578 = vst [vmem:[#allocation273_spill] sm:$0xff] %v8678_v48  ;;  %v2493_v4 = vld [vmem:[%s10813_s0 + $0xb48] sm:$0xff] }
 0x136   : > { %11576 = vst [vmem:[#allocation271_spill] sm:$0xff] %v8673_v12  ;;  %11577 = vst [vmem:[#allocation272_spill] sm:$0xff] %v8675_v17 }
 0x137   : > { %3188 = vmatpush1.bf16.msra.mxu0 %v8645_v11  ;;  %3231 = vmatpush1.bf16.msra.mxu1 %v8649_v56  ;;  %11579 = vst [vmem:[#allocation274_spill] sm:$0xff] %v8693_v39  ;;  %v8702_v56 = vcombine.high %v2485_v57, %v2489_v60  ;;  %v2492_v11 = vld [vmem:[%s10813_s0 + $0xb40] sm:$0xff] }
 0x138   : > { %3189 = vmatprep.subr.bf16.mxu0 %v8651_v53  ;;  %3232 = vmatprep.subr.bf16.mxu1 %v8654_v16  ;;  %v8697_v16 = vcombine.low %v2477_v31, %v2481_v32  ;;  %v8699_v53 = vcombine.high %v2484_v59, %v2488_v6  ;;  %v2497_v31 = vld [vmem:[%s10813_s0 + $0xb68] sm:$0xff]  ;;  %v8717_v32 = vcombine.low %v2484_v59, %v2488_v6  ;;  %v2504_v59 = vld [vmem:[%s10813_s0 + $0xba0] sm:$0xff] }
 0x139   : > { %11582 = vst [vmem:[#allocation277_spill] sm:$0xff] %v8702_v56  ;;  %v2501_v6 = vld [vmem:[%s10813_s0 + $0xb88] sm:$0xff] }
 0x13a   : > { %11580 = vst [vmem:[#allocation275_spill] sm:$0xff] %v8697_v16  ;;  %11581 = vst [vmem:[#allocation276_spill] sm:$0xff] %v8699_v53 }
 0x13b   : > { %3190 = vmatpush1.bf16.msra.mxu0 %v8669_v58  ;;  %3233 = vmatpush1.bf16.msra.mxu1 %v8673_v12  ;;  %11583 = vst [vmem:[#allocation278_spill] sm:$0xff] %v8717_v32  ;;  %v8726_v12 = vcombine.high %v2493_v4, %v2497_v31  ;;  %v2500_v58 = vld [vmem:[%s10813_s0 + $0xb80] sm:$0xff] }
 0x13c   : > { %3191 = vmatprep.subr.bf16.mxu0 %v8675_v17  ;;  %3234 = vmatprep.subr.bf16.mxu1 %v8678_v48  ;;  %v8721_v48 = vcombine.low %v2485_v57, %v2489_v60  ;;  %v8723_v17 = vcombine.high %v2492_v11, %v2496_v15  ;;  %v2505_v57 = vld [vmem:[%s10813_s0 + $0xba8] sm:$0xff]  ;;  %v8741_v60 = vcombine.low %v2492_v11, %v2496_v15  ;;  %v2512_v11 = vld [vmem:[%s10813_s0 + $0xbe0] sm:$0xff] }
 0x13d   : > { %11586 = vst [vmem:[#allocation281_spill] sm:$0xff] %v8726_v12  ;;  %v2509_v15 = vld [vmem:[%s10813_s0 + $0xbc8] sm:$0xff] }
 0x13e   : > { %11584 = vst [vmem:[#allocation279_spill] sm:$0xff] %v8721_v48  ;;  %11585 = vst [vmem:[#allocation280_spill] sm:$0xff] %v8723_v17 }
 0x13f   : > { %3192 = vmatpush1.bf16.msra.mxu0 %v8693_v39  ;;  %3235 = vmatpush1.bf16.msra.mxu1 %v8697_v16  ;;  %11587 = vst [vmem:[#allocation282_spill] sm:$0xff] %v8741_v60  ;;  %v8750_v16 = vcombine.high %v2501_v6, %v2505_v57  ;;  %v2508_v39 = vld [vmem:[%s10813_s0 + $0xbc0] sm:$0xff] }
 0x140   : > { %3193 = vmatprep.subr.bf16.mxu0 %v8699_v53  ;;  %3236 = vmatprep.subr.bf16.mxu1 %v8702_v56  ;;  %v8745_v56 = vcombine.low %v2493_v4, %v2497_v31  ;;  %v8747_v53 = vcombine.high %v2500_v58, %v2504_v59  ;;  %v2513_v4 = vld [vmem:[%s10813_s0 + $0xbe8] sm:$0xff]  ;;  %v8765_v31 = vcombine.low %v2500_v58, %v2504_v59  ;;  %v2394_v58 = vld [vmem:[%s10813_s0 + $0x830] sm:$0xff]  ;;  %v2391_v59 = vld [vmem:[%s10813_s0 + $0x818] sm:$0xff] }
 0x141   : > { %11590 = vst [vmem:[#allocation285_spill] sm:$0xff] %v8750_v16 }
 0x142   : > { %11588 = vst [vmem:[#allocation283_spill] sm:$0xff] %v8745_v56  ;;  %11589 = vst [vmem:[#allocation284_spill] sm:$0xff] %v8747_v53 }
 0x143   : > { %3194 = vmatpush1.bf16.msra.mxu0 %v8717_v32  ;;  %3237 = vmatpush1.bf16.msra.mxu1 %v8721_v48  ;;  %11591 = vst [vmem:[#allocation286_spill] sm:$0xff] %v8765_v31  ;;  %v8774_v48 = vcombine.high %v2509_v15, %v2513_v4  ;;  %v2390_v32 = vld [vmem:[%s10813_s0 + $0x810] sm:$0xff] }
 0x144   : > { %3195 = vmatprep.subr.bf16.mxu0 %v8723_v17  ;;  %3238 = vmatprep.subr.bf16.mxu1 %v8726_v12  ;;  %v8769_v12 = vcombine.low %v2501_v6, %v2505_v57  ;;  %v8771_v17 = vcombine.high %v2508_v39, %v2512_v11  ;;  %v2395_v6 = vld [vmem:[%s10813_s0 + $0x838] sm:$0xff]  ;;  %v8789_v57 = vcombine.low %v2508_v39, %v2512_v11  ;;  %v2398_v39 = vld [vmem:[%s10813_s0 + $0x850] sm:$0xff] }
 0x145   : > { %11594 = vst [vmem:[#allocation289_spill] sm:$0xff] %v8774_v48  ;;  %v8800_v38 = vcombine.high %v2391_v59, %v2395_v6  ;;  %v2402_v11 = vld [vmem:[%s10813_s0 + $0x870] sm:$0xff] }
 0x146   : > { %11592 = vst [vmem:[#allocation287_spill] sm:$0xff] %v8769_v12  ;;  %11593 = vst [vmem:[#allocation288_spill] sm:$0xff] %v8771_v17 }
 0x147   : > { %3196 = vmatpush1.bf16.msra.mxu0 %v8741_v60  ;;  %3239 = vmatpush1.bf16.msra.mxu1 %v8745_v56  ;;  %11595 = vst [vmem:[#allocation290_spill] sm:$0xff] %v8789_v57  ;;  %v8795_v56 = vcombine.low %v2509_v15, %v2513_v4  ;;  %v8797_v60 = vcombine.high %v2390_v32, %v2394_v58  ;;  %11598 = vst [vmem:[#allocation293_spill] sm:$0xff] %v8800_v38  ;;  %v2403_v15 = vld [vmem:[%s10813_s0 + $0x878] sm:$0xff] }
 0x148   : > { %3197 = vmatprep.subr.bf16.mxu0 %v8747_v53  ;;  %3240 = vmatprep.subr.bf16.mxu1 %v8750_v16  ;;  %v2521_v16 = vrot.slane %v7145_v25, 1  ;;  %v2522_v53 = vrot.slane %v7172_v54, 1  ;;  %v8815_v4 = vcombine.low %v2390_v32, %v2394_v58  ;;  %v2406_v32 = vld [vmem:[%s10813_s0 + $0x890] sm:$0xff]  ;;  %v2411_v58 = vld [vmem:[%s10813_s0 + $0x8b8] sm:$0xff] }
 0x149   : > { %11596 = vst [vmem:[#allocation291_spill] sm:$0xff] %v8795_v56  ;;  %11597 = vst [vmem:[#allocation292_spill] sm:$0xff] %v8797_v60 }
 0x14a   : > { %11599 = vst [vmem:[#allocation294_spill] sm:$0xff] %v8815_v4 }
 0x14b   : > { %3198 = vmatpush1.bf16.msra.mxu0 %v8765_v31  ;;  %3241 = vmatpush1.bf16.msra.mxu1 %v8769_v12  ;;  %v8822_v12 = vcombine.low %v2391_v59, %v2395_v6  ;;  %v8824_v31 = vcombine.high %v2398_v39, %v2402_v11  ;;  %v8844_v59 = vcombine.low %v2398_v39, %v2402_v11  ;;  %v2418_v39 = vld [vmem:[%s10813_s0 + $0x8f0] sm:$0xff]  ;;  %v2419_v11 = vld [vmem:[%s10813_s0 + $0x8f8] sm:$0xff] }
 0x14c   : > { %3199 = vmatprep.subr.bf16.mxu0 %v8771_v17  ;;  %3242 = vmatprep.subr.bf16.mxu1 %v8774_v48  ;;  %v2399_v17 = vld [vmem:[%s10813_s0 + $0x858] sm:$0xff]  ;;  %v8818_v48 = vsel %vm2520_vm1, %v2521_v16, %v2522_v53  ;;  %v2410_v53 = vld [vmem:[%s10813_s0 + $0x8b0] sm:$0xff] }
 0x14d   : > { %11600 = vst [vmem:[#allocation295_spill] sm:$0xff] %v8822_v12  ;;  %11601 = vst [vmem:[#allocation296_spill] sm:$0xff] %v8824_v31  ;;  %v8827_v33 = vcombine.high %v2399_v17, %v2403_v15  ;;  %v2407_v16 = vld [vmem:[%s10813_s0 + $0x898] sm:$0xff]  ;;  %v8848_v6 = vcombine.low %v2399_v17, %v2403_v15  ;;  %v8870_v15 = vcombine.low %v2406_v32, %v2410_v53 }
 0x14e   : > { %11603 = vst [vmem:[#allocation298_spill] sm:$0xff] %v8844_v59  ;;  %v2415_v17 = vld [vmem:[%s10813_s0 + $0x8d8] sm:$0xff] }
 0x14f   : > { %3200 = vmatpush1.bf16.msra.mxu0 %v8789_v57  ;;  %3243 = vmatpush1.bf16.msra.mxu1 %v8795_v56  ;;  %11602 = vst [vmem:[#allocation297_spill] sm:$0xff] %v8827_v33  ;;  %11604 = vst [vmem:[#allocation299_spill] sm:$0xff] %v8848_v6  ;;  %v2414_v56 = vld [vmem:[%s10813_s0 + $0x8d0] sm:$0xff]  ;;  %v11661_v57 = vshll.u32 %v6980_v62, 16 }
 0x150   : > { %3255 = vmatprep.subr.bf16.mxu0 %v8797_v60  ;;  %3298 = vmatprep.subr.bf16.mxu1 %v8800_v38  ;;  %v8850_v38 = vcombine.high %v2406_v32, %v2410_v53  ;;  %v8853_v60 = vcombine.high %v2407_v16, %v2411_v58  ;;  %11607 = vst [vmem:[#allocation302_spill] sm:$0xff] %v8870_v15  ;;  %v2426_v32 = vld [vmem:[%s10813_s0 + $0x930] sm:$0xff]  ;;  %v2423_v53 = vld [vmem:[%s10813_s0 + $0x918] sm:$0xff] }
 0x151   : > { %v3501_v2 = vrot.slane %v11661_v57, 2  ;;  %v3366_v57 = vld [vmem:[%s10813_s0 + $0xc48] sm:$0xff] }
 0x152   : > { %3202 = vmatmul.mubr.bf16.vlgmr.msra.gmra.mrb[0].mxu0 %v8818_v48  ;;  %3245 = vmatmul.mubr.bf16.vlgmr.msra.gmra.mrb[0].mxu1 %v8818_v48  ;;  %11605 = vst [vmem:[#allocation300_spill] sm:$0xff] %v8850_v38  ;;  %11606 = vst [vmem:[#allocation301_spill] sm:$0xff] %v8853_v60 }
 0x153   : > { %3256 = vmatpush1.bf16.msra.mxu0 %v8815_v4  ;;  %3299 = vmatpush1.bf16.msra.mxu1 %v8822_v12  ;;  %v8879_v12 = vcombine.high %v2415_v17, %v2419_v11  ;;  %v3357_v4 = vld [vmem:[%s10813_s0 + $0xc00] sm:$0xff] }
 0x154   : > { %3257 = vmatprep.subr.bf16.mxu0 %v8824_v31  ;;  %3300 = vmatprep.subr.bf16.mxu1 %v8827_v33  ;;  %v8874_v33 = vcombine.low %v2407_v16, %v2411_v58  ;;  %v8876_v31 = vcombine.high %v2414_v56, %v2418_v39  ;;  %v2427_v16 = vld [vmem:[%s10813_s0 + $0x938] sm:$0xff]  ;;  %v8894_v58 = vcombine.low %v2414_v56, %v2418_v39  ;;  %v2434_v56 = vld [vmem:[%s10813_s0 + $0x970] sm:$0xff] }
 0x155   : > { %3287 = vmatprep.mubr.bf16.mxu0 %v8447_v49  ;;  %3330 = vmatprep.mubr.bf16.mxu1 %v8447_v49  ;;  %11610 = vst [vmem:[#allocation305_spill] sm:$0xff] %v8879_v12  ;;  %v2422_v49 = vld [vmem:[%s10813_s0 + $0x910] sm:$0xff]  ;;  %v2431_v39 = vld [vmem:[%s10813_s0 + $0x958] sm:$0xff] }
 0x156   : > { %11608 = vst [vmem:[#allocation303_spill] sm:$0xff] %v8874_v33  ;;  %11609 = vst [vmem:[#allocation304_spill] sm:$0xff] %v8876_v31 }
 0x157   : > { %3258 = vmatpush1.bf16.msra.mxu0 %v8844_v59  ;;  %3301 = vmatpush1.bf16.msra.mxu1 %v8848_v6  ;;  %11611 = vst [vmem:[#allocation306_spill] sm:$0xff] %v8894_v58  ;;  %v8903_v6 = vcombine.high %v2423_v53, %v2427_v16  ;;  %v2430_v59 = vld [vmem:[%s10813_s0 + $0x950] sm:$0xff] }
 0x158   : > { %3259 = vmatprep.subr.bf16.mxu0 %v8850_v38  ;;  %3302 = vmatprep.subr.bf16.mxu1 %v8853_v60  ;;  %v8898_v60 = vcombine.low %v2415_v17, %v2419_v11  ;;  %v8900_v38 = vcombine.high %v2422_v49, %v2426_v32  ;;  %v2435_v17 = vld [vmem:[%s10813_s0 + $0x978] sm:$0xff]  ;;  %v8918_v11 = vcombine.low %v2422_v49, %v2426_v32  ;;  %v2442_v49 = vld [vmem:[%s10813_s0 + $0x9b0] sm:$0xff] }
 0x159   : > { %11614 = vst [vmem:[#allocation309_spill] sm:$0xff] %v8903_v6  ;;  %v2439_v32 = vld [vmem:[%s10813_s0 + $0x998] sm:$0xff] }
 0x15a   : > { %11612 = vst [vmem:[#allocation307_spill] sm:$0xff] %v8898_v60  ;;  %11613 = vst [vmem:[#allocation308_spill] sm:$0xff] %v8900_v38 }
 0x15b   : > { %3260 = vmatpush1.bf16.msra.mxu0 %v8870_v15  ;;  %3303 = vmatpush1.bf16.msra.mxu1 %v8874_v33  ;;  %11615 = vst [vmem:[#allocation310_spill] sm:$0xff] %v8918_v11  ;;  %v8927_v33 = vcombine.high %v2431_v39, %v2435_v17  ;;  %v2438_v15 = vld [vmem:[%s10813_s0 + $0x990] sm:$0xff] }
 0x15c   : > { %3261 = vmatprep.subr.bf16.mxu0 %v8876_v31  ;;  %3304 = vmatprep.subr.bf16.mxu1 %v8879_v12  ;;  %v8922_v12 = vcombine.low %v2423_v53, %v2427_v16  ;;  %v8924_v31 = vcombine.high %v2430_v59, %v2434_v56  ;;  %v2443_v53 = vld [vmem:[%s10813_s0 + $0x9b8] sm:$0xff]  ;;  %v8942_v16 = vcombine.low %v2430_v59, %v2434_v56  ;;  %v2450_v59 = vld [vmem:[%s10813_s0 + $0x9f0] sm:$0xff] }
 0x15d   : > { %11618 = vst [vmem:[#allocation313_spill] sm:$0xff] %v8927_v33  ;;  %v2447_v56 = vld [vmem:[%s10813_s0 + $0x9d8] sm:$0xff] }
 0x15e   : > { %11616 = vst [vmem:[#allocation311_spill] sm:$0xff] %v8922_v12  ;;  %11617 = vst [vmem:[#allocation312_spill] sm:$0xff] %v8924_v31 }
 0x15f   : > { %3262 = vmatpush1.bf16.msra.mxu0 %v8894_v58  ;;  %3305 = vmatpush1.bf16.msra.mxu1 %v8898_v60  ;;  %11619 = vst [vmem:[#allocation314_spill] sm:$0xff] %v8942_v16  ;;  %v8951_v60 = vcombine.high %v2439_v32, %v2443_v53  ;;  %v2446_v58 = vld [vmem:[%s10813_s0 + $0x9d0] sm:$0xff] }
 0x160   : > { %3263 = vmatprep.subr.bf16.mxu0 %v8900_v38  ;;  %3306 = vmatprep.subr.bf16.mxu1 %v8903_v6  ;;  %v8946_v6 = vcombine.low %v2431_v39, %v2435_v17  ;;  %v8948_v38 = vcombine.high %v2438_v15, %v2442_v49  ;;  %v2451_v39 = vld [vmem:[%s10813_s0 + $0x9f8] sm:$0xff]  ;;  %v8966_v17 = vcombine.low %v2438_v15, %v2442_v49  ;;  %v2458_v15 = vld [vmem:[%s10813_s0 + $0xa30] sm:$0xff] }
 0x161   : > { %11622 = vst [vmem:[#allocation317_spill] sm:$0xff] %v8951_v60  ;;  %v2455_v49 = vld [vmem:[%s10813_s0 + $0xa18] sm:$0xff] }
 0x162   : > { %11620 = vst [vmem:[#allocation315_spill] sm:$0xff] %v8946_v6  ;;  %11621 = vst [vmem:[#allocation316_spill] sm:$0xff] %v8948_v38 }
 0x163   : > { %3264 = vmatpush1.bf16.msra.mxu0 %v8918_v11  ;;  %3307 = vmatpush1.bf16.msra.mxu1 %v8922_v12  ;;  %11623 = vst [vmem:[#allocation318_spill] sm:$0xff] %v8966_v17  ;;  %v8975_v12 = vcombine.high %v2447_v56, %v2451_v39  ;;  %v2454_v11 = vld [vmem:[%s10813_s0 + $0xa10] sm:$0xff] }
 0x164   : > { %3265 = vmatprep.subr.bf16.mxu0 %v8924_v31  ;;  %3308 = vmatprep.subr.bf16.mxu1 %v8927_v33  ;;  %v8970_v33 = vcombine.low %v2439_v32, %v2443_v53  ;;  %v8972_v31 = vcombine.high %v2446_v58, %v2450_v59  ;;  %v2459_v32 = vld [vmem:[%s10813_s0 + $0xa38] sm:$0xff]  ;;  %v8990_v53 = vcombine.low %v2446_v58, %v2450_v59  ;;  %v2466_v58 = vld [vmem:[%s10813_s0 + $0xa70] sm:$0xff] }
 0x165   : > { %11626 = vst [vmem:[#allocation321_spill] sm:$0xff] %v8975_v12  ;;  %v2463_v59 = vld [vmem:[%s10813_s0 + $0xa58] sm:$0xff] }
 0x166   : > { %11624 = vst [vmem:[#allocation319_spill] sm:$0xff] %v8970_v33  ;;  %11625 = vst [vmem:[#allocation320_spill] sm:$0xff] %v8972_v31 }
 0x167   : > { %3266 = vmatpush1.bf16.msra.mxu0 %v8942_v16  ;;  %3309 = vmatpush1.bf16.msra.mxu1 %v8946_v6  ;;  %11627 = vst [vmem:[#allocation322_spill] sm:$0xff] %v8990_v53  ;;  %v8999_v6 = vcombine.high %v2455_v49, %v2459_v32  ;;  %v2462_v16 = vld [vmem:[%s10813_s0 + $0xa50] sm:$0xff] }
 0x168   : > { %3267 = vmatprep.subr.bf16.mxu0 %v8948_v38  ;;  %3310 = vmatprep.subr.bf16.mxu1 %v8951_v60  ;;  %v8994_v60 = vcombine.low %v2447_v56, %v2451_v39  ;;  %v8996_v38 = vcombine.high %v2454_v11, %v2458_v15  ;;  %v2467_v56 = vld [vmem:[%s10813_s0 + $0xa78] sm:$0xff]  ;;  %v9014_v39 = vcombine.low %v2454_v11, %v2458_v15  ;;  %v2474_v11 = vld [vmem:[%s10813_s0 + $0xab0] sm:$0xff] }
 0x169   : > { %11630 = vst [vmem:[#allocation325_spill] sm:$0xff] %v8999_v6  ;;  %v2471_v15 = vld [vmem:[%s10813_s0 + $0xa98] sm:$0xff] }
 0x16a   : > { %11628 = vst [vmem:[#allocation323_spill] sm:$0xff] %v8994_v60  ;;  %11629 = vst [vmem:[#allocation324_spill] sm:$0xff] %v8996_v38 }
 0x16b   : > { %3268 = vmatpush1.bf16.msra.mxu0 %v8966_v17  ;;  %3311 = vmatpush1.bf16.msra.mxu1 %v8970_v33  ;;  %11631 = vst [vmem:[#allocation326_spill] sm:$0xff] %v9014_v39  ;;  %v9023_v33 = vcombine.high %v2463_v59, %v2467_v56  ;;  %v2470_v17 = vld [vmem:[%s10813_s0 + $0xa90] sm:$0xff] }
 0x16c   : > { %3269 = vmatprep.subr.bf16.mxu0 %v8972_v31  ;;  %3312 = vmatprep.subr.bf16.mxu1 %v8975_v12  ;;  %v9018_v12 = vcombine.low %v2455_v49, %v2459_v32  ;;  %v9020_v31 = vcombine.high %v2462_v16, %v2466_v58  ;;  %v2475_v49 = vld [vmem:[%s10813_s0 + $0xab8] sm:$0xff]  ;;  %v9038_v32 = vcombine.low %v2462_v16, %v2466_v58  ;;  %v2482_v16 = vld [vmem:[%s10813_s0 + $0xaf0] sm:$0xff] }
 0x16d   : > { %11634 = vst [vmem:[#allocation329_spill] sm:$0xff] %v9023_v33  ;;  %v2479_v58 = vld [vmem:[%s10813_s0 + $0xad8] sm:$0xff] }
 0x16e   : > { %11632 = vst [vmem:[#allocation327_spill] sm:$0xff] %v9018_v12  ;;  %11633 = vst [vmem:[#allocation328_spill] sm:$0xff] %v9020_v31 }
 0x16f   : > { %3270 = vmatpush1.bf16.msra.mxu0 %v8990_v53  ;;  %3313 = vmatpush1.bf16.msra.mxu1 %v8994_v60  ;;  %11635 = vst [vmem:[#allocation330_spill] sm:$0xff] %v9038_v32  ;;  %v9047_v60 = vcombine.high %v2471_v15, %v2475_v49  ;;  %v2478_v53 = vld [vmem:[%s10813_s0 + $0xad0] sm:$0xff] }
 0x170   : > { %3271 = vmatprep.subr.bf16.mxu0 %v8996_v38  ;;  %3314 = vmatprep.subr.bf16.mxu1 %v8999_v6  ;;  %v9042_v6 = vcombine.low %v2463_v59, %v2467_v56  ;;  %v9044_v38 = vcombine.high %v2470_v17, %v2474_v11  ;;  %v2483_v59 = vld [vmem:[%s10813_s0 + $0xaf8] sm:$0xff]  ;;  %v9062_v56 = vcombine.low %v2470_v17, %v2474_v11  ;;  %v2490_v17 = vld [vmem:[%s10813_s0 + $0xb30] sm:$0xff] }
 0x171   : > { %11638 = vst [vmem:[#allocation333_spill] sm:$0xff] %v9047_v60  ;;  %v2487_v11 = vld [vmem:[%s10813_s0 + $0xb18] sm:$0xff] }
 0x172   : > { %11636 = vst [vmem:[#allocation331_spill] sm:$0xff] %v9042_v6  ;;  %11637 = vst [vmem:[#allocation332_spill] sm:$0xff] %v9044_v38 }
 0x173   : > { %3272 = vmatpush1.bf16.msra.mxu0 %v9014_v39  ;;  %3315 = vmatpush1.bf16.msra.mxu1 %v9018_v12  ;;  %11639 = vst [vmem:[#allocation334_spill] sm:$0xff] %v9062_v56  ;;  %v9071_v12 = vcombine.high %v2479_v58, %v2483_v59  ;;  %v2486_v39 = vld [vmem:[%s10813_s0 + $0xb10] sm:$0xff] }
 0x174   : > { %3273 = vmatprep.subr.bf16.mxu0 %v9020_v31  ;;  %3316 = vmatprep.subr.bf16.mxu1 %v9023_v33  ;;  %v9066_v33 = vcombine.low %v2471_v15, %v2475_v49  ;;  %v9068_v31 = vcombine.high %v2478_v53, %v2482_v16  ;;  %v2491_v15 = vld [vmem:[%s10813_s0 + $0xb38] sm:$0xff]  ;;  %v9086_v49 = vcombine.low %v2478_v53, %v2482_v16  ;;  %v2498_v53 = vld [vmem:[%s10813_s0 + $0xb70] sm:$0xff] }
 0x175   : > { %11642 = vst [vmem:[#allocation337_spill] sm:$0xff] %v9071_v12  ;;  %v2495_v16 = vld [vmem:[%s10813_s0 + $0xb58] sm:$0xff] }
 0x176   : > { %11640 = vst [vmem:[#allocation335_spill] sm:$0xff] %v9066_v33  ;;  %11641 = vst [vmem:[#allocation336_spill] sm:$0xff] %v9068_v31 }
 0x177   : > { %3274 = vmatpush1.bf16.msra.mxu0 %v9038_v32  ;;  %3317 = vmatpush1.bf16.msra.mxu1 %v9042_v6  ;;  %11643 = vst [vmem:[#allocation338_spill] sm:$0xff] %v9086_v49  ;;  %v9095_v6 = vcombine.high %v2487_v11, %v2491_v15  ;;  %v2494_v32 = vld [vmem:[%s10813_s0 + $0xb50] sm:$0xff] }
 0x178   : > { %3275 = vmatprep.subr.bf16.mxu0 %v9044_v38  ;;  %3318 = vmatprep.subr.bf16.mxu1 %v9047_v60  ;;  %v9090_v60 = vcombine.low %v2479_v58, %v2483_v59  ;;  %v9092_v38 = vcombine.high %v2486_v39, %v2490_v17  ;;  %v2499_v58 = vld [vmem:[%s10813_s0 + $0xb78] sm:$0xff]  ;;  %v9110_v59 = vcombine.low %v2486_v39, %v2490_v17  ;;  %v2506_v39 = vld [vmem:[%s10813_s0 + $0xbb0] sm:$0xff] }
 0x179   : > { %11646 = vst [vmem:[#allocation341_spill] sm:$0xff] %v9095_v6  ;;  %v2503_v17 = vld [vmem:[%s10813_s0 + $0xb98] sm:$0xff] }
 0x17a   : > { %11644 = vst [vmem:[#allocation339_spill] sm:$0xff] %v9090_v60  ;;  %11645 = vst [vmem:[#allocation340_spill] sm:$0xff] %v9092_v38 }
 0x17b   : > { %3276 = vmatpush1.bf16.msra.mxu0 %v9062_v56  ;;  %3319 = vmatpush1.bf16.msra.mxu1 %v9066_v33  ;;  %11647 = vst [vmem:[#allocation342_spill] sm:$0xff] %v9110_v59  ;;  %v9119_v33 = vcombine.high %v2495_v16, %v2499_v58  ;;  %v2502_v56 = vld [vmem:[%s10813_s0 + $0xb90] sm:$0xff] }
 0x17c   : > { %3277 = vmatprep.subr.bf16.mxu0 %v9068_v31  ;;  %3320 = vmatprep.subr.bf16.mxu1 %v9071_v12  ;;  %v9114_v12 = vcombine.low %v2487_v11, %v2491_v15  ;;  %v9116_v31 = vcombine.high %v2494_v32, %v2498_v53  ;;  %v2507_v11 = vld [vmem:[%s10813_s0 + $0xbb8] sm:$0xff]  ;;  %v9134_v15 = vcombine.low %v2494_v32, %v2498_v53  ;;  %v2514_v32 = vld [vmem:[%s10813_s0 + $0xbf0] sm:$0xff] }
 0x17d   : > { %11650 = vst [vmem:[#allocation345_spill] sm:$0xff] %v9119_v33  ;;  %v2511_v53 = vld [vmem:[%s10813_s0 + $0xbd8] sm:$0xff] }
 0x17e   : > { %11648 = vst [vmem:[#allocation343_spill] sm:$0xff] %v9114_v12  ;;  %11649 = vst [vmem:[#allocation344_spill] sm:$0xff] %v9116_v31 }
 0x17f   : > { %3278 = vmatpush1.bf16.msra.mxu0 %v9086_v49  ;;  %3321 = vmatpush1.bf16.msra.mxu1 %v9090_v60  ;;  %11651 = vst [vmem:[#allocation346_spill] sm:$0xff] %v9134_v15  ;;  %v9143_v60 = vcombine.high %v2503_v17, %v2507_v11  ;;  %v2510_v49 = vld [vmem:[%s10813_s0 + $0xbd0] sm:$0xff] }
 0x180   : > { %3279 = vmatprep.subr.bf16.mxu0 %v9092_v38  ;;  %3322 = vmatprep.subr.bf16.mxu1 %v9095_v6  ;;  %v9138_v6 = vcombine.low %v2495_v16, %v2499_v58  ;;  %v9140_v38 = vcombine.high %v2502_v56, %v2506_v39  ;;  %v2515_v16 = vld [vmem:[%s10813_s0 + $0xbf8] sm:$0xff]  ;;  %v3498_v58 = vshrl.u32 %v6980_v62, 16  ;;  %v9189_v13 = vcombine.low %v2510_v49, %v2514_v32  ;;  %v3365_v62 = vld [vmem:[%s10813_s0 + $0xc40] sm:$0xff] }
 0x181   : > { %11654 = vst [vmem:[#allocation349_spill] sm:$0xff] %v9143_v60  ;;  %v9193_v47 = vcombine.low %v2511_v53, %v2515_v16 }
 0x182   : > { %11652 = vst [vmem:[#allocation347_spill] sm:$0xff] %v9138_v6  ;;  %11653 = vst [vmem:[#allocation348_spill] sm:$0xff] %v9140_v38 }
 0x183   : > { %3280 = vmatpush1.bf16.msra.mxu0 %v9110_v59  ;;  %3323 = vmatpush1.bf16.msra.mxu1 %v9114_v12  ;;  %v9165_v12 = vcombine.high %v2510_v49, %v2514_v32  ;;  %v9168_v59 = vcombine.high %v2511_v53, %v2515_v16  ;;  %11662 = vst [vmem:[#allocation354_spill] sm:$0xff] %v9189_v13  ;;  %11663 = vst [vmem:[#allocation355_spill] sm:$0xff] %v9193_v47  ;;  %v3370_v49 = vld [vmem:[%s10813_s0 + $0xc68] sm:$0xff] }
 0x184   : > { %3281 = vmatprep.subr.bf16.mxu0 %v9116_v31  ;;  %3324 = vmatprep.subr.bf16.mxu1 %v9119_v33  ;;  %v9159_v33 = vcombine.low %v2502_v56, %v2506_v39  ;;  %v9163_v31 = vcombine.low %v2503_v17, %v2507_v11  ;;  %v3361_v56 = vld [vmem:[%s10813_s0 + $0xc20] sm:$0xff]  ;;  %v3358_v39 = vld [vmem:[%s10813_s0 + $0xc08] sm:$0xff]  ;;  %v11659_v11 = vshrl.u32 %v6978_v61, 16 }
 0x185   : > { %11657 = vst [vmem:[#allocation352_spill] sm:$0xff] %v9165_v12  ;;  %11658 = vst [vmem:[#allocation353_spill] sm:$0xff] %v9168_v59  ;;  %v3362_v17 = vld [vmem:[%s10813_s0 + $0xc28] sm:$0xff]  ;;  %v9195_v46 = vcombine.high %v3357_v4, %v3361_v56  ;;  %v9213_v16 = vcombine.low %v3357_v4, %v3361_v56 }
 0x186   : > { %11655 = vst [vmem:[#allocation350_spill] sm:$0xff] %v9159_v33  ;;  %11656 = vst [vmem:[#allocation351_spill] sm:$0xff] %v9163_v31  ;;  %v3374_v4 = vld [vmem:[%s10813_s0 + $0xc88] sm:$0xff] }
 0x187   : > { %3282 = vmatpush1.bf16.msra.mxu0 %v9134_v15  ;;  %3325 = vmatpush1.bf16.msra.mxu1 %v9138_v6  ;;  %v3500_v15 = vrot.slane %v3498_v58, 1  ;;  %11664 = vst [vmem:[#allocation356_spill] sm:$0xff] %v9195_v46  ;;  %11666 = vst [vmem:[#allocation358_spill] sm:$0xff] %v9213_v16  ;;  %v9217_v58 = vcombine.low %v3358_v39, %v3362_v17 }
 0x188   : > { %3283 = vmatprep.subr.bf16.mxu0 %v9140_v38  ;;  %3326 = vmatprep.subr.bf16.mxu1 %v9143_v60  ;;  %v3495_v60 = vrot.slane %v11659_v11, 1  ;;  %v11660_v38 = vshll.u32 %v6978_v61, 16  ;;  %v9198_v61 = vcombine.high %v3358_v39, %v3362_v17  ;;  %v9246_v39 = vcombine.low %v3366_v57, %v3370_v49 }
 0x189   : > { %v3502_v53 = vor.u32 %v3501_v2, %v3500_v15  ;;  %11667 = vst [vmem:[#allocation359_spill] sm:$0xff] %v9217_v58  ;;  %v3373_v2 = vld [vmem:[%s10813_s0 + $0xc80] sm:$0xff] }
 0x18a   : > { %v3496_v6 = vrot.slane %v11660_v38, 2  ;;  %11665 = vst [vmem:[#allocation357_spill] sm:$0xff] %v9198_v61  ;;  %v3369_v38 = vld [vmem:[%s10813_s0 + $0xc60] sm:$0xff]  ;;  %11671 = vst [vmem:[#allocation363_spill] sm:$0xff] %v9246_v39 }
 0x18b   : > { %3284 = vmatpush1.bf16.msra.mxu0 %v9159_v33  ;;  %3327 = vmatpush1.bf16.msra.mxu1 %v9163_v31  ;;  %v9219_v11 = vcombine.high %v3365_v62, %v3369_v38  ;;  %v9242_v56 = vcombine.low %v3365_v62, %v3369_v38  ;;  %v3385_v62 = vld [vmem:[%s10813_s0 + $0xce0] sm:$0xff]  ;;  %v3382_v38 = vld [vmem:[%s10813_s0 + $0xcc8] sm:$0xff] }
 0x18c   : > { %3285 = vmatprep.subr.bf16.mxu0 %v9165_v12  ;;  %3328 = vmatprep.subr.bf16.mxu1 %v9168_v59  ;;  %v3497_v32 = vor.u32 %v3496_v6, %v3495_v60  ;;  %v9222_v59 = vcombine.high %v3366_v57, %v3370_v49  ;;  %v3377_v60 = vld [vmem:[%s10813_s0 + $0xca0] sm:$0xff]  ;;  %v3378_v6 = vld [vmem:[%s10813_s0 + $0xca8] sm:$0xff] }
 0x18d   : > { %11668 = vst [vmem:[#allocation360_spill] sm:$0xff] %v9219_v11  ;;  %11670 = vst [vmem:[#allocation362_spill] sm:$0xff] %v9242_v56  ;;  %v9248_v17 = vcombine.high %v3373_v2, %v3377_v60  ;;  %v3386_v57 = vld [vmem:[%s10813_s0 + $0xce8] sm:$0xff]  ;;  %v9268_v49 = vcombine.low %v3373_v2, %v3377_v60  ;;  %v3393_v2 = vld [vmem:[%s10813_s0 + $0xd20] sm:$0xff] }
 0x18e   : > { %11669 = vst [vmem:[#allocation361_spill] sm:$0xff] %v9222_v59  ;;  %v9238_v15 = vsel %vm3485_vm2, %v3497_v32, %v3502_v53  ;;  %v9272_v32 = vcombine.low %v3374_v4, %v3378_v6  ;;  %v3390_v60 = vld [vmem:[%s10813_s0 + $0xd08] sm:$0xff] }
 0x18f   : > { %3286 = vmatpush1.bf16.msra.mxu0 %v9189_v13  ;;  %3329 = vmatpush1.bf16.msra.mxu1 %v9193_v47  ;;  %11672 = vst [vmem:[#allocation364_spill] sm:$0xff] %v9248_v17  ;;  %11674 = vst [vmem:[#allocation366_spill] sm:$0xff] %v9268_v49 }
 0x190   : > { %4146 = vmatprep.subr.bf16.mxu0 %v9195_v46  ;;  %4189 = vmatprep.subr.bf16.mxu1 %v9198_v61  ;;  %v9251_v61 = vcombine.high %v3374_v4, %v3378_v6  ;;  %11675 = vst [vmem:[#allocation367_spill] sm:$0xff] %v9272_v32  ;;  %v3394_v4 = vld [vmem:[%s10813_s0 + $0xd28] sm:$0xff] }
 0x192   : > { %3288 = vmatmul.mubr.bf16.vlgmr.msra.gmra.mrb[4].mxu0 %v8818_v48  ;;  %3331 = vmatmul.mubr.bf16.vlgmr.msra.gmra.mrb[4].mxu1 %v8818_v48  ;;  %11673 = vst [vmem:[#allocation365_spill] sm:$0xff] %v9251_v61  ;;  %v3381_v48 = vld [vmem:[%s10813_s0 + $0xcc0] sm:$0xff] }
 0x193   : > { %4147 = vmatpush1.bf16.msra.mxu0 %v9213_v16  ;;  %4190 = vmatpush1.bf16.msra.mxu1 %v9217_v58  ;;  %v9274_v53 = vcombine.high %v3381_v48, %v3385_v62  ;;  %v9292_v6 = vcombine.low %v3381_v48, %v3385_v62  ;;  %v3401_v48 = vld [vmem:[%s10813_s0 + $0xd60] sm:$0xff]  ;;  %v3398_v62 = vld [vmem:[%s10813_s0 + $0xd48] sm:$0xff] }
 0x194   : > { %4148 = vmatprep.subr.bf16.mxu0 %v9219_v11  ;;  %4191 = vmatprep.subr.bf16.mxu1 %v9222_v59  ;;  %v9277_v59 = vcombine.high %v3382_v38, %v3386_v57  ;;  %v3389_v11 = vld [vmem:[%s10813_s0 + $0xd00] sm:$0xff] }
 0x195   : > { %4178 = vmatprep.mubr.bf16.mxu0 %v9238_v15  ;;  %4221 = vmatprep.mubr.bf16.mxu1 %v9238_v15  ;;  %11676 = vst [vmem:[#allocation368_spill] sm:$0xff] %v9274_v53  ;;  %11678 = vst [vmem:[#allocation370_spill] sm:$0xff] %v9292_v6 }
 0x196   : > { %11677 = vst [vmem:[#allocation369_spill] sm:$0xff] %v9277_v59 }
 0x197   : > { %4149 = vmatpush1.bf16.msra.mxu0 %v9242_v56  ;;  %4192 = vmatpush1.bf16.msra.mxu1 %v9246_v39  ;;  %v9301_v39 = vcombine.high %v3390_v60, %v3394_v4  ;;  %v3397_v56 = vld [vmem:[%s10813_s0 + $0xd40] sm:$0xff] }
 0x198   : > { %4150 = vmatprep.subr.bf16.mxu0 %v9248_v17  ;;  %4193 = vmatprep.subr.bf16.mxu1 %v9251_v61  ;;  %v9296_v61 = vcombine.low %v3382_v38, %v3386_v57  ;;  %v9298_v17 = vcombine.high %v3389_v11, %v3393_v2  ;;  %v3402_v38 = vld [vmem:[%s10813_s0 + $0xd68] sm:$0xff]  ;;  %v9316_v57 = vcombine.low %v3389_v11, %v3393_v2  ;;  %v3409_v11 = vld [vmem:[%s10813_s0 + $0xda0] sm:$0xff] }
 0x199   : > { %11681 = vst [vmem:[#allocation373_spill] sm:$0xff] %v9301_v39  ;;  %v3406_v2 = vld [vmem:[%s10813_s0 + $0xd88] sm:$0xff] }
 0x19a   : > { %11679 = vst [vmem:[#allocation371_spill] sm:$0xff] %v9296_v61  ;;  %11680 = vst [vmem:[#allocation372_spill] sm:$0xff] %v9298_v17 }
 0x19b   : > { %4151 = vmatpush1.bf16.msra.mxu0 %v9268_v49  ;;  %4194 = vmatpush1.bf16.msra.mxu1 %v9272_v32  ;;  %11682 = vst [vmem:[#allocation374_spill] sm:$0xff] %v9316_v57  ;;  %v9325_v32 = vcombine.high %v3398_v62, %v3402_v38  ;;  %v3405_v49 = vld [vmem:[%s10813_s0 + $0xd80] sm:$0xff] }
 0x19c   : > { %4152 = vmatprep.subr.bf16.mxu0 %v9274_v53  ;;  %4195 = vmatprep.subr.bf16.mxu1 %v9277_v59  ;;  %v9320_v59 = vcombine.low %v3390_v60, %v3394_v4  ;;  %v9322_v53 = vcombine.high %v3397_v56, %v3401_v48  ;;  %v3410_v60 = vld [vmem:[%s10813_s0 + $0xda8] sm:$0xff]  ;;  %v9340_v4 = vcombine.low %v3397_v56, %v3401_v48  ;;  %v3417_v56 = vld [vmem:[%s10813_s0 + $0xde0] sm:$0xff] }
 0x19d   : > { %11685 = vst [vmem:[#allocation377_spill] sm:$0xff] %v9325_v32  ;;  %v3414_v48 = vld [vmem:[%s10813_s0 + $0xdc8] sm:$0xff] }
 0x19e   : > { %11683 = vst [vmem:[#allocation375_spill] sm:$0xff] %v9320_v59  ;;  %11684 = vst [vmem:[#allocation376_spill] sm:$0xff] %v9322_v53 }
 0x19f   : > { %4153 = vmatpush1.bf16.msra.mxu0 %v9292_v6  ;;  %4196 = vmatpush1.bf16.msra.mxu1 %v9296_v61  ;;  %11686 = vst [vmem:[#allocation378_spill] sm:$0xff] %v9340_v4  ;;  %v9349_v61 = vcombine.high %v3406_v2, %v3410_v60  ;;  %v3413_v6 = vld [vmem:[%s10813_s0 + $0xdc0] sm:$0xff] }
 0x1a0   : > { %4154 = vmatprep.subr.bf16.mxu0 %v9298_v17  ;;  %4197 = vmatprep.subr.bf16.mxu1 %v9301_v39  ;;  %v9344_v39 = vcombine.low %v3398_v62, %v3402_v38  ;;  %v9346_v17 = vcombine.high %v3405_v49, %v3409_v11  ;;  %v3418_v62 = vld [vmem:[%s10813_s0 + $0xde8] sm:$0xff]  ;;  %v9364_v38 = vcombine.low %v3405_v49, %v3409_v11  ;;  %v3425_v49 = vld [vmem:[%s10813_s0 + $0xe20] sm:$0xff] }
 0x1a1   : > { %11689 = vst [vmem:[#allocation381_spill] sm:$0xff] %v9349_v61  ;;  %v3422_v11 = vld [vmem:[%s10813_s0 + $0xe08] sm:$0xff] }
 0x1a2   : > { %11687 = vst [vmem:[#allocation379_spill] sm:$0xff] %v9344_v39  ;;  %11688 = vst [vmem:[#allocation380_spill] sm:$0xff] %v9346_v17 }
 0x1a3   : > { %4155 = vmatpush1.bf16.msra.mxu0 %v9316_v57  ;;  %4198 = vmatpush1.bf16.msra.mxu1 %v9320_v59  ;;  %11690 = vst [vmem:[#allocation382_spill] sm:$0xff] %v9364_v38  ;;  %v9373_v59 = vcombine.high %v3414_v48, %v3418_v62  ;;  %v3421_v57 = vld [vmem:[%s10813_s0 + $0xe00] sm:$0xff] }
 0x1a4   : > { %4156 = vmatprep.subr.bf16.mxu0 %v9322_v53  ;;  %4199 = vmatprep.subr.bf16.mxu1 %v9325_v32  ;;  %v9368_v32 = vcombine.low %v3406_v2, %v3410_v60  ;;  %v9370_v53 = vcombine.high %v3413_v6, %v3417_v56  ;;  %v3426_v2 = vld [vmem:[%s10813_s0 + $0xe28] sm:$0xff]  ;;  %v9388_v60 = vcombine.low %v3413_v6, %v3417_v56  ;;  %v3433_v6 = vld [vmem:[%s10813_s0 + $0xe60] sm:$0xff] }
 0x1a5   : > { %11693 = vst [vmem:[#allocation385_spill] sm:$0xff] %v9373_v59  ;;  %v3430_v56 = vld [vmem:[%s10813_s0 + $0xe48] sm:$0xff] }
 0x1a6   : > { %11691 = vst [vmem:[#allocation383_spill] sm:$0xff] %v9368_v32  ;;  %11692 = vst [vmem:[#allocation384_spill] sm:$0xff] %v9370_v53 }
 0x1a7   : > { %4157 = vmatpush1.bf16.msra.mxu0 %v9340_v4  ;;  %4200 = vmatpush1.bf16.msra.mxu1 %v9344_v39  ;;  %11694 = vst [vmem:[#allocation386_spill] sm:$0xff] %v9388_v60  ;;  %v9397_v39 = vcombine.high %v3422_v11, %v3426_v2  ;;  %v3429_v4 = vld [vmem:[%s10813_s0 + $0xe40] sm:$0xff] }
 0x1a8   : > { %4158 = vmatprep.subr.bf16.mxu0 %v9346_v17  ;;  %4201 = vmatprep.subr.bf16.mxu1 %v9349_v61  ;;  %v9392_v61 = vcombine.low %v3414_v48, %v3418_v62  ;;  %v9394_v17 = vcombine.high %v3421_v57, %v3425_v49  ;;  %v3434_v48 = vld [vmem:[%s10813_s0 + $0xe68] sm:$0xff]  ;;  %v9412_v62 = vcombine.low %v3421_v57, %v3425_v49  ;;  %v3441_v57 = vld [vmem:[%s10813_s0 + $0xea0] sm:$0xff] }
 0x1a9   : > { %11697 = vst [vmem:[#allocation389_spill] sm:$0xff] %v9397_v39  ;;  %v3438_v49 = vld [vmem:[%s10813_s0 + $0xe88] sm:$0xff] }
 0x1aa   : > { %11695 = vst [vmem:[#allocation387_spill] sm:$0xff] %v9392_v61  ;;  %11696 = vst [vmem:[#allocation388_spill] sm:$0xff] %v9394_v17 }
 0x1ab   : > { %4159 = vmatpush1.bf16.msra.mxu0 %v9364_v38  ;;  %4202 = vmatpush1.bf16.msra.mxu1 %v9368_v32  ;;  %11698 = vst [vmem:[#allocation390_spill] sm:$0xff] %v9412_v62  ;;  %v9421_v32 = vcombine.high %v3430_v56, %v3434_v48  ;;  %v3437_v38 = vld [vmem:[%s10813_s0 + $0xe80] sm:$0xff] }
 0x1ac   : > { %4160 = vmatprep.subr.bf16.mxu0 %v9370_v53  ;;  %4203 = vmatprep.subr.bf16.mxu1 %v9373_v59  ;;  %v9416_v59 = vcombine.low %v3422_v11, %v3426_v2  ;;  %v9418_v53 = vcombine.high %v3429_v4, %v3433_v6  ;;  %v3442_v11 = vld [vmem:[%s10813_s0 + $0xea8] sm:$0xff]  ;;  %v9436_v2 = vcombine.low %v3429_v4, %v3433_v6  ;;  %v3449_v4 = vld [vmem:[%s10813_s0 + $0xee0] sm:$0xff] }
 0x1ad   : > { %11701 = vst [vmem:[#allocation393_spill] sm:$0xff] %v9421_v32  ;;  %v3446_v6 = vld [vmem:[%s10813_s0 + $0xec8] sm:$0xff] }
 0x1ae   : > { %11699 = vst [vmem:[#allocation391_spill] sm:$0xff] %v9416_v59  ;;  %11700 = vst [vmem:[#allocation392_spill] sm:$0xff] %v9418_v53 }
 0x1af   : > { %4161 = vmatpush1.bf16.msra.mxu0 %v9388_v60  ;;  %4204 = vmatpush1.bf16.msra.mxu1 %v9392_v61  ;;  %11702 = vst [vmem:[#allocation394_spill] sm:$0xff] %v9436_v2  ;;  %v9445_v61 = vcombine.high %v3438_v49, %v3442_v11  ;;  %v3445_v60 = vld [vmem:[%s10813_s0 + $0xec0] sm:$0xff] }
 0x1b0   : > { %4162 = vmatprep.subr.bf16.mxu0 %v9394_v17  ;;  %4205 = vmatprep.subr.bf16.mxu1 %v9397_v39  ;;  %v9440_v39 = vcombine.low %v3430_v56, %v3434_v48  ;;  %v9442_v17 = vcombine.high %v3437_v38, %v3441_v57  ;;  %v3450_v56 = vld [vmem:[%s10813_s0 + $0xee8] sm:$0xff]  ;;  %v9460_v48 = vcombine.low %v3437_v38, %v3441_v57  ;;  %v3457_v38 = vld [vmem:[%s10813_s0 + $0xf20] sm:$0xff] }
 0x1b1   : > { %11705 = vst [vmem:[#allocation397_spill] sm:$0xff] %v9445_v61  ;;  %v3454_v57 = vld [vmem:[%s10813_s0 + $0xf08] sm:$0xff] }
 0x1b2   : > { %11703 = vst [vmem:[#allocation395_spill] sm:$0xff] %v9440_v39  ;;  %11704 = vst [vmem:[#allocation396_spill] sm:$0xff] %v9442_v17 }
 0x1b3   : > { %4163 = vmatpush1.bf16.msra.mxu0 %v9412_v62  ;;  %4206 = vmatpush1.bf16.msra.mxu1 %v9416_v59  ;;  %11706 = vst [vmem:[#allocation398_spill] sm:$0xff] %v9460_v48  ;;  %v9469_v59 = vcombine.high %v3446_v6, %v3450_v56  ;;  %v3453_v62 = vld [vmem:[%s10813_s0 + $0xf00] sm:$0xff] }
 0x1b4   : > { %4164 = vmatprep.subr.bf16.mxu0 %v9418_v53  ;;  %4207 = vmatprep.subr.bf16.mxu1 %v9421_v32  ;;  %v9464_v32 = vcombine.low %v3438_v49, %v3442_v11  ;;  %v9466_v53 = vcombine.high %v3445_v60, %v3449_v4  ;;  %v3458_v49 = vld [vmem:[%s10813_s0 + $0xf28] sm:$0xff]  ;;  %v9484_v11 = vcombine.low %v3445_v60, %v3449_v4  ;;  %v3465_v60 = vld [vmem:[%s10813_s0 + $0xf60] sm:$0xff] }
 0x1b5   : > { %11709 = vst [vmem:[#allocation401_spill] sm:$0xff] %v9469_v59  ;;  %v3462_v4 = vld [vmem:[%s10813_s0 + $0xf48] sm:$0xff] }
 0x1b6   : > { %11707 = vst [vmem:[#allocation399_spill] sm:$0xff] %v9464_v32  ;;  %11708 = vst [vmem:[#allocation400_spill] sm:$0xff] %v9466_v53 }
 0x1b7   : > { %4165 = vmatpush1.bf16.msra.mxu0 %v9436_v2  ;;  %4208 = vmatpush1.bf16.msra.mxu1 %v9440_v39  ;;  %11710 = vst [vmem:[#allocation402_spill] sm:$0xff] %v9484_v11  ;;  %v9493_v39 = vcombine.high %v3454_v57, %v3458_v49  ;;  %v3461_v2 = vld [vmem:[%s10813_s0 + $0xf40] sm:$0xff] }
 0x1b8   : > { %4166 = vmatprep.subr.bf16.mxu0 %v9442_v17  ;;  %4209 = vmatprep.subr.bf16.mxu1 %v9445_v61  ;;  %v9488_v61 = vcombine.low %v3446_v6, %v3450_v56  ;;  %v9490_v17 = vcombine.high %v3453_v62, %v3457_v38  ;;  %v3466_v6 = vld [vmem:[%s10813_s0 + $0xf68] sm:$0xff]  ;;  %v9508_v56 = vcombine.low %v3453_v62, %v3457_v38  ;;  %v3473_v62 = vld [vmem:[%s10813_s0 + $0xfa0] sm:$0xff] }
 0x1b9   : > { %11713 = vst [vmem:[#allocation405_spill] sm:$0xff] %v9493_v39  ;;  %v3470_v38 = vld [vmem:[%s10813_s0 + $0xf88] sm:$0xff] }
 0x1ba   : > { %11711 = vst [vmem:[#allocation403_spill] sm:$0xff] %v9488_v61  ;;  %11712 = vst [vmem:[#allocation404_spill] sm:$0xff] %v9490_v17 }
 0x1bb   : > { %4167 = vmatpush1.bf16.msra.mxu0 %v9460_v48  ;;  %4210 = vmatpush1.bf16.msra.mxu1 %v9464_v32  ;;  %11714 = vst [vmem:[#allocation406_spill] sm:$0xff] %v9508_v56  ;;  %v9517_v32 = vcombine.high %v3462_v4, %v3466_v6  ;;  %v3469_v48 = vld [vmem:[%s10813_s0 + $0xf80] sm:$0xff] }
 0x1bc   : > { %4168 = vmatprep.subr.bf16.mxu0 %v9466_v53  ;;  %4211 = vmatprep.subr.bf16.mxu1 %v9469_v59  ;;  %v9512_v59 = vcombine.low %v3454_v57, %v3458_v49  ;;  %v9514_v53 = vcombine.high %v3461_v2, %v3465_v60  ;;  %v3474_v57 = vld [vmem:[%s10813_s0 + $0xfa8] sm:$0xff]  ;;  %v9532_v49 = vcombine.low %v3461_v2, %v3465_v60  ;;  %v3481_v2 = vld [vmem:[%s10813_s0 + $0xfe0] sm:$0xff] }
 0x1bd   : > { %11717 = vst [vmem:[#allocation409_spill] sm:$0xff] %v9517_v32  ;;  %v9550_v60 = vcombine.low %v3469_v48, %v3473_v62  ;;  %v9567_v46 = vcombine.low %v3470_v38, %v3474_v57 }
 0x1be   : > { %11715 = vst [vmem:[#allocation407_spill] sm:$0xff] %v9512_v59  ;;  %11716 = vst [vmem:[#allocation408_spill] sm:$0xff] %v9514_v53 }
 0x1bf   : > { %4169 = vmatpush1.bf16.msra.mxu0 %v9484_v11  ;;  %4212 = vmatpush1.bf16.msra.mxu1 %v9488_v61  ;;  %11718 = vst [vmem:[#allocation410_spill] sm:$0xff] %v9532_v49  ;;  %v9539_v61 = vcombine.high %v3469_v48, %v3473_v62  ;;  %v9542_v11 = vcombine.high %v3470_v38, %v3474_v57  ;;  %11722 = vst [vmem:[#allocation414_spill] sm:$0xff] %v9550_v60  ;;  %v11725_v48 = vshll.u32 %v7172_v54, 16 }
 0x1c0   : > { %4170 = vmatprep.subr.bf16.mxu0 %v9490_v17  ;;  %4213 = vmatprep.subr.bf16.mxu1 %v9493_v39  ;;  %v3489_v39 = vshrl.u32 %v7172_v54, 16  ;;  %v9537_v17 = vcombine.low %v3462_v4, %v3466_v6  ;;  %v3478_v4 = vld [vmem:[%s10813_s0 + $0xfc8] sm:$0xff]  ;;  %11726 = vst [vmem:[#allocation415_spill] sm:$0xff] %v9567_v46  ;;  %v3363_v54 = vld [vmem:[%s10813_s0 + $0xc30] sm:$0xff] }
 0x1c1   : > { %11720 = vst [vmem:[#allocation412_spill] sm:$0xff] %v9539_v61  ;;  %11721 = vst [vmem:[#allocation413_spill] sm:$0xff] %v9542_v11  ;;  %v3482_v6 = vld [vmem:[%s10813_s0 + $0xfe8] sm:$0xff]  ;;  %v3492_v62 = vrot.slane %v11725_v48, 2 }
 0x1c2   : > { %11719 = vst [vmem:[#allocation411_spill] sm:$0xff] %v9537_v17  ;;  %v3491_v16 = vrot.slane %v3489_v39, 1  ;;  %v3364_v39 = vld [vmem:[%s10813_s0 + $0xc38] sm:$0xff]  ;;  %v9591_v48 = vcombine.low %v3478_v4, %v3482_v6 }
 0x1c3   : > { %4171 = vmatpush1.bf16.msra.mxu0 %v9508_v56  ;;  %4214 = vmatpush1.bf16.msra.mxu1 %v9512_v59  ;;  %v3477_v56 = vld [vmem:[%s10813_s0 + $0xfc0] sm:$0xff]  ;;  %v11724_v59 = vshll.u32 %v7145_v25, 16 }
 0x1c4   : > { %4172 = vmatprep.subr.bf16.mxu0 %v9514_v53  ;;  %4215 = vmatprep.subr.bf16.mxu1 %v9517_v32  ;;  %v11723_v32 = vshrl.u32 %v7145_v25, 16  ;;  %v9569_v47 = vcombine.high %v3477_v56, %v3481_v2  ;;  %v3359_v25 = vld [vmem:[%s10813_s0 + $0xc10] sm:$0xff]  ;;  %v3493_v57 = vor.u32 %v3492_v62, %v3491_v16  ;;  %11730 = vst [vmem:[#allocation419_spill] sm:$0xff] %v9591_v48 }
 0x1c5   : > { %v3487_v58 = vrot.slane %v11724_v59, 2  ;;  %v3360_v59 = vld [vmem:[%s10813_s0 + $0xc18] sm:$0xff]  ;;  %v3371_v16 = vld [vmem:[%s10813_s0 + $0xc70] sm:$0xff] }
 0x1c6   : > { %v3486_v53 = vrot.slane %v11723_v32, 1  ;;  %11727 = vst [vmem:[#allocation416_spill] sm:$0xff] %v9569_v47  ;;  %v9587_v32 = vcombine.low %v3477_v56, %v3481_v2  ;;  %v9614_v2 = vcombine.low %v3359_v25, %v3363_v54 }
 0x1c7   : > { %4173 = vmatpush1.bf16.msra.mxu0 %v9532_v49  ;;  %4216 = vmatpush1.bf16.msra.mxu1 %v9537_v17  ;;  %v9572_v49 = vcombine.high %v3478_v4, %v3482_v6  ;;  %v9618_v4 = vcombine.low %v3360_v59, %v3364_v39 }
 0x1c8   : > { %4174 = vmatprep.subr.bf16.mxu0 %v9539_v61  ;;  %4217 = vmatprep.subr.bf16.mxu1 %v9542_v11  ;;  %11729 = vst [vmem:[#allocation418_spill] sm:$0xff] %v9587_v32  ;;  %v3488_v38 = vor.u32 %v3487_v58, %v3486_v53  ;;  %v9593_v11 = vcombine.high %v3359_v25, %v3363_v54  ;;  %v3368_v58 = vld [vmem:[%s10813_s0 + $0xc58] sm:$0xff]  ;;  %11733 = vst [vmem:[#allocation422_spill] sm:$0xff] %v9614_v2  ;;  %v3379_v25 = vld [vmem:[%s10813_s0 + $0xcb0] sm:$0xff] }
 0x1c9   : > { %11728 = vst [vmem:[#allocation417_spill] sm:$0xff] %v9572_v49  ;;  %v9596_v61 = vcombine.high %v3360_v59, %v3364_v39  ;;  %v3372_v53 = vld [vmem:[%s10813_s0 + $0xc78] sm:$0xff]  ;;  %11734 = vst [vmem:[#allocation423_spill] sm:$0xff] %v9618_v4 }
 0x1ca   : > { %11731 = vst [vmem:[#allocation420_spill] sm:$0xff] %v9593_v11  ;;  %v9612_v56 = vsel %vm3485_vm2, %v3488_v38, %v3493_v57  ;;  %v9623_v62 = vcombine.high %v3368_v58, %v3372_v53  ;;  %v3376_v54 = vld [vmem:[%s10813_s0 + $0xc98] sm:$0xff]  ;;  %v9644_v38 = vcombine.low %v3368_v58, %v3372_v53 }
 0x1cb   : > { %4175 = vmatpush1.bf16.msra.mxu0 %v9550_v60  ;;  %4218 = vmatpush1.bf16.msra.mxu1 %v9567_v46  ;;  %11732 = vst [vmem:[#allocation421_spill] sm:$0xff] %v9596_v61  ;;  %v3367_v60 = vld [vmem:[%s10813_s0 + $0xc50] sm:$0xff]  ;;  %v3380_v59 = vld [vmem:[%s10813_s0 + $0xcb8] sm:$0xff] }
 0x1cc   : > { %4176 = vmatprep.subr.bf16.mxu0 %v9569_v47  ;;  %4219 = vmatprep.subr.bf16.mxu1 %v9572_v49  ;;  %v9620_v6 = vcombine.high %v3367_v60, %v3371_v16  ;;  %11736 = vst [vmem:[#allocation425_spill] sm:$0xff] %v9623_v62  ;;  %v9640_v39 = vcombine.low %v3367_v60, %v3371_v16  ;;  %11738 = vst [vmem:[#allocation427_spill] sm:$0xff] %v9644_v38  ;;  %v3387_v60 = vld [vmem:[%s10813_s0 + $0xcf0] sm:$0xff]  ;;  %v3384_v16 = vld [vmem:[%s10813_s0 + $0xcd8] sm:$0xff] }
 0x1cd   : > { %v3388_v58 = vld [vmem:[%s10813_s0 + $0xcf8] sm:$0xff] }
 0x1ce   : > { %11735 = vst [vmem:[#allocation424_spill] sm:$0xff] %v9620_v6  ;;  %11737 = vst [vmem:[#allocation426_spill] sm:$0xff] %v9640_v39 }
 0x1cf   : > { %4177 = vmatpush1.bf16.msra.mxu0 %v9587_v32  ;;  %4220 = vmatpush1.bf16.msra.mxu1 %v9591_v48  ;;  %v3375_v32 = vld [vmem:[%s10813_s0 + $0xc90] sm:$0xff] }
 0x1d0   : > { %4232 = vmatprep.subr.bf16.mxu0 %v9593_v11  ;;  %4275 = vmatprep.subr.bf16.mxu1 %v9596_v61  ;;  %v9646_v57 = vcombine.high %v3375_v32, %v3379_v25  ;;  %v9649_v61 = vcombine.high %v3376_v54, %v3380_v59  ;;  %v3383_v11 = vld [vmem:[%s10813_s0 + $0xcd0] sm:$0xff]  ;;  %v9666_v53 = vcombine.low %v3375_v32, %v3379_v25  ;;  %v3392_v25 = vld [vmem:[%s10813_s0 + $0xd18] sm:$0xff] }
 0x1d1   : > { %v3395_v32 = vld [vmem:[%s10813_s0 + $0xd30] sm:$0xff] }
 0x1d2   : > { %4179 = vmatmul.mubr.bf16.vlgmr.msra.gmra.mrb[0].mxu0 %v9612_v56  ;;  %4222 = vmatmul.mubr.bf16.vlgmr.msra.gmra.mrb[0].mxu1 %v9612_v56  ;;  %11739 = vst [vmem:[#allocation428_spill] sm:$0xff] %v9646_v57  ;;  %11740 = vst [vmem:[#allocation429_spill] sm:$0xff] %v9649_v61 }
 0x1d3   : > { %4233 = vmatpush1.bf16.msra.mxu0 %v9614_v2  ;;  %4276 = vmatpush1.bf16.msra.mxu1 %v9618_v4  ;;  %11741 = vst [vmem:[#allocation430_spill] sm:$0xff] %v9666_v53  ;;  %v9675_v4 = vcombine.high %v3384_v16, %v3388_v58 }
 0x1d4   : > { %4234 = vmatprep.subr.bf16.mxu0 %v9620_v6  ;;  %4277 = vmatprep.subr.bf16.mxu1 %v9623_v62  ;;  %v9670_v62 = vcombine.low %v3376_v54, %v3380_v59  ;;  %v9672_v6 = vcombine.high %v3383_v11, %v3387_v60  ;;  %v3396_v54 = vld [vmem:[%s10813_s0 + $0xd38] sm:$0xff]  ;;  %v9690_v59 = vcombine.low %v3383_v11, %v3387_v60  ;;  %v3403_v11 = vld [vmem:[%s10813_s0 + $0xd70] sm:$0xff] }
 0x1d5   : > { %4264 = vmatprep.mubr.bf16.mxu0 %v9238_v15  ;;  %4307 = vmatprep.mubr.bf16.mxu1 %v9238_v15  ;;  %11744 = vst [vmem:[#allocation433_spill] sm:$0xff] %v9675_v4  ;;  %v3391_v15 = vld [vmem:[%s10813_s0 + $0xd10] sm:$0xff]  ;;  %v3400_v60 = vld [vmem:[%s10813_s0 + $0xd58] sm:$0xff] }
 0x1d6   : > { %11742 = vst [vmem:[#allocation431_spill] sm:$0xff] %v9670_v62  ;;  %11743 = vst [vmem:[#allocation432_spill] sm:$0xff] %v9672_v6 }
 0x1d7   : > { %4235 = vmatpush1.bf16.msra.mxu0 %v9640_v39  ;;  %4278 = vmatpush1.bf16.msra.mxu1 %v9644_v38  ;;  %11745 = vst [vmem:[#allocation434_spill] sm:$0xff] %v9690_v59  ;;  %v9699_v38 = vcombine.high %v3392_v25, %v3396_v54  ;;  %v3399_v39 = vld [vmem:[%s10813_s0 + $0xd50] sm:$0xff] }
 0x1d8   : > { %4236 = vmatprep.subr.bf16.mxu0 %v9646_v57  ;;  %4279 = vmatprep.subr.bf16.mxu1 %v9649_v61  ;;  %v9694_v61 = vcombine.low %v3384_v16, %v3388_v58  ;;  %v9696_v57 = vcombine.high %v3391_v15, %v3395_v32  ;;  %v3404_v16 = vld [vmem:[%s10813_s0 + $0xd78] sm:$0xff]  ;;  %v9714_v58 = vcombine.low %v3391_v15, %v3395_v32  ;;  %v3411_v15 = vld [vmem:[%s10813_s0 + $0xdb0] sm:$0xff] }
 0x1d9   : > { %11748 = vst [vmem:[#allocation437_spill] sm:$0xff] %v9699_v38  ;;  %v3408_v32 = vld [vmem:[%s10813_s0 + $0xd98] sm:$0xff] }
 0x1da   : > { %11746 = vst [vmem:[#allocation435_spill] sm:$0xff] %v9694_v61  ;;  %11747 = vst [vmem:[#allocation436_spill] sm:$0xff] %v9696_v57 }
 0x1db   : > { %4237 = vmatpush1.bf16.msra.mxu0 %v9666_v53  ;;  %4280 = vmatpush1.bf16.msra.mxu1 %v9670_v62  ;;  %11749 = vst [vmem:[#allocation438_spill] sm:$0xff] %v9714_v58  ;;  %v9723_v62 = vcombine.high %v3400_v60, %v3404_v16  ;;  %v3407_v53 = vld [vmem:[%s10813_s0 + $0xd90] sm:$0xff] }
 0x1dc   : > { %4238 = vmatprep.subr.bf16.mxu0 %v9672_v6  ;;  %4281 = vmatprep.subr.bf16.mxu1 %v9675_v4  ;;  %v9718_v4 = vcombine.low %v3392_v25, %v3396_v54  ;;  %v9720_v6 = vcombine.high %v3399_v39, %v3403_v11  ;;  %v3412_v25 = vld [vmem:[%s10813_s0 + $0xdb8] sm:$0xff]  ;;  %v9738_v54 = vcombine.low %v3399_v39, %v3403_v11  ;;  %v3419_v39 = vld [vmem:[%s10813_s0 + $0xdf0] sm:$0xff] }
 0x1dd   : > { %11752 = vst [vmem:[#allocation441_spill] sm:$0xff] %v9723_v62  ;;  %v3416_v11 = vld [vmem:[%s10813_s0 + $0xdd8] sm:$0xff] }
 0x1de   : > { %11750 = vst [vmem:[#allocation439_spill] sm:$0xff] %v9718_v4  ;;  %11751 = vst [vmem:[#allocation440_spill] sm:$0xff] %v9720_v6 }
 0x1df   : > { %4239 = vmatpush1.bf16.msra.mxu0 %v9690_v59  ;;  %4282 = vmatpush1.bf16.msra.mxu1 %v9694_v61  ;;  %11753 = vst [vmem:[#allocation442_spill] sm:$0xff] %v9738_v54  ;;  %v9747_v61 = vcombine.high %v3408_v32, %v3412_v25  ;;  %v3415_v59 = vld [vmem:[%s10813_s0 + $0xdd0] sm:$0xff] }
 0x1e0   : > { %4240 = vmatprep.subr.bf16.mxu0 %v9696_v57  ;;  %4283 = vmatprep.subr.bf16.mxu1 %v9699_v38  ;;  %v9742_v38 = vcombine.low %v3400_v60, %v3404_v16  ;;  %v9744_v57 = vcombine.high %v3407_v53, %v3411_v15  ;;  %v3420_v60 = vld [vmem:[%s10813_s0 + $0xdf8] sm:$0xff]  ;;  %v9762_v16 = vcombine.low %v3407_v53, %v3411_v15  ;;  %v3427_v53 = vld [vmem:[%s10813_s0 + $0xe30] sm:$0xff] }
 0x1e1   : > { %11756 = vst [vmem:[#allocation445_spill] sm:$0xff] %v9747_v61  ;;  %v3424_v15 = vld [vmem:[%s10813_s0 + $0xe18] sm:$0xff] }
 0x1e2   : > { %11754 = vst [vmem:[#allocation443_spill] sm:$0xff] %v9742_v38  ;;  %11755 = vst [vmem:[#allocation444_spill] sm:$0xff] %v9744_v57 }
 0x1e3   : > { %4241 = vmatpush1.bf16.msra.mxu0 %v9714_v58  ;;  %4284 = vmatpush1.bf16.msra.mxu1 %v9718_v4  ;;  %11757 = vst [vmem:[#allocation446_spill] sm:$0xff] %v9762_v16  ;;  %v9771_v4 = vcombine.high %v3416_v11, %v3420_v60  ;;  %v3423_v58 = vld [vmem:[%s10813_s0 + $0xe10] sm:$0xff] }
 0x1e4   : > { %4242 = vmatprep.subr.bf16.mxu0 %v9720_v6  ;;  %4285 = vmatprep.subr.bf16.mxu1 %v9723_v62  ;;  %v9766_v62 = vcombine.low %v3408_v32, %v3412_v25  ;;  %v9768_v6 = vcombine.high %v3415_v59, %v3419_v39  ;;  %v3428_v32 = vld [vmem:[%s10813_s0 + $0xe38] sm:$0xff]  ;;  %v9786_v25 = vcombine.low %v3415_v59, %v3419_v39  ;;  %v3435_v59 = vld [vmem:[%s10813_s0 + $0xe70] sm:$0xff] }
 0x1e5   : > { %11760 = vst [vmem:[#allocation449_spill] sm:$0xff] %v9771_v4  ;;  %v3432_v39 = vld [vmem:[%s10813_s0 + $0xe58] sm:$0xff] }
 0x1e6   : > { %11758 = vst [vmem:[#allocation447_spill] sm:$0xff] %v9766_v62  ;;  %11759 = vst [vmem:[#allocation448_spill] sm:$0xff] %v9768_v6 }
 0x1e7   : > { %4243 = vmatpush1.bf16.msra.mxu0 %v9738_v54  ;;  %4286 = vmatpush1.bf16.msra.mxu1 %v9742_v38  ;;  %11761 = vst [vmem:[#allocation450_spill] sm:$0xff] %v9786_v25  ;;  %v9795_v38 = vcombine.high %v3424_v15, %v3428_v32  ;;  %v3431_v54 = vld [vmem:[%s10813_s0 + $0xe50] sm:$0xff] }
 0x1e8   : > { %4244 = vmatprep.subr.bf16.mxu0 %v9744_v57  ;;  %4287 = vmatprep.subr.bf16.mxu1 %v9747_v61  ;;  %v9790_v61 = vcombine.low %v3416_v11, %v3420_v60  ;;  %v9792_v57 = vcombine.high %v3423_v58, %v3427_v53  ;;  %v3436_v11 = vld [vmem:[%s10813_s0 + $0xe78] sm:$0xff]  ;;  %v9810_v60 = vcombine.low %v3423_v58, %v3427_v53  ;;  %v3443_v58 = vld [vmem:[%s10813_s0 + $0xeb0] sm:$0xff] }
 0x1e9   : > { %11764 = vst [vmem:[#allocation453_spill] sm:$0xff] %v9795_v38  ;;  %v3440_v53 = vld [vmem:[%s10813_s0 + $0xe98] sm:$0xff] }
 0x1ea   : > { %11762 = vst [vmem:[#allocation451_spill] sm:$0xff] %v9790_v61  ;;  %11763 = vst [vmem:[#allocation452_spill] sm:$0xff] %v9792_v57 }
 0x1eb   : > { %4245 = vmatpush1.bf16.msra.mxu0 %v9762_v16  ;;  %4288 = vmatpush1.bf16.msra.mxu1 %v9766_v62  ;;  %11765 = vst [vmem:[#allocation454_spill] sm:$0xff] %v9810_v60  ;;  %v9819_v62 = vcombine.high %v3432_v39, %v3436_v11  ;;  %v3439_v16 = vld [vmem:[%s10813_s0 + $0xe90] sm:$0xff] }
 0x1ec   : > { %4246 = vmatprep.subr.bf16.mxu0 %v9768_v6  ;;  %4289 = vmatprep.subr.bf16.mxu1 %v9771_v4  ;;  %v9814_v4 = vcombine.low %v3424_v15, %v3428_v32  ;;  %v9816_v6 = vcombine.high %v3431_v54, %v3435_v59  ;;  %v3444_v15 = vld [vmem:[%s10813_s0 + $0xeb8] sm:$0xff]  ;;  %v9834_v32 = vcombine.low %v3431_v54, %v3435_v59  ;;  %v3451_v54 = vld [vmem:[%s10813_s0 + $0xef0] sm:$0xff] }
 0x1ed   : > { %11768 = vst [vmem:[#allocation457_spill] sm:$0xff] %v9819_v62  ;;  %v3448_v59 = vld [vmem:[%s10813_s0 + $0xed8] sm:$0xff] }
 0x1ee   : > { %11766 = vst [vmem:[#allocation455_spill] sm:$0xff] %v9814_v4  ;;  %11767 = vst [vmem:[#allocation456_spill] sm:$0xff] %v9816_v6 }
 0x1ef   : > { %4247 = vmatpush1.bf16.msra.mxu0 %v9786_v25  ;;  %4290 = vmatpush1.bf16.msra.mxu1 %v9790_v61  ;;  %11769 = vst [vmem:[#allocation458_spill] sm:$0xff] %v9834_v32  ;;  %v9843_v61 = vcombine.high %v3440_v53, %v3444_v15  ;;  %v3447_v25 = vld [vmem:[%s10813_s0 + $0xed0] sm:$0xff] }
 0x1f0   : > { %4248 = vmatprep.subr.bf16.mxu0 %v9792_v57  ;;  %4291 = vmatprep.subr.bf16.mxu1 %v9795_v38  ;;  %v9838_v38 = vcombine.low %v3432_v39, %v3436_v11  ;;  %v9840_v57 = vcombine.high %v3439_v16, %v3443_v58  ;;  %v3452_v39 = vld [vmem:[%s10813_s0 + $0xef8] sm:$0xff]  ;;  %v9858_v11 = vcombine.low %v3439_v16, %v3443_v58  ;;  %v3459_v16 = vld [vmem:[%s10813_s0 + $0xf30] sm:$0xff] }
 0x1f1   : > { %11772 = vst [vmem:[#allocation461_spill] sm:$0xff] %v9843_v61  ;;  %v3456_v58 = vld [vmem:[%s10813_s0 + $0xf18] sm:$0xff] }
 0x1f2   : > { %11770 = vst [vmem:[#allocation459_spill] sm:$0xff] %v9838_v38  ;;  %11771 = vst [vmem:[#allocation460_spill] sm:$0xff] %v9840_v57 }
 0x1f3   : > { %4249 = vmatpush1.bf16.msra.mxu0 %v9810_v60  ;;  %4292 = vmatpush1.bf16.msra.mxu1 %v9814_v4  ;;  %11773 = vst [vmem:[#allocation462_spill] sm:$0xff] %v9858_v11  ;;  %v9867_v4 = vcombine.high %v3448_v59, %v3452_v39  ;;  %v3455_v60 = vld [vmem:[%s10813_s0 + $0xf10] sm:$0xff] }
 0x1f4   : > { %4250 = vmatprep.subr.bf16.mxu0 %v9816_v6  ;;  %4293 = vmatprep.subr.bf16.mxu1 %v9819_v62  ;;  %v9862_v62 = vcombine.low %v3440_v53, %v3444_v15  ;;  %v9864_v6 = vcombine.high %v3447_v25, %v3451_v54  ;;  %v3460_v53 = vld [vmem:[%s10813_s0 + $0xf38] sm:$0xff]  ;;  %v9882_v15 = vcombine.low %v3447_v25, %v3451_v54  ;;  %v3467_v25 = vld [vmem:[%s10813_s0 + $0xf70] sm:$0xff] }
 0x1f5   : > { %11776 = vst [vmem:[#allocation465_spill] sm:$0xff] %v9867_v4  ;;  %v3464_v54 = vld [vmem:[%s10813_s0 + $0xf58] sm:$0xff] }
 0x1f6   : > { %11774 = vst [vmem:[#allocation463_spill] sm:$0xff] %v9862_v62  ;;  %11775 = vst [vmem:[#allocation464_spill] sm:$0xff] %v9864_v6 }
 0x1f7   : > { %4251 = vmatpush1.bf16.msra.mxu0 %v9834_v32  ;;  %4294 = vmatpush1.bf16.msra.mxu1 %v9838_v38  ;;  %11777 = vst [vmem:[#allocation466_spill] sm:$0xff] %v9882_v15  ;;  %v9891_v38 = vcombine.high %v3456_v58, %v3460_v53  ;;  %v3463_v32 = vld [vmem:[%s10813_s0 + $0xf50] sm:$0xff] }
 0x1f8   : > { %4252 = vmatprep.subr.bf16.mxu0 %v9840_v57  ;;  %4295 = vmatprep.subr.bf16.mxu1 %v9843_v61  ;;  %v9886_v61 = vcombine.low %v3448_v59, %v3452_v39  ;;  %v9888_v57 = vcombine.high %v3455_v60, %v3459_v16  ;;  %v3468_v59 = vld [vmem:[%s10813_s0 + $0xf78] sm:$0xff]  ;;  %v9906_v39 = vcombine.low %v3455_v60, %v3459_v16  ;;  %v3475_v60 = vld [vmem:[%s10813_s0 + $0xfb0] sm:$0xff] }
 0x1f9   : > { %11780 = vst [vmem:[#allocation469_spill] sm:$0xff] %v9891_v38  ;;  %v3472_v16 = vld [vmem:[%s10813_s0 + $0xf98] sm:$0xff] }
 0x1fa   : > { %11778 = vst [vmem:[#allocation467_spill] sm:$0xff] %v9886_v61  ;;  %11779 = vst [vmem:[#allocation468_spill] sm:$0xff] %v9888_v57 }
 0x1fb   : > { %4253 = vmatpush1.bf16.msra.mxu0 %v9858_v11  ;;  %4296 = vmatpush1.bf16.msra.mxu1 %v9862_v62  ;;  %11781 = vst [vmem:[#allocation470_spill] sm:$0xff] %v9906_v39  ;;  %v9915_v62 = vcombine.high %v3464_v54, %v3468_v59  ;;  %v3471_v11 = vld [vmem:[%s10813_s0 + $0xf90] sm:$0xff] }
 0x1fc   : > { %4254 = vmatprep.subr.bf16.mxu0 %v9864_v6  ;;  %4297 = vmatprep.subr.bf16.mxu1 %v9867_v4  ;;  %v9910_v4 = vcombine.low %v3456_v58, %v3460_v53  ;;  %v9912_v6 = vcombine.high %v3463_v32, %v3467_v25  ;;  %v3476_v58 = vld [vmem:[%s10813_s0 + $0xfb8] sm:$0xff]  ;;  %v9930_v53 = vcombine.low %v3463_v32, %v3467_v25  ;;  %v3483_v32 = vld [vmem:[%s10813_s0 + $0xff0] sm:$0xff] }
 0x1fd   : > { %11784 = vst [vmem:[#allocation473_spill] sm:$0xff] %v9915_v62  ;;  %v3480_v25 = vld [vmem:[%s10813_s0 + $0xfd8] sm:$0xff] }
 0x1fe   : > { %11782 = vst [vmem:[#allocation471_spill] sm:$0xff] %v9910_v4  ;;  %11783 = vst [vmem:[#allocation472_spill] sm:$0xff] %v9912_v6 }
 0x1ff   : > { %4255 = vmatpush1.bf16.msra.mxu0 %v9882_v15  ;;  %4298 = vmatpush1.bf16.msra.mxu1 %v9886_v61  ;;  %11785 = vst [vmem:[#allocation474_spill] sm:$0xff] %v9930_v53  ;;  %v9939_v61 = vcombine.high %v3472_v16, %v3476_v58  ;;  %v3479_v15 = vld [vmem:[%s10813_s0 + $0xfd0] sm:$0xff] }
 0x200   : > { %4256 = vmatprep.subr.bf16.mxu0 %v9888_v57  ;;  %4299 = vmatprep.subr.bf16.mxu1 %v9891_v38  ;;  %v9934_v38 = vcombine.low %v3464_v54, %v3468_v59  ;;  %v9936_v57 = vcombine.high %v3471_v11, %v3475_v60  ;;  %v3484_v54 = vld [vmem:[%s10813_s0 + $0xff8] sm:$0xff]  ;;  %v9954_v59 = vcombine.low %v3471_v11, %v3475_v60  ;;  %v6600_v60 = vld [vmem:[%s10814_s1 + $0xc0] sm:$0xff]  }
 0x201   : > { %11788 = vst [vmem:[#allocation477_spill] sm:$0xff] %v9939_v61  ;;  %v9970_v11 = vcombine.low %v3480_v25, %v3484_v54 }
 0x202   : > { %11786 = vst [vmem:[#allocation475_spill] sm:$0xff] %v9934_v38  ;;  %11787 = vst [vmem:[#allocation476_spill] sm:$0xff] %v9936_v57 }
 0x203   : > { %4257 = vmatpush1.bf16.msra.mxu0 %v9906_v39  ;;  %4300 = vmatpush1.bf16.msra.mxu1 %v9910_v4  ;;  %11789 = vst [vmem:[#allocation478_spill] sm:$0xff] %v9954_v59  ;;  %v9963_v4 = vcombine.high %v3480_v25, %v3484_v54  ;;  %v9966_v39 = vcombine.low %v3479_v15, %v3483_v32  ;;  %11794 = vst [vmem:[#allocation483_spill] sm:$0xff] %v9970_v11  ;;  %v6605_v25 = vld [vmem:[%s10814_s1 + $0x8] sm:$0xff]  }
 0x204   : > { %4258 = vmatprep.subr.bf16.mxu0 %v9912_v6  ;;  %4301 = vmatprep.subr.bf16.mxu1 %v9915_v62  ;;  %v9958_v62 = vcombine.low %v3472_v16, %v3476_v58  ;;  %v9960_v6 = vcombine.high %v3479_v15, %v3483_v32  ;;  %v6599_v15 = vld [vmem:[%s10814_s1 + $0x40] sm:$0xff]   ;;  %v6604_v32 = vld [vmem:[%s10814_s1 + $0xc8] sm:$0xff]  }
 0x205   : > { %11792 = vst [vmem:[#allocation481_spill] sm:$0xff] %v9963_v4  ;;  %11793 = vst [vmem:[#allocation482_spill] sm:$0xff] %v9966_v39  ;;  %v6601_v16 = vld [vmem:[%s10814_s1] sm:$0xff]   ;;  %v6606_v54 = vld [vmem:[%s10814_s1 + $0x88] sm:$0xff]  }
 0x206   : > { %11790 = vst [vmem:[#allocation479_spill] sm:$0xff] %v9958_v62  ;;  %11791 = vst [vmem:[#allocation480_spill] sm:$0xff] %v9960_v6  ;;  %v6602_v58 = vld [vmem:[%s10814_s1 + $0x80] sm:$0xff]  }
 0x207   : > { %4259 = vmatpush1.bf16.msra.mxu0 %v9930_v53  ;;  %4302 = vmatpush1.bf16.msra.mxu1 %v9934_v38 }
 0x208   : > { %4260 = vmatprep.subr.bf16.mxu0 %v9936_v57  ;;  %4303 = vmatprep.subr.bf16.mxu1 %v9939_v61 }
 0x20b   : > { %4261 = vmatpush1.bf16.msra.mxu0 %v9954_v59  ;;  %4304 = vmatpush1.bf16.msra.mxu1 %v9958_v62 }
 0x20c   : > { %4262 = vmatprep.subr.bf16.mxu0 %v9960_v6  ;;  %4305 = vmatprep.subr.bf16.mxu1 %v9963_v4 }
 0x20f   : > { %4263 = vmatpush1.bf16.msra.mxu0 %v9966_v39  ;;  %4306 = vmatpush1.bf16.msra.mxu1 %v9970_v11  ;;  %v6607_v11 = vld [vmem:[%s10814_s1 + $0x50] sm:$0xff]  }
 0x210   : > { %6388 = vmatprep.subr.bf16.mxu0 %v6599_v15  ;;  %6410 = vmatprep.subr.bf16.mxu1 %v6600_v60  ;;  %v6608_v15 = vld [vmem:[%s10814_s1 + $0xd0] sm:$0xff]  }
 0x211   : > { %v6609_v60 = vld [vmem:[%s10814_s1 + $0x10] sm:$0xff]  }
 0x212   : > { %4265 = vmatmul.mubr.bf16.vlgmr.msra.gmra.mrb[4].mxu0 %v9612_v56  ;;  %4308 = vmatmul.mubr.bf16.vlgmr.msra.gmra.mrb[4].mxu1 %v9612_v56  ;;  %v6603_v56 = vld [vmem:[%s10814_s1 + $0x48] sm:$0xff]  }
 0x213   : > { %6389 = vmatpush3.bf16.msra.mxu0 %v6601_v16  ;;  %6411 = vmatpush3.bf16.msra.mxu1 %v6602_v58  ;;  %v6610_v16 = vld [vmem:[%s10814_s1 + $0x90] sm:$0xff]   ;;  %v6611_v58 = vld [vmem:[%s10814_s1 + $0x58] sm:$0xff]  }
 0x214   : > { %6390 = vmatprep.subr.bf16.mxu0 %v6603_v56  ;;  %6412 = vmatprep.subr.bf16.mxu1 %v6604_v32  ;;  %v6612_v56 = vld [vmem:[%s10814_s1 + $0xd8] sm:$0xff]  }
 0x215   : > { %v6614_v32 = vld [vmem:[%s10814_s1 + $0x98] sm:$0xff]  }
 0x217   : > { %6391 = vmatpush3.bf16.msra.mxu0 %v6605_v25  ;;  %6413 = vmatpush3.bf16.msra.mxu1 %v6606_v54  ;;  %v6615_v25 = vld [vmem:[%s10814_s1 + $0x60] sm:$0xff]  }
 0x218   : > { %6392 = vmatprep.subr.bf16.mxu0 %v6607_v11  ;;  %6414 = vmatprep.subr.bf16.mxu1 %v6608_v15  ;;  %v6613_v11 = vld [vmem:[%s10814_s1 + $0x18] sm:$0xff]   ;;  %v6616_v54 = vld [vmem:[%s10814_s1 + $0xe0] sm:$0xff]  }
 0x219   : > { %v6617_v15 = vld [vmem:[%s10814_s1 + $0x20] sm:$0xff]  }
 0x21b   : > { %6393 = vmatpush3.bf16.msra.mxu0 %v6609_v60  ;;  %6415 = vmatpush3.bf16.msra.mxu1 %v6610_v16  ;;  %v6618_v60 = vld [vmem:[%s10814_s1 + $0xa0] sm:$0xff]   ;;  %v6619_v16 = vld [vmem:[%s10814_s1 + $0x68] sm:$0xff]  }
 0x21c   : > { %6394 = vmatprep.subr.bf16.mxu0 %v6611_v58  ;;  %6416 = vmatprep.subr.bf16.mxu1 %v6612_v56  ;;  %v6620_v58 = vld [vmem:[%s10814_s1 + $0xe8] sm:$0xff]  }
 0x21d   : > { %v6621_v56 = vld [vmem:[%s10814_s1 + $0x28] sm:$0xff]  }
 0x21f   : > { %6395 = vmatpush3.bf16.msra.mxu0 %v6613_v11  ;;  %6417 = vmatpush3.bf16.msra.mxu1 %v6614_v32  ;;  %v6622_v11 = vld [vmem:[%s10814_s1 + $0xa8] sm:$0xff]   ;;  %v6623_v32 = vld [vmem:[%s10814_s1 + $0x70] sm:$0xff]  }
 0x220   : > { %6396 = vmatprep.subr.bf16.mxu0 %v6615_v25  ;;  %6418 = vmatprep.subr.bf16.mxu1 %v6616_v54  ;;  %v6624_v25 = vld [vmem:[%s10814_s1 + $0xf0] sm:$0xff]  }
 0x221   : > { %v6625_v54 = vld [vmem:[%s10814_s1 + $0x30] sm:$0xff]  }
 0x223   : > { %6397 = vmatpush3.bf16.msra.mxu0 %v6617_v15  ;;  %6419 = vmatpush3.bf16.msra.mxu1 %v6618_v60  ;;  %v6626_v15 = vld [vmem:[%s10814_s1 + $0xb0] sm:$0xff]   ;;  %v6627_v60 = vld [vmem:[%s10814_s1 + $0x78] sm:$0xff]  }
 0x224   : > { %6398 = vmatprep.subr.bf16.mxu0 %v6619_v16  ;;  %6420 = vmatprep.subr.bf16.mxu1 %v6620_v58  ;;  %v6628_v16 = vld [vmem:[%s10814_s1 + $0xf8] sm:$0xff]  }
 0x225   : > { %v6629_v58 = vld [vmem:[%s10814_s1 + $0x38] sm:$0xff]  }
 0x227   : > { %6399 = vmatpush3.bf16.msra.mxu0 %v6621_v56  ;;  %6421 = vmatpush3.bf16.msra.mxu1 %v6622_v11  ;;  %v6630_v56 = vld [vmem:[%s10814_s1 + $0xb8] sm:$0xff]  }
 0x228   : > { %6400 = vmatprep.subr.bf16.mxu0 %v6623_v32  ;;  %6422 = vmatprep.subr.bf16.mxu1 %v6624_v25 }
 0x22b   : > { %6401 = vmatpush3.bf16.msra.mxu0 %v6625_v54  ;;  %6423 = vmatpush3.bf16.msra.mxu1 %v6626_v15 }
 0x22c   : > { %6402 = vmatprep.subr.bf16.mxu0 %v6627_v60  ;;  %6424 = vmatprep.subr.bf16.mxu1 %v6628_v16 }
 0x22f   : > { %6403 = vmatpush3.bf16.msra.mxu0 %v6629_v58  ;;  %6425 = vmatpush3.bf16.msra.mxu1 %v6630_v56 }
 0x230   : > { %4766 = vmatprep.subr.bf16.mxu0 %v6792_v3  ;;  %4809 = vmatprep.subr.bf16.mxu1 %v6805_v8 }
 0x2a5   : > { %v4180_v11 = vpop.f32.mrb[0].mxu0  ;;  %v4223_v32 = vpop.f32.mrb[0].mxu1 }
 0x2a6   : > { %v4182_v25 = vpop.f32.mrb[1].mxu0  ;;  %v4225_v54 = vpop.f32.mrb[1].mxu1  ;;  %v4334_v62 = vmul.f32 %v4180_v11, %v4180_v11  ;;  %v4336_v59 = vmul.f32 %v4223_v32, %v4223_v32 }
 0x2a7   : > { %v4184_v15 = vpop.f32.mrb[2].mxu0  ;;  %v4227_v39 = vpop.f32.mrb[2].mxu1  ;;  %v4335_v57 = vmul.f32 %v4182_v25, %v4182_v25  ;;  %v4337_v60 = vmul.f32 %v4225_v54, %v4225_v54 }
 0x2a8   : > { %v4186_v4 = vpop.f32.mrb[3].mxu0  ;;  %v4229_v6 = vpop.f32.mrb[3].mxu1  ;;  %v4338_v16 = vmul.f32 %v4184_v15, %v4184_v15  ;;  %v4340_v3 = vmul.f32 %v4227_v39, %v4227_v39 }
 0x2a9   : > { %v4339_v53 = vmul.f32 %v4186_v4, %v4186_v4  ;;  %v4341_v47 = vmul.f32 %v4229_v6, %v4229_v6 }
 0x2e5   : > { %v4266_v61 = vpop.f32.mrb[4].mxu0  ;;  %v4309_v56 = vpop.f32.mrb[4].mxu1 }
 0x2e6   : > { %v4342_v58 = vmul.f32 %v4266_v61, %v4266_v61  ;;  %v4268_v38 = vpop.f32.mrb[5].mxu0  ;;  %v4344_v8 = vmul.f32 %v4309_v56, %v4309_v56  ;;  %v4311_v48 = vpop.f32.mrb[5].mxu1 }
 0x2e7   : > { %v4343_v2 = vmul.f32 %v4268_v38, %v4268_v38  ;;  %v4270_v49 = vpop.f32.mrb[6].mxu0  ;;  %v4345_v17 = vmul.f32 %v4311_v48, %v4311_v48  ;;  %v4313_v11 = vpop.f32.mrb[6].mxu1 }
 0x2e8   : > { %v4350_v46 = vadd.f32 %v4342_v58, %v4334_v62  ;;  %v4346_v13 = vmul.f32 %v4270_v49, %v4270_v49  ;;  %v4272_v32 = vpop.f32.mrb[7].mxu0  ;;  %v4352_v12 = vadd.f32 %v4344_v8, %v4336_v59  ;;  %v4348_v54 = vmul.f32 %v4313_v11, %v4313_v11  ;;  %v4315_v61 = vpop.f32.mrb[7].mxu1  ;;  %v4733_v59 = vld [vmem:[%s10079_s26 + $0x18] sm:$0xff] }
 0x2e9   : > { %v4351_v25 = vadd.f32 %v4343_v2, %v4335_v57  ;;  %v4347_v15 = vmul.f32 %v4272_v32, %v4272_v32  ;;  %v4353_v33 = vadd.f32 %v4345_v17, %v4337_v60  ;;  %v4349_v4 = vmul.f32 %v4315_v61, %v4315_v61 }
 0x2ea   : > { %v4358_v31 = vadd.f32 1e-30, %v4350_v46  ;;  %v4354_v39 = vadd.f32 %v4346_v13, %v4338_v16  ;;  %v4360_v48 = vadd.f32 1e-30, %v4352_v12  ;;  %v4356_v6 = vadd.f32 %v4348_v54, %v4340_v3  ;;  %v4731_v13 = vld [vmem:[%s10079_s26 + $0x8] sm:$0xff] }
 0x2eb   : > { %v4359_v49 = vadd.f32 1e-30, %v4351_v25  ;;  %v4355_v62 = vadd.f32 %v4347_v15, %v4339_v53  ;;  %v4361_v2 = vadd.f32 1e-30, %v4353_v33  ;;  %v4357_v57 = vadd.f32 %v4349_v4, %v4341_v47  ;;  %v4735_v47 = vld [vmem:[%s10088_s28 + $0x8] sm:$0xff] }
 0x2ec   : > { %6631 = vrsqrt.f32 %v4358_v31  ;;  %v4362_v38 = vadd.f32 1e-30, %v4354_v39  ;;  %v4364_v17 = vadd.f32 1e-30, %v4356_v6  ;;  %v10090_v31 = vpack.c.bf16 %v4733_v59, %v4731_v13 }
 0x2ed   : > { %6633 = vrsqrt.f32 %v4360_v48  ;;  %v4363_v60 = vadd.f32 1e-30, %v4355_v62  ;;  %v4365_v16 = vadd.f32 1e-30, %v4357_v57  ;;  %v10094_v56 = vpack.c.bf16 %v4735_v47, %v4735_v47 }
 0x2ee   : > { %6635 = vrsqrt.f32 %v4359_v49  ;;  %v11303_v53 = vshll.u32 %v10090_v31, 16  ;;  %v4753_v32 = vshrl.u32 %v10090_v31, 16 }
 0x2ef   : > { %6637 = vrsqrt.f32 %v4361_v2  ;;  %v4760_v61 = vshll.u32 %v10094_v56, 16 }
 0x2f0   : > { %6639 = vrsqrt.f32 %v4362_v38  ;;  %v4757_v54 = vrot.slane %v11303_v53, 1 }
 0x2f1   : > { %6641 = vrsqrt.f32 %v4364_v17  ;;  %v4762_v53 = vrot.slane %v4760_v61, 1 }
 0x2f2   : > { %6643 = vrsqrt.f32 %v4363_v60  ;;  %v4758_v47 = vor.u32 %v4757_v54, %v4753_v32  ;;  %v11829_v54 = vld [vmem:[#allocation37_spill] sm:$0xff] }
 0x2f3   : > { %6645 = vrsqrt.f32 %v4365_v16 }
 0x2f6   : > { %v6632_v58 = vpop.eup %6631 }
 0x2f7   : > { %v6634_v3 = vpop.eup %6633  ;;  %v4374_v48 = vmul.f32 %v6632_v58, %v4350_v46  ;;  %v10105_v46 = vsel %vm737_vm0, %v4758_v47, %v4762_v53  ;;  %v11825_v53 = vld [vmem:[#allocation33_spill] sm:$0xff]  ;;  %v11826_v58 = vld [vmem:[#allocation34_spill] sm:$0xff] }
 0x2f8   : > { %v6636_v8 = vpop.eup %6635  ;;  %v4376_v38 = vmul.f32 %v6634_v3, %v4352_v12  ;;  %v11821_v12 = vld [vmem:[#allocation29_spill] sm:$0xff] }
 0x2f9   : > { %v6638_v11 = vpop.eup %6637  ;;  %v4375_v59 = vmul.f32 %v6636_v8, %v4351_v25  ;;  %v11822_v25 = vld [vmem:[#allocation30_spill] sm:$0xff]  ;;  %v11827_v8 = vld [vmem:[#allocation35_spill] sm:$0xff]  ;;  %v11841_v47 = vld [vmem:[#allocation49_spill] sm:$0xff] }
 0x2fa   : > { %v6640_v15 = vpop.eup %6639  ;;  %v4377_v41 = vmul.f32 %v6638_v11, %v4353_v33  ;;  %v11820_v33 = vld [vmem:[#allocation28_spill] sm:$0xff] }
 0x2fb   : > { %v6642_v4 = vpop.eup %6641  ;;  %v4378_v49 = vmul.f32 %v6640_v15, %v4354_v39  ;;  %v11828_v11 = vld [vmem:[#allocation36_spill] sm:$0xff]  ;;  %v11830_v15 = vld [vmem:[#allocation38_spill] sm:$0xff] }
 0x2fc   : > { %v6644_v2 = vpop.eup %6643  ;;  %v4380_v17 = vmul.f32 %v6642_v4, %v4356_v6  ;;  %v11831_v4 = vld [vmem:[#allocation39_spill] sm:$0xff] }
 0x2fd   : > { %v6646_v13 = vpop.eup %6645  ;;  %v4382_v60 = vpack.c.bf16 %v4378_v49, %v4374_v48  ;;  %v4379_v16 = vmul.f32 %v6644_v2, %v4355_v62  ;;  %v11823_v62 = vld [vmem:[#allocation31_spill] sm:$0xff]  ;;  %v11832_v48 = vld [vmem:[#allocation40_spill] sm:$0xff]  ;;  %v11833_v49 = vld [vmem:[#allocation41_spill] sm:$0xff] }
 0x2fe   : > { %v4384_v40 = vpack.c.bf16 %v4380_v17, %v4376_v38  ;;  %v4381_v30 = vmul.f32 %v6646_v13, %v4357_v57  ;;  %v11824_v57 = vld [vmem:[#allocation32_spill] sm:$0xff]  ;;  %v11834_v2 = vld [vmem:[#allocation42_spill] sm:$0xff]  ;;  %v11835_v38 = vld [vmem:[#allocation43_spill] sm:$0xff] }
 0x2ff   : > { %v4383_v24 = vpack.c.bf16 %v4379_v16, %v4375_v59  ;;  %v11836_v17 = vld [vmem:[#allocation44_spill] sm:$0xff]  ;;  %v11837_v13 = vld [vmem:[#allocation45_spill] sm:$0xff]  ;;  %v11838_v59 = vld [vmem:[#allocation46_spill] sm:$0xff] }
 0x300   : > { %v4385_v23 = vpack.c.bf16 %v4381_v30, %v4377_v41  ;;  %v11819_v41 = vld [vmem:[#allocation27_spill] sm:$0xff]  ;;  %v11840_v16 = vld [vmem:[#allocation48_spill] sm:$0xff] }
 0x301   : > { %4674 = vmatprep.mubr.bf16.mxu0 %v4383_v24 }
 0x302   : > { %4715 = vmatprep.mubr.bf16.mxu1 %v4385_v23  ;;  %4675 = vmatmul.mubr.bf16.vlgmr.msra.gmra.mrb[8].mxu0 %v4382_v60  ;;  %v11818_v23 = vld [vmem:[#allocation26_spill] sm:$0xff]  ;;  %v11839_v60 = vld [vmem:[#allocation47_spill] sm:$0xff] }
 0x303   : > { %4716 = vmatmul.mubr.bf16.vlgmr.msra.gmra.mrb[8].mxu1 %v4384_v40  ;;  %4767 = vmatpush1.bf16.msra.mxu0 %v6797_v5  ;;  %v11795_v5 = vld [vmem:[#allocation3_spill] sm:$0xff] }
 0x304   : > { %4810 = vmatpush1.bf16.msra.mxu1 %v6807_v9  ;;  %4768 = vmatprep.subr.bf16.mxu0 %v6809_v10  ;;  %v11796_v9 = vld [vmem:[#allocation4_spill] sm:$0xff]  ;;  %v11797_v10 = vld [vmem:[#allocation5_spill] sm:$0xff] }
 0x305   : > { %4811 = vmatprep.subr.bf16.mxu1 %v6821_v14  ;;  %4798 = vmatprep.mubr.bf16.mxu0 %v10105_v46  ;;  %v11798_v14 = vld [vmem:[#allocation6_spill] sm:$0xff] }
 0x306   : > { %4841 = vmatprep.mubr.bf16.mxu1 %v10105_v46 }
 0x307   : > { %4769 = vmatpush1.bf16.msra.mxu0 %v6839_v18  ;;  %v11799_v18 = vld [vmem:[#allocation7_spill] sm:$0xff] }
 0x308   : > { %4812 = vmatpush1.bf16.msra.mxu1 %v6843_v19  ;;  %4770 = vmatprep.subr.bf16.mxu0 %v6845_v20  ;;  %v11800_v19 = vld [vmem:[#allocation8_spill] sm:$0xff]  ;;  %v11801_v20 = vld [vmem:[#allocation9_spill] sm:$0xff] }
 0x309   : > { %4813 = vmatprep.subr.bf16.mxu1 %v6848_v21  ;;  %v11802_v21 = vld [vmem:[#allocation10_spill] sm:$0xff] }
 0x30b   : > { %4771 = vmatpush1.bf16.msra.mxu0 %v6863_v26  ;;  %v11803_v26 = vld [vmem:[#allocation11_spill] sm:$0xff] }
 0x30c   : > { %4814 = vmatpush1.bf16.msra.mxu1 %v6867_v27  ;;  %4772 = vmatprep.subr.bf16.mxu0 %v6869_v28  ;;  %v11804_v27 = vld [vmem:[#allocation12_spill] sm:$0xff]  ;;  %v11805_v28 = vld [vmem:[#allocation13_spill] sm:$0xff] }
 0x30d   : > { %4815 = vmatprep.subr.bf16.mxu1 %v6872_v29  ;;  %v11806_v29 = vld [vmem:[#allocation14_spill] sm:$0xff] }
 0x30f   : > { %4773 = vmatpush1.bf16.msra.mxu0 %v6887_v34  ;;  %v4730_v34 = vld [vmem:[%s10079_s26] sm:$0xff] }
 0x310   : > { %4816 = vmatpush1.bf16.msra.mxu1 %v6894_v35  ;;  %4774 = vmatprep.subr.bf16.mxu0 %v6896_v36  ;;  %v4732_v35 = vld [vmem:[%s10079_s26 + $0x10] sm:$0xff]  ;;  %v11807_v36 = vld [vmem:[#allocation15_spill] sm:$0xff] }
 0x311   : > { %4817 = vmatprep.subr.bf16.mxu1 %v6899_v37  ;;  %v11808_v37 = vld [vmem:[#allocation16_spill] sm:$0xff] }
 0x313   : > { %4775 = vmatpush1.bf16.msra.mxu0 %v6914_v42  ;;  %v11809_v42 = vld [vmem:[#allocation17_spill] sm:$0xff] }
 0x314   : > { %4818 = vmatpush1.bf16.msra.mxu1 %v6919_v43  ;;  %4776 = vmatprep.subr.bf16.mxu0 %v6921_v44  ;;  %v10155_v43 = vpack.c.bf16 %v4732_v35, %v4730_v34  ;;  %v11810_v44 = vld [vmem:[#allocation18_spill] sm:$0xff]  ;;  %v11855_v34 = vld [vmem:[#allocation63_spill] sm:$0xff]  ;;  %v11856_v35 = vld [vmem:[#allocation64_spill] sm:$0xff] }
 0x315   : > { %4819 = vmatprep.subr.bf16.mxu1 %v6924_v45  ;;  %v11811_v45 = vld [vmem:[#allocation19_spill] sm:$0xff] }
 0x316   : > { %v4741_v24 = vshrl.u32 %v10155_v43, 16 }
 0x317   : > { %4777 = vmatpush1.bf16.msra.mxu0 %v6952_v50  ;;  %v11812_v50 = vld [vmem:[#allocation20_spill] sm:$0xff] }
 0x318   : > { %4820 = vmatpush1.bf16.msra.mxu1 %v6956_v51  ;;  %4778 = vmatprep.subr.bf16.mxu0 %v6958_v52  ;;  %v4734_v51 = vld [vmem:[%s10088_s28] sm:$0xff]  ;;  %v11813_v52 = vld [vmem:[#allocation21_spill] sm:$0xff] }
 0x319   : > { %4821 = vmatprep.subr.bf16.mxu1 %v6965_v55  ;;  %v11814_v55 = vld [vmem:[#allocation22_spill] sm:$0xff] }
 0x31b   : > { %4779 = vmatpush1.bf16.msra.mxu0 %v6983_v63  ;;  %v10163_v63 = vpack.c.bf16 %v4734_v51, %v4734_v51  ;;  %v11863_v51 = vld [vmem:[#allocation71_spill] sm:$0xff] }
 0x31c   : > { %4822 = vmatpush1.bf16.msra.mxu1 %v6985_v0  ;;  %4780 = vmatprep.subr.bf16.mxu0 %v6989_v1  ;;  %v4743_v0 = vshll.u32 %v10155_v43, 16  ;;  %v11815_v1 = vld [vmem:[#allocation23_spill] sm:$0xff] }
 0x31d   : > { %4823 = vmatprep.subr.bf16.mxu1 %v6995_v7  ;;  %v11816_v7 = vld [vmem:[#allocation24_spill] sm:$0xff]  ;;  %v4748_v40 = vshll.u32 %v10163_v63, 16 }
 0x31e   : > { %v4745_v30 = vrot.slane %v4743_v0, 1 }
 0x31f   : > { %4781 = vmatpush1.bf16.msra.mxu0 %v7014_v22  ;;  %v11817_v22 = vld [vmem:[#allocation25_spill] sm:$0xff]  ;;  %v4750_v6 = vrot.slane %v4748_v40, 1 }
 0x320   : > { %4824 = vmatpush1.bf16.msra.mxu1 %v11795_v5  ;;  %4782 = vmatprep.subr.bf16.mxu0 %v11796_v9  ;;  %v4746_v39 = vor.u32 %v4745_v30, %v4741_v24  ;;  %v11842_v5 = vld [vmem:[#allocation50_spill] sm:$0xff]  ;;  %v11843_v9 = vld [vmem:[#allocation51_spill] sm:$0xff] }
 0x321   : > { %4825 = vmatprep.subr.bf16.mxu1 %v11797_v10  ;;  %v11845_v10 = vld [vmem:[#allocation53_spill] sm:$0xff]  ;;  %v11870_v30 = vld [vmem:[#allocation78_spill] sm:$0xff] }
 0x322   : > { %v10187_v3 = vsel %vm737_vm0, %v4746_v39, %v4750_v6  ;;  %v11875_v39 = vld [vmem:[#allocation83_spill] sm:$0xff]  ;;  %v11876_v6 = vld [vmem:[#allocation84_spill] sm:$0xff] }
 0x323   : > { %4783 = vmatpush1.bf16.msra.mxu0 %v11798_v14  ;;  %v11846_v14 = vld [vmem:[#allocation54_spill] sm:$0xff] }
 0x324   : > { %4826 = vmatpush1.bf16.msra.mxu1 %v11799_v18  ;;  %4784 = vmatprep.subr.bf16.mxu0 %v11800_v19  ;;  %v11847_v18 = vld [vmem:[#allocation55_spill] sm:$0xff]  ;;  %v11848_v19 = vld [vmem:[#allocation56_spill] sm:$0xff] }
 0x325   : > { %4827 = vmatprep.subr.bf16.mxu1 %v11801_v20  ;;  %v11849_v20 = vld [vmem:[#allocation57_spill] sm:$0xff] }
 0x327   : > { %4785 = vmatpush1.bf16.msra.mxu0 %v11802_v21  ;;  %v11850_v21 = vld [vmem:[#allocation58_spill] sm:$0xff] }
 0x328   : > { %4828 = vmatpush1.bf16.msra.mxu1 %v11803_v26  ;;  %4786 = vmatprep.subr.bf16.mxu0 %v11804_v27  ;;  %v11851_v26 = vld [vmem:[#allocation59_spill] sm:$0xff]  ;;  %v11852_v27 = vld [vmem:[#allocation60_spill] sm:$0xff] }
 0x329   : > { %4829 = vmatprep.subr.bf16.mxu1 %v11805_v28  ;;  %v11853_v28 = vld [vmem:[#allocation61_spill] sm:$0xff] }
 0x32b   : > { %4787 = vmatpush1.bf16.msra.mxu0 %v11806_v29  ;;  %v11854_v29 = vld [vmem:[#allocation62_spill] sm:$0xff] }
 0x32c   : > { %4830 = vmatpush1.bf16.msra.mxu1 %v11807_v36  ;;  %4788 = vmatprep.subr.bf16.mxu0 %v11808_v37  ;;  %v11857_v36 = vld [vmem:[#allocation65_spill] sm:$0xff]  ;;  %v11858_v37 = vld [vmem:[#allocation66_spill] sm:$0xff] }
 0x32d   : > { %4831 = vmatprep.subr.bf16.mxu1 %v11809_v42  ;;  %v11859_v42 = vld [vmem:[#allocation67_spill] sm:$0xff] }
 0x32f   : > { %4789 = vmatpush1.bf16.msra.mxu0 %v11810_v44  ;;  %v11860_v44 = vld [vmem:[#allocation68_spill] sm:$0xff] }
 0x330   : > { %4832 = vmatpush1.bf16.msra.mxu1 %v11811_v45  ;;  %4790 = vmatprep.subr.bf16.mxu0 %v11812_v50  ;;  %v11861_v45 = vld [vmem:[#allocation69_spill] sm:$0xff]  ;;  %v11862_v50 = vld [vmem:[#allocation70_spill] sm:$0xff] }
 0x331   : > { %4833 = vmatprep.subr.bf16.mxu1 %v11813_v52  ;;  %v11864_v52 = vld [vmem:[#allocation72_spill] sm:$0xff] }
 0x333   : > { %4791 = vmatpush1.bf16.msra.mxu0 %v11814_v55  ;;  %v11865_v55 = vld [vmem:[#allocation73_spill] sm:$0xff] }
 0x334   : > { %4834 = vmatpush1.bf16.msra.mxu1 %v11815_v1  ;;  %4792 = vmatprep.subr.bf16.mxu0 %v11816_v7  ;;  %v11866_v1 = vld [vmem:[#allocation74_spill] sm:$0xff]  ;;  %v11867_v7 = vld [vmem:[#allocation75_spill] sm:$0xff] }
 0x335   : > { %4835 = vmatprep.subr.bf16.mxu1 %v11817_v22  ;;  %v11868_v22 = vld [vmem:[#allocation76_spill] sm:$0xff] }
 0x337   : > { %4793 = vmatpush1.bf16.msra.mxu0 %v11818_v23  ;;  %v11869_v23 = vld [vmem:[#allocation77_spill] sm:$0xff] }
 0x338   : > { %4836 = vmatpush1.bf16.msra.mxu1 %v11819_v41  ;;  %4794 = vmatprep.subr.bf16.mxu0 %v11820_v33  ;;  %v11871_v41 = vld [vmem:[#allocation79_spill] sm:$0xff]  ;;  %v11872_v33 = vld [vmem:[#allocation80_spill] sm:$0xff] }
 0x339   : > { %4837 = vmatprep.subr.bf16.mxu1 %v11821_v12  ;;  %v11873_v12 = vld [vmem:[#allocation81_spill] sm:$0xff] }
 0x33b   : > { %4795 = vmatpush1.bf16.msra.mxu0 %v11822_v25  ;;  %v11874_v25 = vld [vmem:[#allocation82_spill] sm:$0xff] }
 0x33c   : > { %4838 = vmatpush1.bf16.msra.mxu1 %v11823_v62  ;;  %4796 = vmatprep.subr.bf16.mxu0 %v11824_v57  ;;  %v11877_v62 = vld [vmem:[#allocation85_spill] sm:$0xff]  ;;  %v11878_v57 = vld [vmem:[#allocation86_spill] sm:$0xff] }
 0x33d   : > { %4839 = vmatprep.subr.bf16.mxu1 %v11825_v53  ;;  %v11879_v53 = vld [vmem:[#allocation87_spill] sm:$0xff] }
 0x33f   : > { %4797 = vmatpush1.bf16.msra.mxu0 %v11826_v58  ;;  %v11880_v58 = vld [vmem:[#allocation88_spill] sm:$0xff] }
 0x340   : > { %4840 = vmatpush1.bf16.msra.mxu1 %v11827_v8  ;;  %4852 = vmatprep.subr.bf16.mxu0 %v11828_v11  ;;  %v11881_v8 = vld [vmem:[#allocation89_spill] sm:$0xff]  ;;  %v11882_v11 = vld [vmem:[#allocation90_spill] sm:$0xff] }
 0x341   : > { %4895 = vmatprep.subr.bf16.mxu1 %v11829_v54  ;;  %v11883_v54 = vld [vmem:[#allocation91_spill] sm:$0xff] }
 0x342   : > { %4799 = vmatmul.mubr.bf16.vlgmr.msra.gmra.mrb[12].mxu0 %v10187_v3 }
 0x343   : > { %4842 = vmatmul.mubr.bf16.vlgmr.msra.gmra.mrb[12].mxu1 %v10187_v3  ;;  %4853 = vmatpush1.bf16.msra.mxu0 %v11830_v15  ;;  %v11884_v15 = vld [vmem:[#allocation92_spill] sm:$0xff] }
 0x344   : > { %4896 = vmatpush1.bf16.msra.mxu1 %v11831_v4  ;;  %4854 = vmatprep.subr.bf16.mxu0 %v11832_v48  ;;  %v11885_v4 = vld [vmem:[#allocation93_spill] sm:$0xff]  ;;  %v11886_v48 = vld [vmem:[#allocation94_spill] sm:$0xff] }
 0x345   : > { %4897 = vmatprep.subr.bf16.mxu1 %v11833_v49  ;;  %4884 = vmatprep.mubr.bf16.mxu0 %v10105_v46  ;;  %v11887_v49 = vld [vmem:[#allocation95_spill] sm:$0xff] }
 0x346   : > { %4927 = vmatprep.mubr.bf16.mxu1 %v10105_v46  ;;  %v11844_v46 = vld [vmem:[#allocation52_spill] sm:$0xff] }
 0x347   : > { %4855 = vmatpush1.bf16.msra.mxu0 %v11834_v2  ;;  %v11888_v2 = vld [vmem:[#allocation96_spill] sm:$0xff] }
 0x348   : > { %4898 = vmatpush1.bf16.msra.mxu1 %v11835_v38  ;;  %4856 = vmatprep.subr.bf16.mxu0 %v11836_v17  ;;  %v11889_v38 = vld [vmem:[#allocation97_spill] sm:$0xff]  ;;  %v11890_v17 = vld [vmem:[#allocation98_spill] sm:$0xff] }
 0x349   : > { %4899 = vmatprep.subr.bf16.mxu1 %v11837_v13  ;;  %v11891_v13 = vld [vmem:[#allocation99_spill] sm:$0xff] }
 0x34b   : > { %4857 = vmatpush1.bf16.msra.mxu0 %v11838_v59  ;;  %v11892_v59 = vld [vmem:[#allocation100_spill] sm:$0xff] }
 0x34c   : > { %4900 = vmatpush1.bf16.msra.mxu1 %v11839_v60  ;;  %4858 = vmatprep.subr.bf16.mxu0 %v11840_v16  ;;  %v11893_v60 = vld [vmem:[#allocation101_spill] sm:$0xff]  ;;  %v11894_v16 = vld [vmem:[#allocation102_spill] sm:$0xff] }
 0x34d   : > { %4901 = vmatprep.subr.bf16.mxu1 %v11841_v47  ;;  %v11895_v47 = vld [vmem:[#allocation103_spill] sm:$0xff] }
 0x34f   : > { %4859 = vmatpush1.bf16.msra.mxu0 %v11842_v5  ;;  %v11896_v5 = vld [vmem:[#allocation104_spill] sm:$0xff] }
 0x350   : > { %4902 = vmatpush1.bf16.msra.mxu1 %v11843_v9  ;;  %4860 = vmatprep.subr.bf16.mxu0 %v11844_v46  ;;  %v11897_v9 = vld [vmem:[#allocation105_spill] sm:$0xff]  ;;  %v11898_v46 = vld [vmem:[#allocation106_spill] sm:$0xff] }
 0x351   : > { %4903 = vmatprep.subr.bf16.mxu1 %v11845_v10  ;;  %v11899_v10 = vld [vmem:[#allocation107_spill] sm:$0xff] }
 0x353   : > { %4861 = vmatpush1.bf16.msra.mxu0 %v11846_v14  ;;  %v11900_v14 = vld [vmem:[#allocation108_spill] sm:$0xff] }
 0x354   : > { %4904 = vmatpush1.bf16.msra.mxu1 %v11847_v18  ;;  %4862 = vmatprep.subr.bf16.mxu0 %v11848_v19  ;;  %v11901_v18 = vld [vmem:[#allocation109_spill] sm:$0xff]  ;;  %v11903_v19 = vld [vmem:[#allocation111_spill] sm:$0xff] }
 0x355   : > { %4905 = vmatprep.subr.bf16.mxu1 %v11849_v20  ;;  %v11904_v20 = vld [vmem:[#allocation112_spill] sm:$0xff] }
 0x357   : > { %4863 = vmatpush1.bf16.msra.mxu0 %v11850_v21  ;;  %v11905_v21 = vld [vmem:[#allocation113_spill] sm:$0xff] }
 0x358   : > { %4906 = vmatpush1.bf16.msra.mxu1 %v11851_v26  ;;  %4864 = vmatprep.subr.bf16.mxu0 %v11852_v27  ;;  %v11906_v26 = vld [vmem:[#allocation114_spill] sm:$0xff]  ;;  %v11907_v27 = vld [vmem:[#allocation115_spill] sm:$0xff] }
 0x359   : > { %4907 = vmatprep.subr.bf16.mxu1 %v11853_v28  ;;  %v11908_v28 = vld [vmem:[#allocation116_spill] sm:$0xff] }
 0x35b   : > { %4865 = vmatpush1.bf16.msra.mxu0 %v11854_v29  ;;  %v11909_v29 = vld [vmem:[#allocation117_spill] sm:$0xff] }
 0x35c   : > { %4908 = vmatpush1.bf16.msra.mxu1 %v11855_v34  ;;  %4866 = vmatprep.subr.bf16.mxu0 %v11856_v35  ;;  %v11910_v34 = vld [vmem:[#allocation118_spill] sm:$0xff]  ;;  %v11911_v35 = vld [vmem:[#allocation119_spill] sm:$0xff] }
 0x35d   : > { %4909 = vmatprep.subr.bf16.mxu1 %v11857_v36  ;;  %v11912_v36 = vld [vmem:[#allocation120_spill] sm:$0xff] }
 0x35f   : > { %4867 = vmatpush1.bf16.msra.mxu0 %v11858_v37  ;;  %v11913_v37 = vld [vmem:[#allocation121_spill] sm:$0xff] }
 0x360   : > { %4910 = vmatpush1.bf16.msra.mxu1 %v11859_v42  ;;  %4868 = vmatprep.subr.bf16.mxu0 %v11860_v44  ;;  %v11914_v42 = vld [vmem:[#allocation122_spill] sm:$0xff]  ;;  %v11915_v44 = vld [vmem:[#allocation123_spill] sm:$0xff] }
 0x361   : > { %4911 = vmatprep.subr.bf16.mxu1 %v11861_v45  ;;  %v11916_v45 = vld [vmem:[#allocation124_spill] sm:$0xff] }
 0x363   : > { %4869 = vmatpush1.bf16.msra.mxu0 %v11862_v50  ;;  %v11917_v50 = vld [vmem:[#allocation125_spill] sm:$0xff] }
 0x364   : > { %4912 = vmatpush1.bf16.msra.mxu1 %v11863_v51  ;;  %4870 = vmatprep.subr.bf16.mxu0 %v11864_v52  ;;  %v11918_v51 = vld [vmem:[#allocation126_spill] sm:$0xff]  ;;  %v11919_v52 = vld [vmem:[#allocation127_spill] sm:$0xff] }
 0x365   : > { %4913 = vmatprep.subr.bf16.mxu1 %v11865_v55  ;;  %v11920_v55 = vld [vmem:[#allocation128_spill] sm:$0xff] }
 0x367   : > { %4871 = vmatpush1.bf16.msra.mxu0 %v11866_v1  ;;  %v11921_v1 = vld [vmem:[#allocation129_spill] sm:$0xff] }
 0x368   : > { %4914 = vmatpush1.bf16.msra.mxu1 %v11867_v7  ;;  %4872 = vmatprep.subr.bf16.mxu0 %v11868_v22  ;;  %v11922_v7 = vld [vmem:[#allocation130_spill] sm:$0xff]  ;;  %v11923_v22 = vld [vmem:[#allocation131_spill] sm:$0xff] }
 0x369   : > { %4915 = vmatprep.subr.bf16.mxu1 %v11869_v23  ;;  %v11924_v23 = vld [vmem:[#allocation132_spill] sm:$0xff] }
 0x36b   : > { %4873 = vmatpush1.bf16.msra.mxu0 %v11870_v30  ;;  %v11925_v30 = vld [vmem:[#allocation133_spill] sm:$0xff] }
 0x36c   : > { %4916 = vmatpush1.bf16.msra.mxu1 %v11871_v41  ;;  %4874 = vmatprep.subr.bf16.mxu0 %v11872_v33  ;;  %v11926_v41 = vld [vmem:[#allocation134_spill] sm:$0xff]  ;;  %v11927_v33 = vld [vmem:[#allocation135_spill] sm:$0xff] }
 0x36d   : > { %4917 = vmatprep.subr.bf16.mxu1 %v11873_v12  ;;  %v11928_v12 = vld [vmem:[#allocation136_spill] sm:$0xff] }
 0x36f   : > { %4875 = vmatpush1.bf16.msra.mxu0 %v11874_v25  ;;  %v11929_v25 = vld [vmem:[#allocation137_spill] sm:$0xff] }
 0x370   : > { %4918 = vmatpush1.bf16.msra.mxu1 %v11875_v39  ;;  %4876 = vmatprep.subr.bf16.mxu0 %v11876_v6  ;;  %v11930_v39 = vld [vmem:[#allocation138_spill] sm:$0xff]  ;;  %v11931_v6 = vld [vmem:[#allocation139_spill] sm:$0xff] }
 0x371   : > { %4919 = vmatprep.subr.bf16.mxu1 %v11877_v62  ;;  %v11932_v62 = vld [vmem:[#allocation140_spill] sm:$0xff] }
 0x373   : > { %4877 = vmatpush1.bf16.msra.mxu0 %v11878_v57  ;;  %v11933_v57 = vld [vmem:[#allocation141_spill] sm:$0xff] }
 0x374   : > { %4920 = vmatpush1.bf16.msra.mxu1 %v11879_v53  ;;  %4878 = vmatprep.subr.bf16.mxu0 %v11880_v58  ;;  %v11934_v53 = vld [vmem:[#allocation142_spill] sm:$0xff]  ;;  %v11935_v58 = vld [vmem:[#allocation143_spill] sm:$0xff] }
 0x375   : > { %4921 = vmatprep.subr.bf16.mxu1 %v11881_v8  ;;  %v11936_v8 = vld [vmem:[#allocation144_spill] sm:$0xff] }
 0x377   : > { %4879 = vmatpush1.bf16.msra.mxu0 %v11882_v11  ;;  %v11937_v11 = vld [vmem:[#allocation145_spill] sm:$0xff] }
 0x378   : > { %4922 = vmatpush1.bf16.msra.mxu1 %v11883_v54  ;;  %4880 = vmatprep.subr.bf16.mxu0 %v11884_v15  ;;  %v11938_v54 = vld [vmem:[#allocation146_spill] sm:$0xff]  ;;  %v11939_v15 = vld [vmem:[#allocation147_spill] sm:$0xff] }
 0x379   : > { %4923 = vmatprep.subr.bf16.mxu1 %v11885_v4  ;;  %v11940_v4 = vld [vmem:[#allocation148_spill] sm:$0xff] }
 0x37b   : > { %4881 = vmatpush1.bf16.msra.mxu0 %v11886_v48  ;;  %v11941_v48 = vld [vmem:[#allocation149_spill] sm:$0xff] }
 0x37c   : > { %4924 = vmatpush1.bf16.msra.mxu1 %v11887_v49  ;;  %4882 = vmatprep.subr.bf16.mxu0 %v11888_v2  ;;  %v11942_v49 = vld [vmem:[#allocation150_spill] sm:$0xff]  ;;  %v11943_v2 = vld [vmem:[#allocation151_spill] sm:$0xff] }
 0x37d   : > { %4925 = vmatprep.subr.bf16.mxu1 %v11889_v38  ;;  %v11944_v38 = vld [vmem:[#allocation152_spill] sm:$0xff] }
 0x37f   : > { %4883 = vmatpush1.bf16.msra.mxu0 %v11890_v17  ;;  %v11945_v17 = vld [vmem:[#allocation153_spill] sm:$0xff] }
 0x380   : > { %4926 = vmatpush1.bf16.msra.mxu1 %v11891_v13  ;;  %4938 = vmatprep.subr.bf16.mxu0 %v11892_v59  ;;  %v11946_v13 = vld [vmem:[#allocation154_spill] sm:$0xff]  ;;  %v11947_v59 = vld [vmem:[#allocation155_spill] sm:$0xff] }
 0x381   : > { %4981 = vmatprep.subr.bf16.mxu1 %v11893_v60  ;;  %v11948_v60 = vld [vmem:[#allocation156_spill] sm:$0xff] }
 0x382   : > { %4885 = vmatmul.mubr.bf16.vlgmr.msra.gmra.mrb[16].mxu0 %v10187_v3 }
 0x383   : > { %4928 = vmatmul.mubr.bf16.vlgmr.msra.gmra.mrb[16].mxu1 %v10187_v3  ;;  %4939 = vmatpush1.bf16.msra.mxu0 %v11894_v16  ;;  %v11902_v3 = vld [vmem:[#allocation110_spill] sm:$0xff]  ;;  %v11949_v16 = vld [vmem:[#allocation157_spill] sm:$0xff] }
 0x384   : > { %4982 = vmatpush1.bf16.msra.mxu1 %v11895_v47  ;;  %4940 = vmatprep.subr.bf16.mxu0 %v11896_v5  ;;  %v11950_v47 = vld [vmem:[#allocation158_spill] sm:$0xff]  ;;  %v11951_v5 = vld [vmem:[#allocation159_spill] sm:$0xff] }
 0x385   : > { %4983 = vmatprep.subr.bf16.mxu1 %v11897_v9  ;;  %4970 = vmatprep.mubr.bf16.mxu0 %v10090_v31  ;;  %v11952_v9 = vld [vmem:[#allocation160_spill] sm:$0xff] }
 0x386   : > { %5013 = vmatprep.mubr.bf16.mxu1 %v10090_v31 }
 0x387   : > { %4941 = vmatpush1.bf16.msra.mxu0 %v11898_v46  ;;  %v11953_v46 = vld [vmem:[#allocation161_spill] sm:$0xff] }
 0x388   : > { %4984 = vmatpush1.bf16.msra.mxu1 %v11899_v10  ;;  %4942 = vmatprep.subr.bf16.mxu0 %v11900_v14  ;;  %v11954_v10 = vld [vmem:[#allocation162_spill] sm:$0xff]  ;;  %v11955_v14 = vld [vmem:[#allocation163_spill] sm:$0xff] }
 0x389   : > { %4985 = vmatprep.subr.bf16.mxu1 %v11901_v18  ;;  %v11956_v18 = vld [vmem:[#allocation164_spill] sm:$0xff] }
 0x38b   : > { %4943 = vmatpush1.bf16.msra.mxu0 %v11902_v3  ;;  %v11957_v3 = vld [vmem:[#allocation165_spill] sm:$0xff] }
 0x38c   : > { %4986 = vmatpush1.bf16.msra.mxu1 %v11903_v19  ;;  %4944 = vmatprep.subr.bf16.mxu0 %v11904_v20  ;;  %v11958_v19 = vld [vmem:[#allocation166_spill] sm:$0xff]  ;;  %v11959_v20 = vld [vmem:[#allocation167_spill] sm:$0xff] }
 0x38d   : > { %4987 = vmatprep.subr.bf16.mxu1 %v11905_v21  ;;  %v11960_v21 = vld [vmem:[#allocation168_spill] sm:$0xff] }
 0x38f   : > { %4945 = vmatpush1.bf16.msra.mxu0 %v11906_v26  ;;  %v11961_v26 = vld [vmem:[#allocation169_spill] sm:$0xff] }
 0x390   : > { %4988 = vmatpush1.bf16.msra.mxu1 %v11907_v27  ;;  %4946 = vmatprep.subr.bf16.mxu0 %v11908_v28  ;;  %v11962_v27 = vld [vmem:[#allocation170_spill] sm:$0xff]  ;;  %v11963_v28 = vld [vmem:[#allocation171_spill] sm:$0xff] }
 0x391   : > { %4989 = vmatprep.subr.bf16.mxu1 %v11909_v29  ;;  %v11964_v29 = vld [vmem:[#allocation172_spill] sm:$0xff] }
 0x393   : > { %4947 = vmatpush1.bf16.msra.mxu0 %v11910_v34  ;;  %v11965_v34 = vld [vmem:[#allocation173_spill] sm:$0xff] }
 0x394   : > { %4990 = vmatpush1.bf16.msra.mxu1 %v11911_v35  ;;  %4948 = vmatprep.subr.bf16.mxu0 %v11912_v36  ;;  %v11966_v35 = vld [vmem:[#allocation174_spill] sm:$0xff]  ;;  %v11967_v36 = vld [vmem:[#allocation175_spill] sm:$0xff] }
 0x395   : > { %4991 = vmatprep.subr.bf16.mxu1 %v11913_v37  ;;  %v11968_v37 = vld [vmem:[#allocation176_spill] sm:$0xff] }
 0x397   : > { %4949 = vmatpush1.bf16.msra.mxu0 %v11914_v42  ;;  %v11969_v42 = vld [vmem:[#allocation177_spill] sm:$0xff] }
 0x398   : > { %4992 = vmatpush1.bf16.msra.mxu1 %v11915_v44  ;;  %4950 = vmatprep.subr.bf16.mxu0 %v11916_v45  ;;  %v11970_v44 = vld [vmem:[#allocation178_spill] sm:$0xff]  ;;  %v11971_v45 = vld [vmem:[#allocation179_spill] sm:$0xff] }
 0x399   : > { %4993 = vmatprep.subr.bf16.mxu1 %v11917_v50  ;;  %v11972_v50 = vld [vmem:[#allocation180_spill] sm:$0xff] }
 0x39b   : > { %4951 = vmatpush1.bf16.msra.mxu0 %v11918_v51  ;;  %v11973_v51 = vld [vmem:[#allocation181_spill] sm:$0xff] }
 0x39c   : > { %4994 = vmatpush1.bf16.msra.mxu1 %v11919_v52  ;;  %4952 = vmatprep.subr.bf16.mxu0 %v11920_v55  ;;  %v11974_v52 = vld [vmem:[#allocation182_spill] sm:$0xff]  ;;  %v11975_v55 = vld [vmem:[#allocation183_spill] sm:$0xff] }
 0x39d   : > { %4995 = vmatprep.subr.bf16.mxu1 %v11921_v1  ;;  %v11976_v1 = vld [vmem:[#allocation184_spill] sm:$0xff] }
 0x39f   : > { %4953 = vmatpush1.bf16.msra.mxu0 %v11922_v7 }
 0x3a0   : > { %4996 = vmatpush1.bf16.msra.mxu1 %v11923_v22  ;;  %4954 = vmatprep.subr.bf16.mxu0 %v11924_v23  ;;  %v11977_v22 = vld [vmem:[#allocation185_spill] sm:$0xff] }
 0x3a1   : > { %4997 = vmatprep.subr.bf16.mxu1 %v11925_v30 }
 0x3a3   : > { %4955 = vmatpush1.bf16.msra.mxu0 %v11926_v41 }
 0x3a4   : > { %4998 = vmatpush1.bf16.msra.mxu1 %v11927_v33  ;;  %4956 = vmatprep.subr.bf16.mxu0 %v11928_v12  ;;  %v11978_v12 = vld [vmem:[#allocation186_spill] sm:$0xff] }
 0x3a5   : > { %4999 = vmatprep.subr.bf16.mxu1 %v11929_v25 }
 0x3a7   : > { %4957 = vmatpush1.bf16.msra.mxu0 %v11930_v39 }
 0x3a8   : > { %5000 = vmatpush1.bf16.msra.mxu1 %v11931_v6  ;;  %4958 = vmatprep.subr.bf16.mxu0 %v11932_v62  ;;  %v11979_v6 = vld [vmem:[#allocation187_spill] sm:$0xff] }
 0x3a9   : > { %5001 = vmatprep.subr.bf16.mxu1 %v11933_v57 }
 0x3ab   : > { %4959 = vmatpush1.bf16.msra.mxu0 %v11934_v53  ;;  %v11980_v53 = vld [vmem:[#allocation188_spill] sm:$0xff] }
 0x3ac   : > { %5002 = vmatpush1.bf16.msra.mxu1 %v11935_v58  ;;  %4960 = vmatprep.subr.bf16.mxu0 %v11936_v8 }
 0x3ad   : > { %5003 = vmatprep.subr.bf16.mxu1 %v11937_v11  ;;  %v11981_v11 = vld [vmem:[#allocation189_spill] sm:$0xff] }
 0x3af   : > { %4961 = vmatpush1.bf16.msra.mxu0 %v11938_v54 }
 0x3b0   : > { %5004 = vmatpush1.bf16.msra.mxu1 %v11939_v15  ;;  %4962 = vmatprep.subr.bf16.mxu0 %v11940_v4  ;;  %v11982_v4 = vld [vmem:[#allocation190_spill] sm:$0xff] }
 0x3b1   : > { %5005 = vmatprep.subr.bf16.mxu1 %v11941_v48 }
 0x3b3   : > { %4963 = vmatpush1.bf16.msra.mxu0 %v11942_v49  ;;  %v11983_v49 = vld [vmem:[#allocation191_spill] sm:$0xff] }
 0x3b4   : > { %5006 = vmatpush1.bf16.msra.mxu1 %v11943_v2  ;;  %4964 = vmatprep.subr.bf16.mxu0 %v11944_v38  ;;  %v11984_v2 = vld [vmem:[#allocation192_spill] sm:$0xff]  ;;  %v11985_v38 = vld [vmem:[#allocation193_spill] sm:$0xff] }
 0x3b5   : > { %5007 = vmatprep.subr.bf16.mxu1 %v11945_v17  ;;  %v11986_v17 = vld [vmem:[#allocation194_spill] sm:$0xff] }
 0x3b7   : > { %4965 = vmatpush1.bf16.msra.mxu0 %v11946_v13  ;;  %v11987_v13 = vld [vmem:[#allocation195_spill] sm:$0xff] }
 0x3b8   : > { %5008 = vmatpush1.bf16.msra.mxu1 %v11947_v59  ;;  %4966 = vmatprep.subr.bf16.mxu0 %v11948_v60  ;;  %v11988_v59 = vld [vmem:[#allocation196_spill] sm:$0xff]  ;;  %v11989_v60 = vld [vmem:[#allocation197_spill] sm:$0xff] }
 0x3b9   : > { %5009 = vmatprep.subr.bf16.mxu1 %v11949_v16  ;;  %v11990_v16 = vld [vmem:[#allocation198_spill] sm:$0xff] }
 0x3bb   : > { %4967 = vmatpush1.bf16.msra.mxu0 %v11950_v47  ;;  %v11991_v47 = vld [vmem:[#allocation199_spill] sm:$0xff] }
 0x3bc   : > { %5010 = vmatpush1.bf16.msra.mxu1 %v11951_v5  ;;  %4968 = vmatprep.subr.bf16.mxu0 %v11952_v9  ;;  %v11992_v5 = vld [vmem:[#allocation200_spill] sm:$0xff]  ;;  %v11993_v9 = vld [vmem:[#allocation201_spill] sm:$0xff] }
 0x3bd   : > { %5011 = vmatprep.subr.bf16.mxu1 %v11953_v46  ;;  %v11994_v46 = vld [vmem:[#allocation202_spill] sm:$0xff] }
 0x3bf   : > { %4969 = vmatpush1.bf16.msra.mxu0 %v11954_v10  ;;  %v11995_v10 = vld [vmem:[#allocation203_spill] sm:$0xff] }
 0x3c0   : > { %5012 = vmatpush1.bf16.msra.mxu1 %v11955_v14  ;;  %5024 = vmatprep.subr.bf16.mxu0 %v11956_v18  ;;  %v11996_v14 = vld [vmem:[#allocation204_spill] sm:$0xff]  ;;  %v11997_v18 = vld [vmem:[#allocation205_spill] sm:$0xff] }
 0x3c1   : > { %5067 = vmatprep.subr.bf16.mxu1 %v11957_v3  ;;  %v11998_v3 = vld [vmem:[#allocation206_spill] sm:$0xff] }
 0x3c2   : > { %4971 = vmatmul.mubr.bf16.vlgmr.msra.gmra.mrb[12].mxu0 %v10155_v43 }
 0x3c3   : > { %5014 = vmatmul.mubr.bf16.vlgmr.msra.gmra.mrb[12].mxu1 %v10155_v43  ;;  %5025 = vmatpush1.bf16.msra.mxu0 %v11958_v19  ;;  %v11999_v19 = vld [vmem:[#allocation207_spill] sm:$0xff] }
 0x3c4   : > { %5068 = vmatpush1.bf16.msra.mxu1 %v11959_v20  ;;  %5026 = vmatprep.subr.bf16.mxu0 %v11960_v21  ;;  %v12000_v20 = vld [vmem:[#allocation208_spill] sm:$0xff]  ;;  %v12001_v21 = vld [vmem:[#allocation209_spill] sm:$0xff] }
 0x3c5   : > { %5069 = vmatprep.subr.bf16.mxu1 %v11961_v26  ;;  %5056 = vmatprep.mubr.bf16.mxu0 %v10090_v31  ;;  %v12002_v26 = vld [vmem:[#allocation210_spill] sm:$0xff] }
 0x3c6   : > { %5099 = vmatprep.mubr.bf16.mxu1 %v10090_v31 }
 0x3c7   : > { %5027 = vmatpush1.bf16.msra.mxu0 %v11962_v27  ;;  %v12003_v27 = vld [vmem:[#allocation211_spill] sm:$0xff] }
 0x3c8   : > { %5070 = vmatpush1.bf16.msra.mxu1 %v11963_v28  ;;  %5028 = vmatprep.subr.bf16.mxu0 %v11964_v29  ;;  %v12004_v28 = vld [vmem:[#allocation212_spill] sm:$0xff]  ;;  %v12005_v29 = vld [vmem:[#allocation213_spill] sm:$0xff] }
 0x3c9   : > { %5071 = vmatprep.subr.bf16.mxu1 %v11965_v34  ;;  %v12006_v34 = vld [vmem:[#allocation214_spill] sm:$0xff] }
 0x3cb   : > { %5029 = vmatpush1.bf16.msra.mxu0 %v11966_v35  ;;  %v12007_v35 = vld [vmem:[#allocation215_spill] sm:$0xff] }
 0x3cc   : > { %5072 = vmatpush1.bf16.msra.mxu1 %v11967_v36  ;;  %5030 = vmatprep.subr.bf16.mxu0 %v11968_v37  ;;  %v12008_v36 = vld [vmem:[#allocation216_spill] sm:$0xff]  ;;  %v12009_v37 = vld [vmem:[#allocation217_spill] sm:$0xff] }
 0x3cd   : > { %5073 = vmatprep.subr.bf16.mxu1 %v11969_v42  ;;  %v12010_v42 = vld [vmem:[#allocation218_spill] sm:$0xff] }
 0x3cf   : > { %5031 = vmatpush1.bf16.msra.mxu0 %v11970_v44  ;;  %v12011_v44 = vld [vmem:[#allocation219_spill] sm:$0xff] }
 0x3d0   : > { %5074 = vmatpush1.bf16.msra.mxu1 %v11971_v45  ;;  %5032 = vmatprep.subr.bf16.mxu0 %v11972_v50  ;;  %v12012_v45 = vld [vmem:[#allocation220_spill] sm:$0xff]  ;;  %v12013_v50 = vld [vmem:[#allocation221_spill] sm:$0xff] }
 0x3d1   : > { %5075 = vmatprep.subr.bf16.mxu1 %v11973_v51  ;;  %v12014_v51 = vld [vmem:[#allocation222_spill] sm:$0xff] }
 0x3d3   : > { %5033 = vmatpush1.bf16.msra.mxu0 %v11974_v52  ;;  %v12015_v52 = vld [vmem:[#allocation223_spill] sm:$0xff] }
 0x3d4   : > { %5076 = vmatpush1.bf16.msra.mxu1 %v11975_v55  ;;  %5034 = vmatprep.subr.bf16.mxu0 %v11976_v1  ;;  %v12016_v55 = vld [vmem:[#allocation224_spill] sm:$0xff]  ;;  %v12017_v1 = vld [vmem:[#allocation225_spill] sm:$0xff] }
 0x3d5   : > { %v6404_v7 = vpop.f32.mrb[8].mxu0  ;;  %5077 = vmatprep.subr.bf16.mxu1 %v11977_v22  ;;  %v5118_v22 = vrot.slane %v10094_v56, 1 }
 0x3d6   : > { %v6426_v23 = vpop.f32.mrb[8].mxu1  ;;  %v6405_v30 = vpop.f32.mrb[9].mxu0 }
 0x3d7   : > { %v6406_v41 = vadd.f32 %v6405_v30, %v6404_v7  ;;  %v6427_v33 = vpop.f32.mrb[9].mxu1  ;;  %5035 = vmatpush1.bf16.msra.mxu0 %v11978_v12  ;;  %v6407_v25 = vpop.f32.mrb[10].mxu0  ;;  %v5117_v7 = vrot.slane %v10090_v31, 1  ;;  %v12019_v30 = vld [vmem:[#allocation227_spill] sm:$0xff] }
 0x3d8   : > { %v6428_v39 = vadd.f32 %v6427_v33, %v6426_v23  ;;  %5078 = vmatpush1.bf16.msra.mxu1 %v11979_v6  ;;  %v6429_v62 = vpop.f32.mrb[10].mxu1  ;;  %v6408_v57 = vpop.f32.mrb[11].mxu0  ;;  %5036 = vmatprep.subr.bf16.mxu0 %v11980_v53  ;;  %v12018_v23 = vld [vmem:[#allocation226_spill] sm:$0xff]  ;;  %v12021_v33 = vld [vmem:[#allocation229_spill] sm:$0xff]  ;;  %v12024_v6 = vld [vmem:[#allocation232_spill] sm:$0xff] }
 0x3d9   : > { %v6409_v58 = vadd.f32 %v6408_v57, %v6407_v25  ;;  %v6430_v8 = vpop.f32.mrb[11].mxu1  ;;  %5079 = vmatprep.subr.bf16.mxu1 %v11981_v11  ;;  %v10404_v12 = vsel %vm2520_vm1, %v5117_v7, %v5118_v22  ;;  %v12022_v25 = vld [vmem:[#allocation230_spill] sm:$0xff]  ;;  %v12027_v53 = vld [vmem:[#allocation235_spill] sm:$0xff]  ;;  %v12068_v7 = vld [vmem:[#allocation276_spill] sm:$0xff] }
 0x3da   : > { %v10356_v54 = vadd.f32 %v6428_v39, %v6406_v41  ;;  %v6431_v15 = vadd.f32 %v6430_v8, %v6429_v62  ;;  %v12020_v41 = vld [vmem:[#allocation228_spill] sm:$0xff]  ;;  %v12023_v39 = vld [vmem:[#allocation231_spill] sm:$0xff]  ;;  %v12025_v62 = vld [vmem:[#allocation233_spill] sm:$0xff] }
 0x3db   : > { %5037 = vmatpush1.bf16.msra.mxu0 %v11982_v4  ;;  %v12026_v57 = vld [vmem:[#allocation234_spill] sm:$0xff]  ;;  %v12029_v8 = vld [vmem:[#allocation237_spill] sm:$0xff]  ;;  %v12032_v4 = vld [vmem:[#allocation240_spill] sm:$0xff] }
 0x3dc   : > { %v10359_v48 = vadd.f32 %v6431_v15, %v6409_v58  ;;  %5080 = vmatpush1.bf16.msra.mxu1 %v11983_v49  ;;  %5038 = vmatprep.subr.bf16.mxu0 %v11984_v2  ;;  %v12028_v58 = vld [vmem:[#allocation236_spill] sm:$0xff]  ;;  %v12030_v11 = vld [vmem:[#allocation238_spill] sm:$0xff]  ;;  %v12031_v15 = vld [vmem:[#allocation239_spill] sm:$0xff] }
 0x3dd   : > { %5081 = vmatprep.subr.bf16.mxu1 %v11985_v38  ;;  %v12033_v49 = vld [vmem:[#allocation241_spill] sm:$0xff]  ;;  %v12034_v2 = vld [vmem:[#allocation242_spill] sm:$0xff]  ;;  %v12035_v38 = vld [vmem:[#allocation243_spill] sm:$0xff] }
 0x3de   : > { %v12069_v22 = vld [vmem:[#allocation277_spill] sm:$0xff] }
 0x3df   : > { %5039 = vmatpush1.bf16.msra.mxu0 %v11986_v17  ;;  %v12036_v17 = vld [vmem:[#allocation244_spill] sm:$0xff] }
 0x3e0   : > { %5082 = vmatpush1.bf16.msra.mxu1 %v11987_v13  ;;  %5040 = vmatprep.subr.bf16.mxu0 %v11988_v59  ;;  %v12037_v13 = vld [vmem:[#allocation245_spill] sm:$0xff]  ;;  %v12038_v59 = vld [vmem:[#allocation246_spill] sm:$0xff] }
 0x3e1   : > { %5083 = vmatprep.subr.bf16.mxu1 %v11989_v60  ;;  %v12039_v60 = vld [vmem:[#allocation247_spill] sm:$0xff] }
 0x3e3   : > { %5041 = vmatpush1.bf16.msra.mxu0 %v11990_v16  ;;  %v12040_v16 = vld [vmem:[#allocation248_spill] sm:$0xff] }
 0x3e4   : > { %5084 = vmatpush1.bf16.msra.mxu1 %v11991_v47  ;;  %5042 = vmatprep.subr.bf16.mxu0 %v11992_v5  ;;  %v12041_v47 = vld [vmem:[#allocation249_spill] sm:$0xff]  ;;  %v12042_v5 = vld [vmem:[#allocation250_spill] sm:$0xff] }
 0x3e5   : > { %5085 = vmatprep.subr.bf16.mxu1 %v11993_v9  ;;  %v12043_v9 = vld [vmem:[#allocation251_spill] sm:$0xff] }
 0x3e7   : > { %5043 = vmatpush1.bf16.msra.mxu0 %v11994_v46  ;;  %v12044_v46 = vld [vmem:[#allocation252_spill] sm:$0xff] }
 0x3e8   : > { %5086 = vmatpush1.bf16.msra.mxu1 %v11995_v10  ;;  %5044 = vmatprep.subr.bf16.mxu0 %v11996_v14  ;;  %v12045_v10 = vld [vmem:[#allocation253_spill] sm:$0xff]  ;;  %v12046_v14 = vld [vmem:[#allocation254_spill] sm:$0xff] }
 0x3e9   : > { %5087 = vmatprep.subr.bf16.mxu1 %v11997_v18  ;;  %v12047_v18 = vld [vmem:[#allocation255_spill] sm:$0xff] }
 0x3eb   : > { %5045 = vmatpush1.bf16.msra.mxu0 %v11998_v3  ;;  %v12048_v3 = vld [vmem:[#allocation256_spill] sm:$0xff] }
 0x3ec   : > { %5088 = vmatpush1.bf16.msra.mxu1 %v11999_v19  ;;  %5046 = vmatprep.subr.bf16.mxu0 %v12000_v20  ;;  %v12049_v19 = vld [vmem:[#allocation257_spill] sm:$0xff]  ;;  %v12050_v20 = vld [vmem:[#allocation258_spill] sm:$0xff] }
 0x3ed   : > { %5089 = vmatprep.subr.bf16.mxu1 %v12001_v21  ;;  %v12051_v21 = vld [vmem:[#allocation259_spill] sm:$0xff] }
 0x3ef   : > { %5047 = vmatpush1.bf16.msra.mxu0 %v12002_v26  ;;  %v12052_v26 = vld [vmem:[#allocation260_spill] sm:$0xff] }
 0x3f0   : > { %5090 = vmatpush1.bf16.msra.mxu1 %v12003_v27  ;;  %5048 = vmatprep.subr.bf16.mxu0 %v12004_v28  ;;  %v12053_v27 = vld [vmem:[#allocation261_spill] sm:$0xff]  ;;  %v12054_v28 = vld [vmem:[#allocation262_spill] sm:$0xff] }
 0x3f1   : > { %5091 = vmatprep.subr.bf16.mxu1 %v12005_v29  ;;  %v12055_v29 = vld [vmem:[#allocation263_spill] sm:$0xff] }
 0x3f3   : > { %5049 = vmatpush1.bf16.msra.mxu0 %v12006_v34  ;;  %v12056_v34 = vld [vmem:[#allocation264_spill] sm:$0xff] }
 0x3f4   : > { %5092 = vmatpush1.bf16.msra.mxu1 %v12007_v35  ;;  %5050 = vmatprep.subr.bf16.mxu0 %v12008_v36  ;;  %v12057_v35 = vld [vmem:[#allocation265_spill] sm:$0xff]  ;;  %v12058_v36 = vld [vmem:[#allocation266_spill] sm:$0xff] }
 0x3f5   : > { %5093 = vmatprep.subr.bf16.mxu1 %v12009_v37  ;;  %v12059_v37 = vld [vmem:[#allocation267_spill] sm:$0xff] }
 0x3f7   : > { %5051 = vmatpush1.bf16.msra.mxu0 %v12010_v42  ;;  %v12060_v42 = vld [vmem:[#allocation268_spill] sm:$0xff] }
 0x3f8   : > { %5094 = vmatpush1.bf16.msra.mxu1 %v12011_v44  ;;  %5052 = vmatprep.subr.bf16.mxu0 %v12012_v45  ;;  %v12061_v44 = vld [vmem:[#allocation269_spill] sm:$0xff]  ;;  %v12062_v45 = vld [vmem:[#allocation270_spill] sm:$0xff] }
 0x3f9   : > { %5095 = vmatprep.subr.bf16.mxu1 %v12013_v50  ;;  %v12063_v50 = vld [vmem:[#allocation271_spill] sm:$0xff] }
 0x3fb   : > { %5053 = vmatpush1.bf16.msra.mxu0 %v12014_v51  ;;  %v12064_v51 = vld [vmem:[#allocation272_spill] sm:$0xff] }
 0x3fc   : > { %5096 = vmatpush1.bf16.msra.mxu1 %v12015_v52  ;;  %5054 = vmatprep.subr.bf16.mxu0 %v12016_v55  ;;  %v12065_v52 = vld [vmem:[#allocation273_spill] sm:$0xff]  ;;  %v12066_v55 = vld [vmem:[#allocation274_spill] sm:$0xff] }
 0x3fd   : > { %5097 = vmatprep.subr.bf16.mxu1 %v12017_v1  ;;  %v12067_v1 = vld [vmem:[#allocation275_spill] sm:$0xff] }
 0x3ff   : > { %5055 = vmatpush1.bf16.msra.mxu0 %v12018_v23  ;;  %v12070_v23 = vld [vmem:[#allocation278_spill] sm:$0xff] }
 0x400   : > { %5098 = vmatpush1.bf16.msra.mxu1 %v12019_v30  ;;  %5122 = vmatprep.subr.bf16.mxu0 %v12020_v41  ;;  %v12071_v30 = vld [vmem:[#allocation279_spill] sm:$0xff]  ;;  %v12072_v41 = vld [vmem:[#allocation280_spill] sm:$0xff] }
 0x401   : > { %5165 = vmatprep.subr.bf16.mxu1 %v12021_v33  ;;  %v12073_v33 = vld [vmem:[#allocation281_spill] sm:$0xff] }
 0x402   : > { %5057 = vmatmul.mubr.bf16.vlgmr.msra.gmra.mrb[16].mxu0 %v10155_v43 }
 0x403   : > { %5100 = vmatmul.mubr.bf16.vlgmr.msra.gmra.mrb[16].mxu1 %v10155_v43  ;;  %5123 = vmatpush1.bf16.msra.mxu0 %v12022_v25  ;;  %v12074_v25 = vld [vmem:[#allocation282_spill] sm:$0xff] }
 0x404   : > { %5166 = vmatpush1.bf16.msra.mxu1 %v12023_v39  ;;  %5124 = vmatprep.subr.bf16.mxu0 %v12024_v6  ;;  %v12075_v39 = vld [vmem:[#allocation283_spill] sm:$0xff]  ;;  %v12076_v6 = vld [vmem:[#allocation284_spill] sm:$0xff] }
 0x405   : > { %5167 = vmatprep.subr.bf16.mxu1 %v12025_v62  ;;  %5154 = vmatprep.mubr.bf16.mxu0 %v10404_v12  ;;  %v12077_v62 = vld [vmem:[#allocation285_spill] sm:$0xff] }
 0x406   : > { %5197 = vmatprep.mubr.bf16.mxu1 %v10404_v12 }
 0x407   : > { %5125 = vmatpush1.bf16.msra.mxu0 %v12026_v57  ;;  %v12078_v57 = vld [vmem:[#allocation286_spill] sm:$0xff] }
 0x408   : > { %5168 = vmatpush1.bf16.msra.mxu1 %v12027_v53  ;;  %5126 = vmatprep.subr.bf16.mxu0 %v12028_v58  ;;  %v5114_v53 = vrot.slane %v10155_v43, 1  ;;  %v5115_v58 = vrot.slane %v10163_v63, 1  ;;  %v12210_v43 = vld [vmem:[#allocation417_spill] sm:$0xff] }
 0x409   : > { %5169 = vmatprep.subr.bf16.mxu1 %v12029_v8  ;;  %v12079_v8 = vld [vmem:[#allocation287_spill] sm:$0xff] }
 0x40b   : > { %5127 = vmatpush1.bf16.msra.mxu0 %v12030_v11  ;;  %v12080_v11 = vld [vmem:[#allocation288_spill] sm:$0xff] }
 0x40c   : > { %5170 = vmatpush1.bf16.msra.mxu1 %v12031_v15  ;;  %5128 = vmatprep.subr.bf16.mxu0 %v12032_v4  ;;  %v12081_v15 = vld [vmem:[#allocation289_spill] sm:$0xff]  ;;  %v12082_v4 = vld [vmem:[#allocation290_spill] sm:$0xff] }
 0x40d   : > { %5171 = vmatprep.subr.bf16.mxu1 %v12033_v49  ;;  %v10473_v49 = vsel %vm2520_vm1, %v5114_v53, %v5115_v58  ;;  %v12129_v53 = vld [vmem:[#allocation337_spill] sm:$0xff]  ;;  %v12130_v58 = vld [vmem:[#allocation338_spill] sm:$0xff] }
 0x40f   : > { %5129 = vmatpush1.bf16.msra.mxu0 %v12034_v2  ;;  %v12083_v2 = vld [vmem:[#allocation291_spill] sm:$0xff] }
 0x410   : > { %5172 = vmatpush1.bf16.msra.mxu1 %v12035_v38  ;;  %5130 = vmatprep.subr.bf16.mxu0 %v12036_v17  ;;  %v12084_v38 = vld [vmem:[#allocation292_spill] sm:$0xff]  ;;  %v12085_v17 = vld [vmem:[#allocation293_spill] sm:$0xff] }
 0x411   : > { %5173 = vmatprep.subr.bf16.mxu1 %v12037_v13  ;;  %v12086_v13 = vld [vmem:[#allocation294_spill] sm:$0xff] }
 0x413   : > { %5131 = vmatpush1.bf16.msra.mxu0 %v12038_v59  ;;  %v12087_v59 = vld [vmem:[#allocation295_spill] sm:$0xff] }
 0x414   : > { %5174 = vmatpush1.bf16.msra.mxu1 %v12039_v60  ;;  %5132 = vmatprep.subr.bf16.mxu0 %v12040_v16  ;;  %v12088_v60 = vld [vmem:[#allocation296_spill] sm:$0xff]  ;;  %v12089_v16 = vld [vmem:[#allocation297_spill] sm:$0xff] }
 0x415   : > { %5175 = vmatprep.subr.bf16.mxu1 %v12041_v47  ;;  %v12090_v47 = vld [vmem:[#allocation298_spill] sm:$0xff] }
 0x417   : > { %5133 = vmatpush1.bf16.msra.mxu0 %v12042_v5  ;;  %v12091_v5 = vld [vmem:[#allocation299_spill] sm:$0xff] }
 0x418   : > { %5176 = vmatpush1.bf16.msra.mxu1 %v12043_v9  ;;  %5134 = vmatprep.subr.bf16.mxu0 %v12044_v46  ;;  %v12092_v9 = vld [vmem:[#allocation300_spill] sm:$0xff]  ;;  %v12093_v46 = vld [vmem:[#allocation301_spill] sm:$0xff] }
 0x419   : > { %5177 = vmatprep.subr.bf16.mxu1 %v12045_v10  ;;  %v12094_v10 = vld [vmem:[#allocation302_spill] sm:$0xff] }
 0x41b   : > { %5135 = vmatpush1.bf16.msra.mxu0 %v12046_v14  ;;  %v12095_v14 = vld [vmem:[#allocation303_spill] sm:$0xff] }
 0x41c   : > { %5178 = vmatpush1.bf16.msra.mxu1 %v12047_v18  ;;  %5136 = vmatprep.subr.bf16.mxu0 %v12048_v3  ;;  %v12096_v18 = vld [vmem:[#allocation304_spill] sm:$0xff]  ;;  %v12097_v3 = vld [vmem:[#allocation305_spill] sm:$0xff] }
 0x41d   : > { %5179 = vmatprep.subr.bf16.mxu1 %v12049_v19  ;;  %v12098_v19 = vld [vmem:[#allocation306_spill] sm:$0xff] }
 0x41f   : > { %5137 = vmatpush1.bf16.msra.mxu0 %v12050_v20  ;;  %v12099_v20 = vld [vmem:[#allocation307_spill] sm:$0xff] }
 0x420   : > { %5180 = vmatpush1.bf16.msra.mxu1 %v12051_v21  ;;  %5138 = vmatprep.subr.bf16.mxu0 %v12052_v26  ;;  %v12101_v21 = vld [vmem:[#allocation309_spill] sm:$0xff]  ;;  %v12102_v26 = vld [vmem:[#allocation310_spill] sm:$0xff] }
 0x421   : > { %5181 = vmatprep.subr.bf16.mxu1 %v12053_v27  ;;  %v12103_v27 = vld [vmem:[#allocation311_spill] sm:$0xff] }
 0x423   : > { %5139 = vmatpush1.bf16.msra.mxu0 %v12054_v28  ;;  %v12104_v28 = vld [vmem:[#allocation312_spill] sm:$0xff] }
 0x424   : > { %5182 = vmatpush1.bf16.msra.mxu1 %v12055_v29  ;;  %5140 = vmatprep.subr.bf16.mxu0 %v12056_v34  ;;  %v12105_v29 = vld [vmem:[#allocation313_spill] sm:$0xff]  ;;  %v12106_v34 = vld [vmem:[#allocation314_spill] sm:$0xff] }
 0x425   : > { %5183 = vmatprep.subr.bf16.mxu1 %v12057_v35  ;;  %v12107_v35 = vld [vmem:[#allocation315_spill] sm:$0xff] }
 0x427   : > { %5141 = vmatpush1.bf16.msra.mxu0 %v12058_v36  ;;  %v12108_v36 = vld [vmem:[#allocation316_spill] sm:$0xff] }
 0x428   : > { %5184 = vmatpush1.bf16.msra.mxu1 %v12059_v37  ;;  %5142 = vmatprep.subr.bf16.mxu0 %v12060_v42  ;;  %v12109_v37 = vld [vmem:[#allocation317_spill] sm:$0xff]  ;;  %v12110_v42 = vld [vmem:[#allocation318_spill] sm:$0xff] }
 0x429   : > { %5185 = vmatprep.subr.bf16.mxu1 %v12061_v44  ;;  %v12111_v44 = vld [vmem:[#allocation319_spill] sm:$0xff] }
 0x42b   : > { %5143 = vmatpush1.bf16.msra.mxu0 %v12062_v45  ;;  %v12112_v45 = vld [vmem:[#allocation320_spill] sm:$0xff] }
 0x42c   : > { %5186 = vmatpush1.bf16.msra.mxu1 %v12063_v50  ;;  %5144 = vmatprep.subr.bf16.mxu0 %v12064_v51  ;;  %v12113_v50 = vld [vmem:[#allocation321_spill] sm:$0xff]  ;;  %v12114_v51 = vld [vmem:[#allocation322_spill] sm:$0xff] }
 0x42d   : > { %5187 = vmatprep.subr.bf16.mxu1 %v12065_v52  ;;  %v12115_v52 = vld [vmem:[#allocation323_spill] sm:$0xff] }
 0x42f   : > { %5145 = vmatpush1.bf16.msra.mxu0 %v12066_v55  ;;  %v12116_v55 = vld [vmem:[#allocation324_spill] sm:$0xff] }
 0x430   : > { %5188 = vmatpush1.bf16.msra.mxu1 %v12067_v1  ;;  %5146 = vmatprep.subr.bf16.mxu0 %v12068_v7  ;;  %v12117_v1 = vld [vmem:[#allocation325_spill] sm:$0xff]  ;;  %v12118_v7 = vld [vmem:[#allocation326_spill] sm:$0xff] }
 0x431   : > { %5189 = vmatprep.subr.bf16.mxu1 %v12069_v22  ;;  %v12119_v22 = vld [vmem:[#allocation327_spill] sm:$0xff] }
 0x433   : > { %5147 = vmatpush1.bf16.msra.mxu0 %v12070_v23  ;;  %v12120_v23 = vld [vmem:[#allocation328_spill] sm:$0xff] }
 0x434   : > { %5190 = vmatpush1.bf16.msra.mxu1 %v12071_v30  ;;  %5148 = vmatprep.subr.bf16.mxu0 %v12072_v41  ;;  %v12121_v30 = vld [vmem:[#allocation329_spill] sm:$0xff]  ;;  %v12122_v41 = vld [vmem:[#allocation330_spill] sm:$0xff] }
 0x435   : > { %5191 = vmatprep.subr.bf16.mxu1 %v12073_v33  ;;  %v12123_v33 = vld [vmem:[#allocation331_spill] sm:$0xff] }
 0x437   : > { %5149 = vmatpush1.bf16.msra.mxu0 %v12074_v25  ;;  %v12124_v25 = vld [vmem:[#allocation332_spill] sm:$0xff] }
 0x438   : > { %5192 = vmatpush1.bf16.msra.mxu1 %v12075_v39  ;;  %5150 = vmatprep.subr.bf16.mxu0 %v12076_v6  ;;  %v12125_v39 = vld [vmem:[#allocation333_spill] sm:$0xff]  ;;  %v12126_v6 = vld [vmem:[#allocation334_spill] sm:$0xff] }
 0x439   : > { %5193 = vmatprep.subr.bf16.mxu1 %v12077_v62  ;;  %v12127_v62 = vld [vmem:[#allocation335_spill] sm:$0xff] }
 0x43b   : > { %5151 = vmatpush1.bf16.msra.mxu0 %v12078_v57  ;;  %v12128_v57 = vld [vmem:[#allocation336_spill] sm:$0xff] }
 0x43c   : > { %5194 = vmatpush1.bf16.msra.mxu1 %v12079_v8  ;;  %5152 = vmatprep.subr.bf16.mxu0 %v12080_v11  ;;  %v12131_v8 = vld [vmem:[#allocation339_spill] sm:$0xff]  ;;  %v12132_v11 = vld [vmem:[#allocation340_spill] sm:$0xff] }
 0x43d   : > { %5195 = vmatprep.subr.bf16.mxu1 %v12081_v15  ;;  %v12133_v15 = vld [vmem:[#allocation341_spill] sm:$0xff] }
 0x43f   : > { %5153 = vmatpush1.bf16.msra.mxu0 %v12082_v4  ;;  %v12134_v4 = vld [vmem:[#allocation342_spill] sm:$0xff] }
 0x440   : > { %5196 = vmatpush1.bf16.msra.mxu1 %v12083_v2  ;;  %5208 = vmatprep.subr.bf16.mxu0 %v12084_v38  ;;  %v12135_v2 = vld [vmem:[#allocation343_spill] sm:$0xff]  ;;  %v12136_v38 = vld [vmem:[#allocation344_spill] sm:$0xff] }
 0x441   : > { %5251 = vmatprep.subr.bf16.mxu1 %v12085_v17  ;;  %v12137_v17 = vld [vmem:[#allocation345_spill] sm:$0xff] }
 0x442   : > { %5155 = vmatmul.mubr.bf16.vlgmr.msra.gmra.mrb[12].mxu0 %v10473_v49 }
 0x443   : > { %5198 = vmatmul.mubr.bf16.vlgmr.msra.gmra.mrb[12].mxu1 %v10473_v49  ;;  %5209 = vmatpush1.bf16.msra.mxu0 %v12086_v13  ;;  %v5322_v13 = vshrl.u32 %v10094_v56, 16 }
 0x444   : > { %5252 = vmatpush1.bf16.msra.mxu1 %v12087_v59  ;;  %5210 = vmatprep.subr.bf16.mxu0 %v12088_v60  ;;  %v12138_v59 = vld [vmem:[#allocation346_spill] sm:$0xff]  ;;  %v12139_v60 = vld [vmem:[#allocation347_spill] sm:$0xff] }
 0x445   : > { %5253 = vmatprep.subr.bf16.mxu1 %v12089_v16  ;;  %5240 = vmatprep.mubr.bf16.mxu0 %v10404_v12  ;;  %v12140_v16 = vld [vmem:[#allocation348_spill] sm:$0xff] }
 0x446   : > { %5283 = vmatprep.mubr.bf16.mxu1 %v10404_v12  ;;  %v12100_v12 = vld [vmem:[#allocation308_spill] sm:$0xff] }
 0x447   : > { %5211 = vmatpush1.bf16.msra.mxu0 %v12090_v47  ;;  %v12141_v47 = vld [vmem:[#allocation349_spill] sm:$0xff] }
 0x448   : > { %5254 = vmatpush1.bf16.msra.mxu1 %v12091_v5  ;;  %5212 = vmatprep.subr.bf16.mxu0 %v12092_v9  ;;  %v5319_v5 = vrot.slane %v4753_v32, 1  ;;  %v12142_v9 = vshll.u32 %v10090_v31, 16  ;;  %v12148_v32 = vld [vmem:[#allocation355_spill] sm:$0xff]  ;;  %v12149_v31 = vld [vmem:[#allocation356_spill] sm:$0xff] }
 0x449   : > { %5255 = vmatprep.subr.bf16.mxu1 %v12093_v46 }
 0x44a   : > { %v5320_v46 = vrot.slane %v12142_v9, 2  ;;  %v12193_v9 = vld [vmem:[#allocation400_spill] sm:$0xff] }
 0x44b   : > { %5213 = vmatpush1.bf16.msra.mxu0 %v12094_v10  ;;  %v5324_v10 = vrot.slane %v5322_v13, 1  ;;  %v12187_v13 = vld [vmem:[#allocation394_spill] sm:$0xff] }
 0x44c   : > { %5256 = vmatpush1.bf16.msra.mxu1 %v12095_v14  ;;  %5214 = vmatprep.subr.bf16.mxu0 %v12096_v18  ;;  %v5325_v14 = vrot.slane %v4760_v61, 2  ;;  %v12143_v18 = vld [vmem:[#allocation350_spill] sm:$0xff] }
 0x44d   : > { %5257 = vmatprep.subr.bf16.mxu1 %v12097_v3  ;;  %v12144_v3 = vld [vmem:[#allocation351_spill] sm:$0xff]  ;;  %v12151_v61 = vld [vmem:[#allocation358_spill] sm:$0xff] }
 0x44f   : > { %5215 = vmatpush1.bf16.msra.mxu0 %v12098_v19  ;;  %v12145_v19 = vld [vmem:[#allocation352_spill] sm:$0xff] }
 0x450   : > { %5258 = vmatpush1.bf16.msra.mxu1 %v12099_v20  ;;  %5216 = vmatprep.subr.bf16.mxu0 %v12100_v12  ;;  %v12146_v20 = vld [vmem:[#allocation353_spill] sm:$0xff]  ;;  %v5321_v12 = vor.u32 %v5320_v46, %v5319_v5  ;;  %v12192_v5 = vld [vmem:[#allocation399_spill] sm:$0xff] }
 0x451   : > { %5259 = vmatprep.subr.bf16.mxu1 %v12101_v21  ;;  %v5326_v21 = vor.u32 %v5325_v14, %v5324_v10  ;;  %v12194_v46 = vld [vmem:[#allocation401_spill] sm:$0xff]  ;;  %v12195_v10 = vld [vmem:[#allocation402_spill] sm:$0xff]  ;;  %v12196_v14 = vld [vmem:[#allocation403_spill] sm:$0xff] }
 0x453   : > { %5217 = vmatpush1.bf16.msra.mxu0 %v12102_v26  ;;  %v12147_v26 = vld [vmem:[#allocation354_spill] sm:$0xff]  ;;  %v10555_v56 = vsel %vm3485_vm2, %v5321_v12, %v5326_v21  ;;  %v12200_v12 = vld [vmem:[#allocation407_spill] sm:$0xff]  ;;  %v12201_v21 = vld [vmem:[#allocation408_spill] sm:$0xff] }
 0x454   : > { %5260 = vmatpush1.bf16.msra.mxu1 %v12103_v27  ;;  %5218 = vmatprep.subr.bf16.mxu0 %v12104_v28  ;;  %v12150_v27 = vld [vmem:[#allocation357_spill] sm:$0xff]  ;;  %v12152_v28 = vld [vmem:[#allocation359_spill] sm:$0xff] }
 0x455   : > { %5261 = vmatprep.subr.bf16.mxu1 %v12105_v29  ;;  %v12153_v29 = vld [vmem:[#allocation360_spill] sm:$0xff] }
 0x457   : > { %5219 = vmatpush1.bf16.msra.mxu0 %v12106_v34  ;;  %v12154_v34 = vld [vmem:[#allocation361_spill] sm:$0xff] }
 0x458   : > { %5262 = vmatpush1.bf16.msra.mxu1 %v12107_v35  ;;  %5220 = vmatprep.subr.bf16.mxu0 %v12108_v36  ;;  %v12155_v35 = vld [vmem:[#allocation362_spill] sm:$0xff]  ;;  %v12156_v36 = vld [vmem:[#allocation363_spill] sm:$0xff] }
 0x459   : > { %5263 = vmatprep.subr.bf16.mxu1 %v12109_v37  ;;  %v12157_v37 = vld [vmem:[#allocation364_spill] sm:$0xff] }
 0x45b   : > { %5221 = vmatpush1.bf16.msra.mxu0 %v12110_v42  ;;  %v12158_v42 = vld [vmem:[#allocation365_spill] sm:$0xff] }
 0x45c   : > { %5264 = vmatpush1.bf16.msra.mxu1 %v12111_v44  ;;  %5222 = vmatprep.subr.bf16.mxu0 %v12112_v45  ;;  %v12160_v44 = vld [vmem:[#allocation367_spill] sm:$0xff]  ;;  %v12161_v45 = vld [vmem:[#allocation368_spill] sm:$0xff] }
 0x45d   : > { %5265 = vmatprep.subr.bf16.mxu1 %v12113_v50  ;;  %v12162_v50 = vld [vmem:[#allocation369_spill] sm:$0xff] }
 0x45f   : > { %5223 = vmatpush1.bf16.msra.mxu0 %v12114_v51  ;;  %v12163_v51 = vld [vmem:[#allocation370_spill] sm:$0xff] }
 0x460   : > { %5266 = vmatpush1.bf16.msra.mxu1 %v12115_v52  ;;  %5224 = vmatprep.subr.bf16.mxu0 %v12116_v55  ;;  %v12164_v52 = vld [vmem:[#allocation371_spill] sm:$0xff]  ;;  %v12165_v55 = vld [vmem:[#allocation372_spill] sm:$0xff] }
 0x461   : > { %5267 = vmatprep.subr.bf16.mxu1 %v12117_v1  ;;  %v12166_v1 = vld [vmem:[#allocation373_spill] sm:$0xff] }
 0x463   : > { %5225 = vmatpush1.bf16.msra.mxu0 %v12118_v7  ;;  %v12167_v7 = vld [vmem:[#allocation374_spill] sm:$0xff] }
 0x464   : > { %5268 = vmatpush1.bf16.msra.mxu1 %v12119_v22  ;;  %5226 = vmatprep.subr.bf16.mxu0 %v12120_v23  ;;  %v12168_v22 = vld [vmem:[#allocation375_spill] sm:$0xff]  ;;  %v12169_v23 = vld [vmem:[#allocation376_spill] sm:$0xff] }
 0x465   : > { %5269 = vmatprep.subr.bf16.mxu1 %v12121_v30  ;;  %v12170_v30 = vld [vmem:[#allocation377_spill] sm:$0xff] }
 0x467   : > { %5227 = vmatpush1.bf16.msra.mxu0 %v12122_v41  ;;  %v12171_v41 = vld [vmem:[#allocation378_spill] sm:$0xff] }
 0x468   : > { %5270 = vmatpush1.bf16.msra.mxu1 %v12123_v33  ;;  %5228 = vmatprep.subr.bf16.mxu0 %v12124_v25  ;;  %v12172_v33 = vld [vmem:[#allocation379_spill] sm:$0xff]  ;;  %v12173_v25 = vld [vmem:[#allocation380_spill] sm:$0xff] }
 0x469   : > { %5271 = vmatprep.subr.bf16.mxu1 %v12125_v39  ;;  %v12174_v39 = vld [vmem:[#allocation381_spill] sm:$0xff] }
 0x46b   : > { %5229 = vmatpush1.bf16.msra.mxu0 %v12126_v6  ;;  %v12175_v6 = vld [vmem:[#allocation382_spill] sm:$0xff] }
 0x46c   : > { %5272 = vmatpush1.bf16.msra.mxu1 %v12127_v62  ;;  %5230 = vmatprep.subr.bf16.mxu0 %v12128_v57  ;;  %v12176_v62 = vld [vmem:[#allocation383_spill] sm:$0xff]  ;;  %v12177_v57 = vld [vmem:[#allocation384_spill] sm:$0xff] }
 0x46d   : > { %5273 = vmatprep.subr.bf16.mxu1 %v12129_v53  ;;  %v12178_v53 = vld [vmem:[#allocation385_spill] sm:$0xff] }
 0x46f   : > { %5231 = vmatpush1.bf16.msra.mxu0 %v12130_v58  ;;  %v12179_v58 = vld [vmem:[#allocation386_spill] sm:$0xff] }
 0x470   : > { %5274 = vmatpush1.bf16.msra.mxu1 %v12131_v8  ;;  %5232 = vmatprep.subr.bf16.mxu0 %v12132_v11  ;;  %v12180_v8 = vld [vmem:[#allocation387_spill] sm:$0xff]  ;;  %v12181_v11 = vld [vmem:[#allocation388_spill] sm:$0xff] }
 0x471   : > { %5275 = vmatprep.subr.bf16.mxu1 %v12133_v15  ;;  %v12182_v15 = vld [vmem:[#allocation389_spill] sm:$0xff] }
 0x473   : > { %5233 = vmatpush1.bf16.msra.mxu0 %v12134_v4  ;;  %v12183_v4 = vld [vmem:[#allocation390_spill] sm:$0xff] }
 0x474   : > { %5276 = vmatpush1.bf16.msra.mxu1 %v12135_v2  ;;  %5234 = vmatprep.subr.bf16.mxu0 %v12136_v38  ;;  %v12184_v2 = vld [vmem:[#allocation391_spill] sm:$0xff]  ;;  %v12185_v38 = vld [vmem:[#allocation392_spill] sm:$0xff] }
 0x475   : > { %5277 = vmatprep.subr.bf16.mxu1 %v12137_v17  ;;  %v12186_v17 = vld [vmem:[#allocation393_spill] sm:$0xff] }
 0x477   : > { %5235 = vmatpush1.bf16.msra.mxu0 %v12138_v59  ;;  %v12188_v59 = vld [vmem:[#allocation395_spill] sm:$0xff] }
 0x478   : > { %5278 = vmatpush1.bf16.msra.mxu1 %v12139_v60  ;;  %5236 = vmatprep.subr.bf16.mxu0 %v12140_v16  ;;  %v12189_v60 = vld [vmem:[#allocation396_spill] sm:$0xff]  ;;  %v12190_v16 = vld [vmem:[#allocation397_spill] sm:$0xff] }
 0x479   : > { %5279 = vmatprep.subr.bf16.mxu1 %v12141_v47  ;;  %v12191_v47 = vld [vmem:[#allocation398_spill] sm:$0xff] }
 0x47b   : > { %5237 = vmatpush1.bf16.msra.mxu0 %v12143_v18  ;;  %v12197_v18 = vld [vmem:[#allocation404_spill] sm:$0xff] }
 0x47c   : > { %5280 = vmatpush1.bf16.msra.mxu1 %v12144_v3  ;;  %5238 = vmatprep.subr.bf16.mxu0 %v12145_v19  ;;  %v12198_v3 = vld [vmem:[#allocation405_spill] sm:$0xff]  ;;  %v12199_v19 = vld [vmem:[#allocation406_spill] sm:$0xff] }
 0x47d   : > { %5281 = vmatprep.subr.bf16.mxu1 %v12146_v20  ;;  %v5313_v20 = vshrl.u32 %v10163_v63, 16 }
 0x47f   : > { %5239 = vmatpush1.bf16.msra.mxu0 %v12147_v26  ;;  %v12202_v26 = vld [vmem:[#allocation409_spill] sm:$0xff] }
 0x480   : > { %5282 = vmatpush1.bf16.msra.mxu1 %v12148_v32  ;;  %5330 = vmatprep.subr.bf16.mxu0 %v12149_v31  ;;  %v12203_v32 = vld [vmem:[#allocation410_spill] sm:$0xff]  ;;  %v5310_v31 = vrot.slane %v4741_v24, 1  ;;  %v12209_v24 = vld [vmem:[#allocation416_spill] sm:$0xff] }
 0x481   : > { %5373 = vmatprep.subr.bf16.mxu1 %v12150_v27  ;;  %v5311_v27 = vrot.slane %v4743_v0, 2  ;;  %v12211_v0 = vld [vmem:[#allocation418_spill] sm:$0xff] }
 0x482   : > { %5241 = vmatmul.mubr.bf16.vlgmr.msra.gmra.mrb[16].mxu0 %v10473_v49 }
 0x483   : > { %5284 = vmatmul.mubr.bf16.vlgmr.msra.gmra.mrb[16].mxu1 %v10473_v49  ;;  %5331 = vmatpush1.bf16.msra.mxu0 %v12151_v61  ;;  %v12159_v49 = vld [vmem:[#allocation366_spill] sm:$0xff]  ;;  %v5315_v61 = vrot.slane %v5313_v20, 1  ;;  %v12254_v20 = vld [vmem:[#allocation461_spill] sm:$0xff] }
 0x484   : > { %5374 = vmatpush1.bf16.msra.mxu1 %v12152_v28  ;;  %5332 = vmatprep.subr.bf16.mxu0 %v12153_v29  ;;  %v5316_v28 = vrot.slane %v4748_v40, 2  ;;  %v12204_v29 = vld [vmem:[#allocation411_spill] sm:$0xff] }
 0x485   : > { %5375 = vmatprep.subr.bf16.mxu1 %v12154_v34  ;;  %5362 = vmatprep.mubr.bf16.mxu0 %v10555_v56  ;;  %v12205_v34 = vld [vmem:[#allocation412_spill] sm:$0xff]  ;;  %v12212_v40 = vld [vmem:[#allocation419_spill] sm:$0xff] }
 0x486   : > { %5405 = vmatprep.mubr.bf16.mxu1 %v10555_v56 }
 0x487   : > { %5333 = vmatpush1.bf16.msra.mxu0 %v12155_v35  ;;  %v12206_v35 = vld [vmem:[#allocation413_spill] sm:$0xff] }
 0x488   : > { %5376 = vmatpush1.bf16.msra.mxu1 %v12156_v36  ;;  %5334 = vmatprep.subr.bf16.mxu0 %v12157_v37  ;;  %v12207_v36 = vld [vmem:[#allocation414_spill] sm:$0xff]  ;;  %v5312_v37 = vor.u32 %v5311_v27, %v5310_v31  ;;  %v12260_v27 = vld [vmem:[#allocation467_spill] sm:$0xff] }
 0x489   : > { %5377 = vmatprep.subr.bf16.mxu1 %v12158_v42  ;;  %v5317_v42 = vor.u32 %v5316_v28, %v5315_v61  ;;  %v12259_v31 = vld [vmem:[#allocation466_spill] sm:$0xff]  ;;  %v12261_v61 = vld [vmem:[#allocation468_spill] sm:$0xff]  ;;  %v12262_v28 = vld [vmem:[#allocation469_spill] sm:$0xff] }
 0x48b   : > { %5335 = vmatpush1.bf16.msra.mxu0 %v12159_v49  ;;  %v12208_v49 = vld [vmem:[#allocation415_spill] sm:$0xff]  ;;  %v10629_v63 = vsel %vm3485_vm2, %v5312_v37, %v5317_v42  ;;  %v12267_v37 = vld [vmem:[#allocation474_spill] sm:$0xff] }
 0x48c   : > { %5378 = vmatpush1.bf16.msra.mxu1 %v12160_v44  ;;  %5336 = vmatprep.subr.bf16.mxu0 %v12161_v45  ;;  %v12213_v44 = vld [vmem:[#allocation420_spill] sm:$0xff]  ;;  %v12214_v45 = vld [vmem:[#allocation421_spill] sm:$0xff]  ;;  %v12268_v42 = vld [vmem:[#allocation475_spill] sm:$0xff] }
 0x48d   : > { %5379 = vmatprep.subr.bf16.mxu1 %v12162_v50  ;;  %v12215_v50 = vld [vmem:[#allocation422_spill] sm:$0xff] }
 0x48f   : > { %5337 = vmatpush1.bf16.msra.mxu0 %v12163_v51  ;;  %v12216_v51 = vld [vmem:[#allocation423_spill] sm:$0xff] }
 0x490   : > { %5380 = vmatpush1.bf16.msra.mxu1 %v12164_v52  ;;  %5338 = vmatprep.subr.bf16.mxu0 %v12165_v55  ;;  %v12217_v52 = vld [vmem:[#allocation424_spill] sm:$0xff]  ;;  %v12218_v55 = vld [vmem:[#allocation425_spill] sm:$0xff] }
 0x491   : > { %5381 = vmatprep.subr.bf16.mxu1 %v12166_v1  ;;  %v12219_v1 = vld [vmem:[#allocation426_spill] sm:$0xff] }
 0x493   : > { %5339 = vmatpush1.bf16.msra.mxu0 %v12167_v7  ;;  %v12220_v7 = vld [vmem:[#allocation427_spill] sm:$0xff] }
 0x494   : > { %5382 = vmatpush1.bf16.msra.mxu1 %v12168_v22  ;;  %5340 = vmatprep.subr.bf16.mxu0 %v12169_v23  ;;  %v12221_v22 = vld [vmem:[#allocation428_spill] sm:$0xff]  ;;  %v12222_v23 = vld [vmem:[#allocation429_spill] sm:$0xff] }
 0x495   : > { %5383 = vmatprep.subr.bf16.mxu1 %v12170_v30  ;;  %v12223_v30 = vld [vmem:[#allocation430_spill] sm:$0xff] }
 0x497   : > { %5341 = vmatpush1.bf16.msra.mxu0 %v12171_v41  ;;  %v12224_v41 = vld [vmem:[#allocation431_spill] sm:$0xff] }
 0x498   : > { %5384 = vmatpush1.bf16.msra.mxu1 %v12172_v33  ;;  %5342 = vmatprep.subr.bf16.mxu0 %v12173_v25  ;;  %v12225_v33 = vld [vmem:[#allocation432_spill] sm:$0xff]  ;;  %v12226_v25 = vld [vmem:[#allocation433_spill] sm:$0xff] }
 0x499   : > { %5385 = vmatprep.subr.bf16.mxu1 %v12174_v39  ;;  %v12227_v39 = vld [vmem:[#allocation434_spill] sm:$0xff] }
 0x49b   : > { %5343 = vmatpush1.bf16.msra.mxu0 %v12175_v6  ;;  %v12228_v6 = vld [vmem:[#allocation435_spill] sm:$0xff] }
 0x49c   : > { %5386 = vmatpush1.bf16.msra.mxu1 %v12176_v62  ;;  %5344 = vmatprep.subr.bf16.mxu0 %v12177_v57  ;;  %v12230_v62 = vld [vmem:[#allocation437_spill] sm:$0xff]  ;;  %v12231_v57 = vld [vmem:[#allocation438_spill] sm:$0xff] }
 0x49d   : > { %5387 = vmatprep.subr.bf16.mxu1 %v12178_v53  ;;  %v12232_v53 = vld [vmem:[#allocation439_spill] sm:$0xff] }
 0x49f   : > { %5345 = vmatpush1.bf16.msra.mxu0 %v12179_v58  ;;  %v12233_v58 = vld [vmem:[#allocation440_spill] sm:$0xff] }
 0x4a0   : > { %5388 = vmatpush1.bf16.msra.mxu1 %v12180_v8  ;;  %5346 = vmatprep.subr.bf16.mxu0 %v12181_v11  ;;  %v12234_v8 = vld [vmem:[#allocation441_spill] sm:$0xff]  ;;  %v12235_v11 = vld [vmem:[#allocation442_spill] sm:$0xff] }
 0x4a1   : > { %5389 = vmatprep.subr.bf16.mxu1 %v12182_v15  ;;  %v12236_v15 = vld [vmem:[#allocation443_spill] sm:$0xff] }
 0x4a3   : > { %5347 = vmatpush1.bf16.msra.mxu0 %v12183_v4  ;;  %v12237_v4 = vld [vmem:[#allocation444_spill] sm:$0xff] }
 0x4a4   : > { %5390 = vmatpush1.bf16.msra.mxu1 %v12184_v2  ;;  %5348 = vmatprep.subr.bf16.mxu0 %v12185_v38  ;;  %v12238_v2 = vld [vmem:[#allocation445_spill] sm:$0xff]  ;;  %v12239_v38 = vld [vmem:[#allocation446_spill] sm:$0xff] }
 0x4a5   : > { %5391 = vmatprep.subr.bf16.mxu1 %v12186_v17  ;;  %v12240_v17 = vld [vmem:[#allocation447_spill] sm:$0xff] }
 0x4a7   : > { %5349 = vmatpush1.bf16.msra.mxu0 %v12187_v13  ;;  %v12241_v13 = vld [vmem:[#allocation448_spill] sm:$0xff] }
 0x4a8   : > { %5392 = vmatpush1.bf16.msra.mxu1 %v12188_v59  ;;  %5350 = vmatprep.subr.bf16.mxu0 %v12189_v60  ;;  %v12242_v59 = vld [vmem:[#allocation449_spill] sm:$0xff]  ;;  %v12243_v60 = vld [vmem:[#allocation450_spill] sm:$0xff] }
 0x4a9   : > { %5393 = vmatprep.subr.bf16.mxu1 %v12190_v16  ;;  %v12244_v16 = vld [vmem:[#allocation451_spill] sm:$0xff] }
 0x4ab   : > { %5351 = vmatpush1.bf16.msra.mxu0 %v12191_v47  ;;  %v12245_v47 = vld [vmem:[#allocation452_spill] sm:$0xff] }
 0x4ac   : > { %5394 = vmatpush1.bf16.msra.mxu1 %v12192_v5  ;;  %5352 = vmatprep.subr.bf16.mxu0 %v12193_v9  ;;  %v12246_v5 = vld [vmem:[#allocation453_spill] sm:$0xff]  ;;  %v12247_v9 = vld [vmem:[#allocation454_spill] sm:$0xff] }
 0x4ad   : > { %5395 = vmatprep.subr.bf16.mxu1 %v12194_v46  ;;  %v12248_v46 = vld [vmem:[#allocation455_spill] sm:$0xff] }
 0x4af   : > { %5353 = vmatpush1.bf16.msra.mxu0 %v12195_v10  ;;  %v12249_v10 = vld [vmem:[#allocation456_spill] sm:$0xff] }
 0x4b0   : > { %5396 = vmatpush1.bf16.msra.mxu1 %v12196_v14  ;;  %5354 = vmatprep.subr.bf16.mxu0 %v12197_v18  ;;  %v12250_v14 = vld [vmem:[#allocation457_spill] sm:$0xff]  ;;  %v12251_v18 = vld [vmem:[#allocation458_spill] sm:$0xff] }
 0x4b1   : > { %5397 = vmatprep.subr.bf16.mxu1 %v12198_v3  ;;  %v12252_v3 = vld [vmem:[#allocation459_spill] sm:$0xff] }
 0x4b3   : > { %5355 = vmatpush1.bf16.msra.mxu0 %v12199_v19  ;;  %v12253_v19 = vld [vmem:[#allocation460_spill] sm:$0xff] }
 0x4b4   : > { %5398 = vmatpush1.bf16.msra.mxu1 %v12200_v12  ;;  %5356 = vmatprep.subr.bf16.mxu0 %v12201_v21  ;;  %v12255_v12 = vld [vmem:[#allocation462_spill] sm:$0xff]  ;;  %v12256_v21 = vld [vmem:[#allocation463_spill] sm:$0xff] }
 0x4b5   : > { %5399 = vmatprep.subr.bf16.mxu1 %v12202_v26  ;;  %v12257_v26 = vld [vmem:[#allocation464_spill] sm:$0xff] }
 0x4b7   : > { %5357 = vmatpush1.bf16.msra.mxu0 %v12203_v32  ;;  %v12258_v32 = vld [vmem:[#allocation465_spill] sm:$0xff] }
 0x4b8   : > { %5400 = vmatpush1.bf16.msra.mxu1 %v12204_v29  ;;  %5358 = vmatprep.subr.bf16.mxu0 %v12205_v34  ;;  %v12263_v29 = vld [vmem:[#allocation470_spill] sm:$0xff]  ;;  %v12264_v34 = vld [vmem:[#allocation471_spill] sm:$0xff] }
 0x4b9   : > { %5401 = vmatprep.subr.bf16.mxu1 %v12206_v35  ;;  %v12265_v35 = vld [vmem:[#allocation472_spill] sm:$0xff] }
 0x4bb   : > { %5359 = vmatpush1.bf16.msra.mxu0 %v12207_v36  ;;  %v12266_v36 = vld [vmem:[#allocation473_spill] sm:$0xff] }
 0x4bc   : > { %5402 = vmatpush1.bf16.msra.mxu1 %v12208_v49  ;;  %5360 = vmatprep.subr.bf16.mxu0 %v12209_v24  ;;  %v12269_v49 = vld [vmem:[#allocation476_spill] sm:$0xff]  ;;  %v12270_v24 = vld [vmem:[#allocation477_spill] sm:$0xff] }
 0x4bd   : > { %5403 = vmatprep.subr.bf16.mxu1 %v12210_v43  ;;  %v12271_v43 = vld [vmem:[#allocation478_spill] sm:$0xff] }
 0x4bf   : > { %5361 = vmatpush1.bf16.msra.mxu0 %v12211_v0  ;;  %v12272_v0 = vld [vmem:[#allocation479_spill] sm:$0xff] }
 0x4c0   : > { %5404 = vmatpush1.bf16.msra.mxu1 %v12212_v40  ;;  %5416 = vmatprep.subr.bf16.mxu0 %v12213_v44  ;;  %v12273_v40 = vld [vmem:[#allocation480_spill] sm:$0xff]  ;;  %v12274_v44 = vld [vmem:[#allocation481_spill] sm:$0xff] }
 0x4c1   : > { %5459 = vmatprep.subr.bf16.mxu1 %v12214_v45  ;;  %v12275_v45 = vld [vmem:[#allocation482_spill] sm:$0xff] }
 0x4c2   : > { %5363 = vmatmul.mubr.bf16.vlgmr.msra.gmra.mrb[12].mxu0 %v10629_v63 }
 0x4c3   : > { %5406 = vmatmul.mubr.bf16.vlgmr.msra.gmra.mrb[12].mxu1 %v10629_v63  ;;  %5417 = vmatpush1.bf16.msra.mxu0 %v12215_v50  ;;  %v12276_v50 = vld [vmem:[#allocation483_spill] sm:$0xff] }
 0x4c4   : > { %5460 = vmatpush1.bf16.msra.mxu1 %v12216_v51  ;;  %5418 = vmatprep.subr.bf16.mxu0 %v12217_v52  ;;  %v6671_v51 = vld [vmem:[%s10814_s1 + $0x40] sm:$0xff]  }
 0x4c5   : > { %5461 = vmatprep.subr.bf16.mxu1 %v12218_v55  ;;  %5448 = vmatprep.mubr.bf16.mxu0 %v10555_v56  ;;  %v6672_v52 = vld [vmem:[%s10814_s1 + $0xc0] sm:$0xff]  }
 0x4c6   : > { %5491 = vmatprep.mubr.bf16.mxu1 %v10555_v56  ;;  %v12229_v56 = vld [vmem:[#allocation436_spill] sm:$0xff]  ;;  %v6673_v55 = vld [vmem:[%s10814_s1] sm:$0xff]  }
 0x4c7   : > { %5419 = vmatpush1.bf16.msra.mxu0 %v12219_v1  ;;  %v6674_v1 = vld [vmem:[%s10814_s1 + $0x80] sm:$0xff]  }
 0x4c8   : > { %5462 = vmatpush1.bf16.msra.mxu1 %v12220_v7  ;;  %5420 = vmatprep.subr.bf16.mxu0 %v12221_v22  ;;  %v6675_v7 = vld [vmem:[%s10814_s1 + $0x48] sm:$0xff]  }
 0x4c9   : > { %5463 = vmatprep.subr.bf16.mxu1 %v12222_v23  ;;  %v6676_v22 = vld [vmem:[%s10814_s1 + $0xc8] sm:$0xff]  }
 0x4ca   : > { %v6678_v23 = vld [vmem:[%s10814_s1 + $0x88] sm:$0xff]  }
 0x4cb   : > { %5421 = vmatpush1.bf16.msra.mxu0 %v12223_v30  ;;  %v6679_v30 = vld [vmem:[%s10814_s1 + $0x50] sm:$0xff]  }
 0x4cc   : > { %5464 = vmatpush1.bf16.msra.mxu1 %v12224_v41  ;;  %5422 = vmatprep.subr.bf16.mxu0 %v12225_v33  ;;  %v6680_v41 = vld [vmem:[%s10814_s1 + $0xd0] sm:$0xff]  }
 0x4cd   : > { %5465 = vmatprep.subr.bf16.mxu1 %v12226_v25  ;;  %v6681_v33 = vld [vmem:[%s10814_s1 + $0x10] sm:$0xff]  }
 0x4ce   : > { %v6682_v25 = vld [vmem:[%s10814_s1 + $0x90] sm:$0xff]  }
 0x4cf   : > { %5423 = vmatpush1.bf16.msra.mxu0 %v12227_v39  ;;  %v6683_v39 = vld [vmem:[%s10814_s1 + $0x58] sm:$0xff]  }
 0x4d0   : > { %5466 = vmatpush1.bf16.msra.mxu1 %v12228_v6  ;;  %5424 = vmatprep.subr.bf16.mxu0 %v12229_v56  ;;  %v6684_v6 = vld [vmem:[%s10814_s1 + $0xd8] sm:$0xff]  }
 0x4d1   : > { %5467 = vmatprep.subr.bf16.mxu1 %v12230_v62  ;;  %v6685_v56 = vld [vmem:[%s10814_s1 + $0x18] sm:$0xff]  }
 0x4d2   : > { %v6686_v62 = vld [vmem:[%s10814_s1 + $0x98] sm:$0xff]  }
 0x4d3   : > { %5425 = vmatpush1.bf16.msra.mxu0 %v12231_v57  ;;  %v6687_v57 = vld [vmem:[%s10814_s1 + $0x60] sm:$0xff]  }
 0x4d4   : > { %5468 = vmatpush1.bf16.msra.mxu1 %v12232_v53  ;;  %5426 = vmatprep.subr.bf16.mxu0 %v12233_v58  ;;  %v6688_v53 = vld [vmem:[%s10814_s1 + $0xe0] sm:$0xff]  }
 0x4d5   : > { %5469 = vmatprep.subr.bf16.mxu1 %v12234_v8  ;;  %v6689_v58 = vld [vmem:[%s10814_s1 + $0x20] sm:$0xff]  }
 0x4d6   : > { %v6690_v8 = vld [vmem:[%s10814_s1 + $0xa0] sm:$0xff]  }
 0x4d7   : > { %5427 = vmatpush1.bf16.msra.mxu0 %v12235_v11  ;;  %v6691_v11 = vld [vmem:[%s10814_s1 + $0x68] sm:$0xff]  }
 0x4d8   : > { %5470 = vmatpush1.bf16.msra.mxu1 %v12236_v15  ;;  %5428 = vmatprep.subr.bf16.mxu0 %v12237_v4  ;;  %v6692_v15 = vld [vmem:[%s10814_s1 + $0xe8] sm:$0xff]  }
 0x4d9   : > { %5471 = vmatprep.subr.bf16.mxu1 %v12238_v2  ;;  %v6693_v4 = vld [vmem:[%s10814_s1 + $0x28] sm:$0xff]  }
 0x4da   : > { %v6694_v2 = vld [vmem:[%s10814_s1 + $0xa8] sm:$0xff]  }
 0x4db   : > { %5429 = vmatpush1.bf16.msra.mxu0 %v12239_v38  ;;  %v6695_v38 = vld [vmem:[%s10814_s1 + $0x70] sm:$0xff]  }
 0x4dc   : > { %5472 = vmatpush1.bf16.msra.mxu1 %v12240_v17  ;;  %5430 = vmatprep.subr.bf16.mxu0 %v12241_v13  ;;  %v6696_v17 = vld [vmem:[%s10814_s1 + $0xf0] sm:$0xff]  }
 0x4dd   : > { %5473 = vmatprep.subr.bf16.mxu1 %v12242_v59  ;;  %v6697_v13 = vld [vmem:[%s10814_s1 + $0x30] sm:$0xff]  }
 0x4de   : > { %v6698_v59 = vld [vmem:[%s10814_s1 + $0xb0] sm:$0xff]  }
 0x4df   : > { %5431 = vmatpush1.bf16.msra.mxu0 %v12243_v60  ;;  %v6699_v60 = vld [vmem:[%s10814_s1 + $0x78] sm:$0xff]  }
 0x4e0   : > { %5474 = vmatpush1.bf16.msra.mxu1 %v12244_v16  ;;  %5432 = vmatprep.subr.bf16.mxu0 %v12245_v47  ;;  %v6700_v16 = vld [vmem:[%s10814_s1 + $0xf8] sm:$0xff]  }
 0x4e1   : > { %5475 = vmatprep.subr.bf16.mxu1 %v12246_v5  ;;  %v6701_v47 = vld [vmem:[%s10814_s1 + $0x38] sm:$0xff]  }
 0x4e2   : > { %v6702_v5 = vld [vmem:[%s10814_s1 + $0xb8] sm:$0xff]  }
 0x4e3   : > { %5433 = vmatpush1.bf16.msra.mxu0 %v12247_v9 }
 0x4e4   : > { %5476 = vmatpush1.bf16.msra.mxu1 %v12248_v46  ;;  %5434 = vmatprep.subr.bf16.mxu0 %v12249_v10 }
 0x4e5   : > { %5477 = vmatprep.subr.bf16.mxu1 %v12250_v14 }
 0x4e7   : > { %5435 = vmatpush1.bf16.msra.mxu0 %v12251_v18 }
 0x4e8   : > { %5478 = vmatpush1.bf16.msra.mxu1 %v12252_v3  ;;  %5436 = vmatprep.subr.bf16.mxu0 %v12253_v19 }
 0x4e9   : > { %5479 = vmatprep.subr.bf16.mxu1 %v12254_v20 }
 0x4eb   : > { %5437 = vmatpush1.bf16.msra.mxu0 %v12255_v12 }
 0x4ec   : > { %5480 = vmatpush1.bf16.msra.mxu1 %v12256_v21  ;;  %5438 = vmatprep.subr.bf16.mxu0 %v12257_v26 }
 0x4ed   : > { %5481 = vmatprep.subr.bf16.mxu1 %v12258_v32 }
 0x4ef   : > { %5439 = vmatpush1.bf16.msra.mxu0 %v12259_v31 }
 0x4f0   : > { %5482 = vmatpush1.bf16.msra.mxu1 %v12260_v27  ;;  %5440 = vmatprep.subr.bf16.mxu0 %v12261_v61 }
 0x4f1   : > { %5483 = vmatprep.subr.bf16.mxu1 %v12262_v28 }
 0x4f3   : > { %5441 = vmatpush1.bf16.msra.mxu0 %v12263_v29 }
 0x4f4   : > { %5484 = vmatpush1.bf16.msra.mxu1 %v12264_v34  ;;  %5442 = vmatprep.subr.bf16.mxu0 %v12265_v35 }
 0x4f5   : > { %5485 = vmatprep.subr.bf16.mxu1 %v12266_v36 }
 0x4f7   : > { %5443 = vmatpush1.bf16.msra.mxu0 %v12267_v37 }
 0x4f8   : > { %5486 = vmatpush1.bf16.msra.mxu1 %v12268_v42  ;;  %5444 = vmatprep.subr.bf16.mxu0 %v12269_v49 }
 0x4f9   : > { %5487 = vmatprep.subr.bf16.mxu1 %v12270_v24 }
 0x4fb   : > { %5445 = vmatpush1.bf16.msra.mxu0 %v12271_v43 }
 0x4fc   : > { %5488 = vmatpush1.bf16.msra.mxu1 %v12272_v0  ;;  %5446 = vmatprep.subr.bf16.mxu0 %v12273_v40 }
 0x4fd   : > { %5489 = vmatprep.subr.bf16.mxu1 %v12274_v44 }
 0x4ff   : > { %5447 = vmatpush1.bf16.msra.mxu0 %v12275_v45 }
 0x500   : > { %5490 = vmatpush1.bf16.msra.mxu1 %v12276_v50  ;;  %6432 = vmatprep.subr.bf16.mxu0 %v6671_v51 }
 0x501   : > { %6454 = vmatprep.subr.bf16.mxu1 %v6672_v52 }
 0x502   : > { %5449 = vmatmul.mubr.bf16.vlgmr.msra.gmra.mrb[16].mxu0 %v10629_v63 }
 0x503   : > { %5492 = vmatmul.mubr.bf16.vlgmr.msra.gmra.mrb[16].mxu1 %v10629_v63  ;;  %6433 = vmatpush3.bf16.msra.mxu0 %v6673_v55  ;;  %v6677_v63 = vld [vmem:[%s10814_s1 + $0x8] sm:$0xff]  }
 0x504   : > { %6455 = vmatpush3.bf16.msra.mxu1 %v6674_v1  ;;  %6434 = vmatprep.subr.bf16.mxu0 %v6675_v7 }
 0x505   : > { %6456 = vmatprep.subr.bf16.mxu1 %v6676_v22 }
 0x507   : > { %6435 = vmatpush3.bf16.msra.mxu0 %v6677_v63 }
 0x508   : > { %6457 = vmatpush3.bf16.msra.mxu1 %v6678_v23  ;;  %6436 = vmatprep.subr.bf16.mxu0 %v6679_v30 }
 0x509   : > { %6458 = vmatprep.subr.bf16.mxu1 %v6680_v41 }
 0x50b   : > { %6437 = vmatpush3.bf16.msra.mxu0 %v6681_v33 }
 0x50c   : > { %6459 = vmatpush3.bf16.msra.mxu1 %v6682_v25  ;;  %6438 = vmatprep.subr.bf16.mxu0 %v6683_v39 }
 0x50d   : > { %6460 = vmatprep.subr.bf16.mxu1 %v6684_v6 }
 0x50f   : > { %6439 = vmatpush3.bf16.msra.mxu0 %v6685_v56 }
 0x510   : > { %6461 = vmatpush3.bf16.msra.mxu1 %v6686_v62  ;;  %6440 = vmatprep.subr.bf16.mxu0 %v6687_v57 }
 0x511   : > { %6462 = vmatprep.subr.bf16.mxu1 %v6688_v53 }
 0x513   : > { %6441 = vmatpush3.bf16.msra.mxu0 %v6689_v58 }
 0x514   : > { %6463 = vmatpush3.bf16.msra.mxu1 %v6690_v8  ;;  %6442 = vmatprep.subr.bf16.mxu0 %v6691_v11 }
 0x515   : > { %6464 = vmatprep.subr.bf16.mxu1 %v6692_v15 }
 0x517   : > { %6443 = vmatpush3.bf16.msra.mxu0 %v6693_v4 }
 0x518   : > { %6465 = vmatpush3.bf16.msra.mxu1 %v6694_v2  ;;  %6444 = vmatprep.subr.bf16.mxu0 %v6695_v38 }
 0x519   : > { %6466 = vmatprep.subr.bf16.mxu1 %v6696_v17 }
 0x51b   : > { %6445 = vmatpush3.bf16.msra.mxu0 %v6697_v13 }
 0x51c   : > { %6467 = vmatpush3.bf16.msra.mxu1 %v6698_v59  ;;  %6446 = vmatprep.subr.bf16.mxu0 %v6699_v60 }
 0x51d   : > { %6468 = vmatprep.subr.bf16.mxu1 %v6700_v16 }
 0x51f   : > { %6447 = vmatpush3.bf16.msra.mxu0 %v6701_v47 }
 0x520   : > { %6469 = vmatpush3.bf16.msra.mxu1 %v6702_v5 }
 0x595   : > { %v5364_v9 = vpop.f32.mrb[12].mxu0 }
 0x596   : > { %v5407_v46 = vpop.f32.mrb[12].mxu1  ;;  %v5366_v10 = vpop.f32.mrb[13].mxu0  ;;  %v5518_v12 = vmul.f32 %v5364_v9, %v5364_v9 }
 0x597   : > { %v5409_v14 = vpop.f32.mrb[13].mxu1  ;;  %v5368_v18 = vpop.f32.mrb[14].mxu0  ;;  %v5520_v21 = vmul.f32 %v5407_v46, %v5407_v46  ;;  %v5519_v32 = vmul.f32 %v5366_v10, %v5366_v10 }
 0x598   : > { %v5411_v3 = vpop.f32.mrb[14].mxu1  ;;  %v5370_v19 = vpop.f32.mrb[15].mxu0  ;;  %v5521_v31 = vmul.f32 %v5409_v14, %v5409_v14  ;;  %v5522_v27 = vmul.f32 %v5368_v18, %v5368_v18 }
 0x599   : > { %v5413_v20 = vpop.f32.mrb[15].mxu1  ;;  %v5524_v34 = vmul.f32 %v5411_v3, %v5411_v3  ;;  %v5523_v35 = vmul.f32 %v5370_v19, %v5370_v19 }
 0x59a   : > { %v5525_v24 = vmul.f32 %v5413_v20, %v5413_v20 }
 0x5d5   : > { %v5450_v26 = vpop.f32.mrb[16].mxu0 }
 0x5d6   : > { %v5526_v61 = vmul.f32 %v5450_v26, %v5450_v26  ;;  %v5493_v28 = vpop.f32.mrb[16].mxu1  ;;  %v5452_v29 = vpop.f32.mrb[17].mxu0 }
 0x5d7   : > { %v5528_v36 = vmul.f32 %v5493_v28, %v5493_v28  ;;  %v5527_v37 = vmul.f32 %v5452_v29, %v5452_v29  ;;  %v5495_v42 = vpop.f32.mrb[17].mxu1  ;;  %v5454_v49 = vpop.f32.mrb[18].mxu0  ;;  %v4725_v29 = vmax.f32 %v10359_v48, 1e-10 }
 0x5d8   : > { %v5534_v43 = vadd.f32 %v5526_v61, %v5518_v12  ;;  %v5529_v0 = vmul.f32 %v5495_v42, %v5495_v42  ;;  %v5530_v40 = vmul.f32 %v5454_v49, %v5454_v49  ;;  %v5497_v44 = vpop.f32.mrb[18].mxu1  ;;  %v5456_v45 = vpop.f32.mrb[19].mxu0 }
 0x5d9   : > { %v5536_v50 = vadd.f32 %v5528_v36, %v5520_v21  ;;  %v5535_v51 = vadd.f32 %v5527_v37, %v5519_v32  ;;  %v5532_v52 = vmul.f32 %v5497_v44, %v5497_v44  ;;  %v5531_v55 = vmul.f32 %v5456_v45, %v5456_v45  ;;  %v5499_v1 = vpop.f32.mrb[19].mxu1 }
 0x5da   : > { %v5542_v7 = vadd.f32 1e-30, %v5534_v43  ;;  %v5537_v22 = vadd.f32 %v5529_v0, %v5521_v31  ;;  %v5538_v63 = vadd.f32 %v5530_v40, %v5522_v27  ;;  %v5533_v23 = vmul.f32 %v5499_v1, %v5499_v1 }
 0x5db   : > { %v5544_v30 = vadd.f32 1e-30, %v5536_v50  ;;  %v5543_v41 = vadd.f32 1e-30, %v5535_v51  ;;  %v5540_v33 = vadd.f32 %v5532_v52, %v5524_v34  ;;  %v5539_v25 = vadd.f32 %v5531_v55, %v5523_v35 }
 0x5dc   : > { %6647 = vrsqrt.f32 %v5542_v7  ;;  %v5545_v39 = vadd.f32 1e-30, %v5537_v22  ;;  %v5546_v6 = vadd.f32 1e-30, %v5538_v63  ;;  %v5541_v56 = vadd.f32 %v5533_v23, %v5525_v24 }
 0x5dd   : > { %6649 = vrsqrt.f32 %v5544_v30  ;;  %v5548_v62 = vadd.f32 1e-30, %v5540_v33  ;;  %v5547_v57 = vadd.f32 1e-30, %v5539_v25  ;;  %v4724_v31 = vmax.f32 %v10356_v54, 1e-10 }
 0x5de   : > { %6651 = vrsqrt.f32 %v5543_v41  ;;  %v5549_v53 = vadd.f32 1e-30, %v5541_v56 }
 0x5df   : > { %6653 = vrsqrt.f32 %v5545_v39 }
 0x5e0   : > { %6655 = vrsqrt.f32 %v5546_v6 }
 0x5e1   : > { %6657 = vrsqrt.f32 %v5548_v62 }
 0x5e2   : > { %6659 = vrsqrt.f32 %v5547_v57 }
 0x5e3   : > { %6661 = vrsqrt.f32 %v5549_v53 }
 0x5e4   : > { %6663 = vlog2.f32 %v4724_v31 }
 0x5e5   : > { %6665 = vlog2.f32 %v4725_v29 }
 0x5e6   : > { %v6648_v58 = vpop.eup %6647 }
 0x5e7   : > { %v6650_v8 = vpop.eup %6649  ;;  %v5558_v38 = vmul.f32 %v6648_v58, %v5534_v43  ;;  %v5675_v43 = vlaneseq }
 0x5e8   : > { %v6652_v11 = vpop.eup %6651  ;;  %v5560_v59 = vmul.f32 %v6650_v8, %v5536_v50 }
 0x5e9   : > { %v6654_v15 = vpop.eup %6653  ;;  %v5559_v47 = vmul.f32 %v6652_v11, %v5535_v51  ;;  %v5676_v40 = vshrl.u32 %v5675_v43, 7 }
 0x5ea   : > { %v6656_v4 = vpop.eup %6655  ;;  %v5561_v46 = vmul.f32 %v6654_v15, %v5537_v22 }
 0x5eb   : > { %v6658_v2 = vpop.eup %6657  ;;  %v5562_v17 = vmul.f32 %v6656_v4, %v5538_v63  ;;  %v5677_v48 = vadd.s32 8, %v5676_v40 }
 0x5ec   : > { %v6660_v13 = vpop.eup %6659  ;;  %v5564_v60 = vmul.f32 %v6658_v2, %v5540_v33 }
 0x5ed   : > { %v6662_v16 = vpop.eup %6661  ;;  %v5566_v5 = vpack.c.bf16 %v5562_v17, %v5558_v38  ;;  %v5563_v9 = vmul.f32 %v6660_v13, %v5539_v25  ;;  %vm5685_vm3 = vcmp.lt.s32.totalorder %v5677_v48, 13 }
 0x5ee   : > { %v5568_v10 = vpack.c.bf16 %v5564_v60, %v5560_v59  ;;  %v5565_v14 = vmul.f32 %v6662_v16, %v5541_v56  ;;  %v6664_v0 = vpop.eup %6663 }
 0x5ef   : > { %v5567_v18 = vpack.c.bf16 %v5563_v9, %v5559_v47  ;;  %v6666_v54 = vpop.eup %6665  ;;  %v4727_v45 = vmul.f32 0.6931472, %v6664_v0 }
 0x5f0   : > { %v5569_v3 = vpack.c.bf16 %v5565_v14, %v5561_v46  ;;  %v4729_v52 = vmul.f32 0.6931472, %v6666_v54 }
 0x5f1   : > { %5602 = vmatprep.mubr.bf16.mxu0 %v5567_v18 }
 0x5f2   : > { %5643 = vmatprep.mubr.bf16.mxu1 %v5569_v3  ;;  %5603 = vmatmul.mubr.bf16.vlgmr.msra.gmra.mrb[20].mxu0 %v5566_v5 }
 0x5f3   : > { %5644 = vmatmul.mubr.bf16.vlgmr.msra.gmra.mrb[20].mxu1 %v5568_v10 }
 0x6c5   : > { %v6448_v19 = vpop.f32.mrb[20].mxu0 }
 0x6c6   : > { %v6470_v20 = vpop.f32.mrb[20].mxu1  ;;  %v6449_v12 = vpop.f32.mrb[21].mxu0 }
 0x6c7   : > { %v6450_v21 = vadd.f32 %v6449_v12, %v6448_v19  ;;  %v6471_v26 = vpop.f32.mrb[21].mxu1  ;;  %v6451_v32 = vpop.f32.mrb[22].mxu0 }
 0x6c8   : > { %v6472_v27 = vadd.f32 %v6471_v26, %v6470_v20  ;;  %v6473_v61 = vpop.f32.mrb[22].mxu1  ;;  %v6452_v28 = vpop.f32.mrb[23].mxu0 }
 0x6c9   : > { %v6453_v34 = vadd.f32 %v6452_v28, %v6451_v32  ;;  %v6474_v35 = vpop.f32.mrb[23].mxu1 }
 0x6ca   : > { %v5646_v36 = vadd.f32 %v6472_v27, %v6450_v21  ;;  %v6475_v37 = vadd.f32 %v6474_v35, %v6473_v61 }
 0x6cc   : > { %v5652_v42 = vmax.f32 %v5646_v36, 1e-10  ;;  %v5649_v49 = vadd.f32 %v6475_v37, %v6453_v34 }
 0x6ce   : > { %6667 = vlog2.f32 %v5652_v42  ;;  %v5653_v24 = vmax.f32 %v5649_v49, 1e-10 }
 0x6d0   : > { %6669 = vlog2.f32 %v5653_v24 }
 0x6d8   : > { %v6668_v44 = vpop.eup %6667 }
 0x6d9   : > { %v5655_v50 = vmul.f32 0.6931472, %v6668_v44 }
 0x6da   : > { %v6670_v51 = vpop.eup %6669 }
 0x6db   : > { %v5658_v55 = vsub.f32 %v4727_v45, %v5655_v50  ;;  %v5657_v1 = vmul.f32 0.6931472, %v6670_v51 }
 0x6dd   : > { %v5659_v7 = vsub.f32 %v4729_v52, %v5657_v1  ;;  %v5660_v63 = vand.u32 2147483647, %v5658_v55 }
 0x6df   : > { %v5661_v22 = vand.u32 2147483647, %v5659_v7 }
 0x6e1   : > { %v5687_v23 = vsel %vm5685_vm3, %v5661_v22, 0.0 }
 0x6e2   : > { %v5694_v30 = vadd.f32 %v5687_v23, %v5660_v63 }
 0x6e4   : > { %v5695_v41 = vrot.slane %v5694_v30, 4 }
 0x6e6   : > { %v5696_v33 = vadd.f32 %v5695_v41, %v5694_v30 }
 0x6e8   : > { %v5697_v25 = vrot.slane %v5696_v33, 2 }
 0x6ea   : > { %v5698_v39 = vadd.f32 %v5697_v25, %v5696_v33 }
 0x6ec   : > { %v5699_v6 = vrot.slane %v5698_v39, 1 }
 0x6ee   : > { %v5700_v56 = vadd.f32 %v5699_v6, %v5698_v39 }
 0x6f0   : > { %5701 = vst [vmem:[%s463_s11] sm:$0x1] %v5700_v56 }
 0x6f1 PF: > { %s16_s23 = sadd.s32 1, %s6725_s23   ;;  %s12277_s21 = smov %s6721_s22 }
 0x6f2   : > { %p13_p5 = scmp.ge.s32.totalorder %s16_s23, 4   ;;  %s12278_s22 = smov %s12280_s24 }
 0x6f4   :  { %15 = sbr.rel (!%p13_p5) target bundleno = 2 (0x2), region = 95 }

</bundles_post_ra>
